<compile_context>
chip_gen: v7x
topology: tpu7x:2x2x1
jax: 0.10.0
libtpu: 0.0.40
codegen_flags: <defaults>
</compile_context>

<pallas_src>
import functools

import numpy as np

import jax
import jax.numpy as jnp
from jax.experimental import pallas as pl
from jax.experimental.pallas import tpu as pltpu


# ----------------------------------------------------------------------------
# Fused whole-network kernel
# ----------------------------------------------------------------------------
def _net_kernel(x_ref, w1_ref, b1_ref, w2_ref, b2_ref,
                wf1_ref, bf1_ref, wf2_ref, bf2_ref, wf3_ref, bf3_ref,
                o_ref, p1_ref, p2_ref, *, bt):
    """One batch tile (bt images): conv1+pool1 -> conv2+pool2 -> fc1/fc2/fc3.

    x_ref : (80*bt, 48) f32   phase-packed input rows (u*8+v)*bt + b,
                              lanes (r*4+q)*3 + c  (zero padded rows at the end)
    w1_ref: (4, 48, 192) bf16 conv1 effective weights per row-shift (sig,tau);
                              output lanes = (pool_dh*2+pool_dw)*48 + parity*12 + cout
    w2_ref: (9, 48, 144) bf16 conv2 effective weights per row-shift;
                              output lanes = (pool_dh*2+pool_dw)*36 + cout
    p1_ref: (64*bt, 48) f32   pooled conv1 (parity-packed lanes), VMEM scratch
    p2_ref: (40*bt, 36) f32   pooled conv2, VMEM scratch
    o_ref : (bt, 101)   f32
    """
    f32 = jnp.float32
    bf16 = jnp.bfloat16
    m1 = 64 * bt           # conv1/pool1 output rows: (s*8+t)*bt + b, s,t in [0,8)
    m2 = 40 * bt           # conv2/pool2 output rows: (g*8+h)*bt + b, g in [0,5)

    # ---- conv1 (5x5, 3->12) + bias + ReLU + 2x2 max pool -------------------
    acc = None
    for sig in range(2):
        for tau in range(2):
            xs = x_ref[pl.ds((sig * 8 + tau) * bt, m1), :].astype(bf16)
            t = jnp.dot(xs, w1_ref[sig * 2 + tau],
                        preferred_element_type=f32)              # (m1, 192)
            acc = t if acc is None else acc + t
    # max over the 4 pool-window offsets (48-lane blocks), then bias + ReLU
    p1 = jnp.maximum(jnp.maximum(acc[:, 0:48], acc[:, 48:96]),
                     jnp.maximum(acc[:, 96:144], acc[:, 144:192]))
    p1 = jnp.maximum(p1 + b1_ref[...], 0.0)
    p1_ref[...] = p1                                             # (m1, 48) f32

    # ---- conv2 (5x5, 12->36) + bias + ReLU + 2x2 max pool ------------------
    acc = None
    for sig in range(3):
        for tau in range(3):
            xs = p1_ref[pl.ds((sig * 8 + tau) * bt, m2), :].astype(bf16)
            t = jnp.dot(xs, w2_ref[sig * 3 + tau],
                        preferred_element_type=f32)              # (m2, 144)
            acc = t if acc is None else acc + t
    p2 = jnp.maximum(jnp.maximum(acc[:, 0:36], acc[:, 36:72]),
                     jnp.maximum(acc[:, 72:108], acc[:, 108:144]))
    p2 = jnp.maximum(p2 + b2_ref[...], 0.0)
    p2_ref[...] = p2                                             # (m2, 36) f32

    # ---- flatten the 5x5 valid positions + fc1 -> ReLU -> fc2 -> ReLU -> fc3
    feats = [p2_ref[pl.ds((g * 8 + h) * bt, bt), :]
             for g in range(5) for h in range(5)]
    z = jnp.concatenate(feats, axis=-1).astype(bf16)             # (bt, 900)
    z = jnp.dot(z, wf1_ref[...], preferred_element_type=f32)
    z = jnp.maximum(z + bf1_ref[...], 0.0).astype(bf16)
    z = jnp.dot(z, wf2_ref[...], preferred_element_type=f32)
    z = jnp.maximum(z + bf2_ref[...], 0.0).astype(bf16)
    z = jnp.dot(z, wf3_ref[...], preferred_element_type=f32)
    o_ref[...] = (z + bf3_ref[...]).astype(o_ref.dtype)          # (bt, 101)


# ----------------------------------------------------------------------------
# Parameter init (PyTorch layouts) and one-time repacking for the kernel
# ----------------------------------------------------------------------------
def init_params(key):
    """PyTorch-style uniform(+-1/sqrt(fan_in)) init, PyTorch weight layouts."""
    def u(k, shape, fan_in):
        bound = float(fan_in) ** -0.5
        return jax.random.uniform(k, shape, jnp.float32, -bound, bound)

    ks = jax.random.split(key, 10)
    return {
        "conv1_w": u(ks[0], (12, 3, 5, 5), 3 * 25),
        "conv1_b": u(ks[1], (12,), 3 * 25),
        "conv2_w": u(ks[2], (36, 12, 5, 5), 12 * 25),
        "conv2_b": u(ks[3], (36,), 12 * 25),
        "fc1_w": u(ks[4], (720, 900), 900),     # (out, in) like nn.Linear
        "fc1_b": u(ks[5], (720,), 900),
        "fc2_w": u(ks[6], (144, 720), 720),
        "fc2_b": u(ks[7], (144,), 720),
        "fc3_w": u(ks[8], (101, 144), 144),
        "fc3_b": u(ks[9], (101,), 144),
    }


def prepare_params(params):
    """One-time repack of PyTorch-layout weights into the kernel's layout."""
    w1 = np.asarray(params["conv1_w"], np.float32)       # (12, 3, 5, 5)
    w2 = np.asarray(params["conv2_w"], np.float32)       # (36, 12, 5, 5)

    # conv1 effective weights: per row-shift (sig,tau in {0,1}), (48 -> 192)
    # input rows  : (r*4+q)*3 + cin   (input phase r,q in [0,4))
    # output lanes: ((dh*2+dw)*4 + (a*2+b))*12 + cout
    #   (dh,dw) = 2x2 pool offset, (a,b) = parity of the pooled conv1 output.
    w1e = np.zeros((2, 2, 48, 192), np.float32)
    for a in range(2):
        for bq in range(2):
            for dh in range(2):
                for dw in range(2):
                    col0 = ((dh * 2 + dw) * 4 + (a * 2 + bq)) * 12
                    for i in range(5):
                        for j in range(5):
                            sig, r = divmod(2 * a + dh + i, 4)
                            tau, q = divmod(2 * bq + dw + j, 4)
                            row0 = (r * 4 + q) * 3
                            w1e[sig, tau, row0:row0 + 3, col0:col0 + 12] = \
                                w1[:, :, i, j].T
    w1e = w1e.reshape(4, 48, 192)

    # conv2 effective weights: per row-shift (sig,tau in {0,1,2}), (48 -> 144)
    # input rows  : (a*2+b)*12 + c1   (parity-packed pooled conv1 lanes)
    # output lanes: (dh*2+dw)*36 + cout
    w2e = np.zeros((3, 3, 48, 144), np.float32)
    for dh in range(2):
        for dw in range(2):
            col0 = (dh * 2 + dw) * 36
            for i in range(5):
                for j in range(5):
                    sig, a = divmod(dh + i, 2)
                    tau, bq = divmod(dw + j, 2)
                    row0 = (a * 2 + bq) * 12
                    w2e[sig, tau, row0:row0 + 12, col0:col0 + 36] = \
                        w2[:, :, i, j].T
    w2e = w2e.reshape(9, 48, 144)

    # fc1: pre-permute rows ONCE from PyTorch flatten order (c, g, h) to the
    # kernel's flatten order (g, h, c); store (in, out).
    f1 = np.asarray(params["fc1_w"], np.float32).reshape(720, 36, 5, 5)
    wf1 = np.transpose(f1, (2, 3, 1, 0)).reshape(900, 720)

    b1e = np.tile(np.asarray(params["conv1_b"], np.float32), 4).reshape(1, 48)

    return {
        "w1e": jnp.asarray(w1e, jnp.bfloat16),
        "b1e": jnp.asarray(b1e, jnp.float32),
        "w2e": jnp.asarray(w2e, jnp.bfloat16),
        "b2e": jnp.asarray(params["conv2_b"], jnp.float32).reshape(1, 36),
        "wf1": jnp.asarray(wf1, jnp.bfloat16),
        "bf1": jnp.asarray(params["fc1_b"], jnp.float32).reshape(1, 720),
        "wf2": jnp.asarray(np.asarray(params["fc2_w"], np.float32).T,
                           jnp.bfloat16),
        "bf2": jnp.asarray(params["fc2_b"], jnp.float32).reshape(1, 144),
        "wf3": jnp.asarray(np.asarray(params["fc3_w"], np.float32).T,
                           jnp.bfloat16),
        "bf3": jnp.asarray(params["fc3_b"], jnp.float32).reshape(1, 101),
    }


# ----------------------------------------------------------------------------
# Forward pass (single fused pallas_call)
# ----------------------------------------------------------------------------
def _tiling(batch):
    """Batch tile size / number of tiles: >=2 grid steps when B>=2, tile<=32."""
    if batch <= 1:
        return 1, 1
    bt_cap = 32
    nb = max(2, -(-batch // bt_cap))
    bt = -(-batch // nb)
    return bt, nb


def net_forward(prep, x_nchw):
    """x_nchw: (B, 3, 32, 32) float. Returns (B, 101) float32."""
    B = x_nchw.shape[0]
    bt, nb = _tiling(B)
    bpad = bt * nb

    x = x_nchw.astype(jnp.float32)
    if bpad != B:
        x = jnp.pad(x, ((0, bpad - B), (0, 0), (0, 0), (0, 0)))
    # Phase-decompose the raw input mod-4 in each spatial dim; rows are
    # position-major with the batch tile innermost, lanes are (r, q, c).
    # This is the only wrapper-side data movement (no 25x im2col expansion).
    x = x.reshape(nb, bt, 3, 8, 4, 8, 4)
    x = jnp.transpose(x, (0, 3, 5, 1, 4, 6, 2))      # (nb, 8, 8, bt, 4, 4, 3)
    x = x.reshape(nb, 64 * bt, 48)
    x = jnp.pad(x, ((0, 0), (0, 16 * bt), (0, 0)))   # rows 64*bt -> 80*bt

    out = pl.pallas_call(
        functools.partial(_net_kernel, bt=bt),
        out_shape=jax.ShapeDtypeStruct((nb, bt, 101), jnp.float32),
        grid=(nb,),
        in_specs=[
            pl.BlockSpec((None, 80 * bt, 48), lambda i: (i, 0, 0)),
            pl.BlockSpec((4, 48, 192), lambda i: (0, 0, 0)),
            pl.BlockSpec((1, 48), lambda i: (0, 0)),
            pl.BlockSpec((9, 48, 144), lambda i: (0, 0, 0)),
            pl.BlockSpec((1, 36), lambda i: (0, 0)),
            pl.BlockSpec((900, 720), lambda i: (0, 0)),
            pl.BlockSpec((1, 720), lambda i: (0, 0)),
            pl.BlockSpec((720, 144), lambda i: (0, 0)),
            pl.BlockSpec((1, 144), lambda i: (0, 0)),
            pl.BlockSpec((144, 101), lambda i: (0, 0)),
            pl.BlockSpec((1, 101), lambda i: (0, 0)),
        ],
        out_specs=pl.BlockSpec((None, bt, 101), lambda i: (i, 0, 0)),
        scratch_shapes=[
            pltpu.VMEM((64 * bt, 48), jnp.float32),   # pooled conv1 (parity-packed)
            pltpu.VMEM((40 * bt, 36), jnp.float32),   # pooled conv2
        ],
        compiler_params=pltpu.CompilerParams(
            dimension_semantics=("parallel",)),
    )(x, prep["w1e"], prep["b1e"], prep["w2e"], prep["b2e"],
      prep["wf1"], prep["bf1"], prep["wf2"], prep["bf2"],
      prep["wf3"], prep["bf3"])

    out = out.reshape(bpad, 101)
    if bpad != B:
        out = out[:B]
    return out


# ----------------------------------------------------------------------------
# Pure-JAX reference with the same bf16 mixed precision (correctness check)
# ----------------------------------------------------------------------------
def net_forward_ref(params, x_nchw):
    x = jnp.transpose(x_nchw, (0, 2, 3, 1)).astype(jnp.float32)

    def conv_relu_pool_ref(x, w, b):
        y = jax.lax.conv_general_dilated(
            x.astype(jnp.bfloat16),
            jnp.transpose(w, (2, 3, 1, 0)).astype(jnp.bfloat16),
            (1, 1), "VALID",
            dimension_numbers=("NHWC", "HWIO", "NHWC"),
            preferred_element_type=jnp.float32)
        y = jnp.maximum(y + b[None, None, None, :].astype(jnp.float32), 0.0)
        B_, H, W, C = y.shape
        return jnp.max(y.reshape(B_, H // 2, 2, W // 2, 2, C), axis=(2, 4))

    x = conv_relu_pool_ref(x, params["conv1_w"], params["conv1_b"])
    x = conv_relu_pool_ref(x, params["conv2_w"], params["conv2_b"])
    B_ = x.shape[0]
    x = jnp.transpose(x, (0, 3, 1, 2)).reshape(B_, 36 * 5 * 5)

    def fc(x, w, b, relu):
        y = jnp.dot(x.astype(jnp.bfloat16), w.T.astype(jnp.bfloat16),
                    preferred_element_type=jnp.float32) + b.astype(jnp.float32)
        if relu:
            y = jnp.maximum(y, 0.0).astype(jnp.bfloat16)
        return y

    x = fc(x, params["fc1_w"], params["fc1_b"], True)
    x = fc(x, params["fc2_w"], params["fc2_b"], True)
    x = fc(x, params["fc3_w"], params["fc3_b"], False)
    return x


if __name__ == "__main__":
    key = jax.random.PRNGKey(0)
    k_param, k_x = jax.random.split(key)
    params = init_params(k_param)
    prep = prepare_params(params)          # one-time weight repack / permute

    # Input must be (B, 3, 32, 32) for the 36*5*5 flatten to hold.
    x = jax.random.normal(k_x, (2, 3, 32, 32), jnp.float32)

    out = jax.block_until_ready(jax.jit(net_forward)(prep, x))
    assert out.shape == (2, 101), out.shape

    ref = jax.block_until_ready(net_forward_ref(params, x))
    max_err = float(jnp.max(jnp.abs(out - ref)))
    # Tolerance covers bf16-operand / f32-accumulation order differences
    # between the fused Pallas path and the XLA reference.
    assert jnp.allclose(out, ref, rtol=2e-2, atol=2e-2), max_err

    print("KERNEL_OK")
</pallas_src>

<mosaic_0001>
module attributes {stable_mosaic.version = 11 : i64} {
  func.func @_net_kernel(%arg0: i32, %arg1: memref<1x80x48xf32, #tpu.memory_space<vmem>>, %arg2: memref<4x48x192xbf16, #tpu.memory_space<vmem>>, %arg3: memref<1x48xf32, #tpu.memory_space<vmem>>, %arg4: memref<9x48x144xbf16, #tpu.memory_space<vmem>>, %arg5: memref<1x36xf32, #tpu.memory_space<vmem>>, %arg6: memref<900x720xbf16, #tpu.memory_space<vmem>>, %arg7: memref<1x720xf32, #tpu.memory_space<vmem>>, %arg8: memref<720x144xbf16, #tpu.memory_space<vmem>>, %arg9: memref<1x144xf32, #tpu.memory_space<vmem>>, %arg10: memref<144x101xbf16, #tpu.memory_space<vmem>>, %arg11: memref<1x101xf32, #tpu.memory_space<vmem>>, %arg12: memref<1x1x101xf32, #tpu.memory_space<vmem>>, %arg13: memref<64x48xf32, #tpu.memory_space<vmem>>, %arg14: memref<40x36xf32, #tpu.memory_space<vmem>>) attributes {dimension_semantics = [#tpu.dimension_semantics<parallel>], iteration_bounds = array<i64: 2>, scalar_prefetch = 0 : i64, scratch_operands = 2 : i64, tpu.core_type = #tpu.core_type<tc>, window_params = [{transform_indices = @transform_0, window_bounds = array<i64: 1, 80, 48>}, {pipeline_mode = #tpu.pipeline_mode<synchronous>, transform_indices = @transform_1, window_bounds = array<i64: 4, 48, 192>}, {pipeline_mode = #tpu.pipeline_mode<synchronous>, transform_indices = @transform_2, window_bounds = array<i64: 1, 48>}, {pipeline_mode = #tpu.pipeline_mode<synchronous>, transform_indices = @transform_3, window_bounds = array<i64: 9, 48, 144>}, {pipeline_mode = #tpu.pipeline_mode<synchronous>, transform_indices = @transform_4, window_bounds = array<i64: 1, 36>}, {pipeline_mode = #tpu.pipeline_mode<synchronous>, transform_indices = @transform_5, window_bounds = array<i64: 900, 720>}, {pipeline_mode = #tpu.pipeline_mode<synchronous>, transform_indices = @transform_6, window_bounds = array<i64: 1, 720>}, {pipeline_mode = #tpu.pipeline_mode<synchronous>, transform_indices = @transform_7, window_bounds = array<i64: 720, 144>}, {pipeline_mode = #tpu.pipeline_mode<synchronous>, transform_indices = @transform_8, window_bounds = array<i64: 1, 144>}, {pipeline_mode = #tpu.pipeline_mode<synchronous>, transform_indices = @transform_9, window_bounds = array<i64: 144, 101>}, {pipeline_mode = #tpu.pipeline_mode<synchronous>, transform_indices = @transform_10, window_bounds = array<i64: 1, 101>}, {transform_indices = @transform_11, window_bounds = array<i64: 1, 1, 101>}]} {
    %c0 = arith.constant 0 : index
    %c0_0 = arith.constant 0 : index
    %c0_1 = arith.constant 0 : index
    %0 = vector.load %arg1[%c0, %c0_0, %c0_1] : memref<1x80x48xf32, #tpu.memory_space<vmem>>, vector<1x64x48xf32>
    %1 = vector.shape_cast %0 : vector<1x64x48xf32> to vector<64x48xf32>
    %2 = arith.truncf %1 : vector<64x48xf32> to vector<64x48xbf16>
    %c0_2 = arith.constant 0 : index
    %c0_3 = arith.constant 0 : index
    %c0_4 = arith.constant 0 : index
    %3 = vector.load %arg2[%c0_2, %c0_3, %c0_4] : memref<4x48x192xbf16, #tpu.memory_space<vmem>>, vector<1x48x192xbf16>
    %4 = vector.shape_cast %3 : vector<1x48x192xbf16> to vector<48x192xbf16>
    %cst = arith.constant dense<0.000000e+00> : vector<64x192xf32>
    %5 = tpu.matmul %2, %4, %cst {dimension_numbers = #tpu.dot_dimension_numbers<[1], [0], [0], [1], [0, 0, 1, 1], [], []>} : vector<64x48xbf16>, vector<48x192xbf16>, vector<64x192xf32> -> vector<64x192xf32>
    %c0_5 = arith.constant 0 : index
    %c1 = arith.constant 1 : index
    %c0_6 = arith.constant 0 : index
    %6 = vector.load %arg1[%c0_5, %c1, %c0_6] : memref<1x80x48xf32, #tpu.memory_space<vmem>>, vector<1x64x48xf32>
    %7 = vector.shape_cast %6 : vector<1x64x48xf32> to vector<64x48xf32>
    %8 = arith.truncf %7 : vector<64x48xf32> to vector<64x48xbf16>
    %c1_7 = arith.constant 1 : index
    %c0_8 = arith.constant 0 : index
    %c0_9 = arith.constant 0 : index
    %9 = vector.load %arg2[%c1_7, %c0_8, %c0_9] : memref<4x48x192xbf16, #tpu.memory_space<vmem>>, vector<1x48x192xbf16>
    %10 = vector.shape_cast %9 : vector<1x48x192xbf16> to vector<48x192xbf16>
    %cst_10 = arith.constant dense<0.000000e+00> : vector<64x192xf32>
    %11 = tpu.matmul %8, %10, %cst_10 {dimension_numbers = #tpu.dot_dimension_numbers<[1], [0], [0], [1], [0, 0, 1, 1], [], []>} : vector<64x48xbf16>, vector<48x192xbf16>, vector<64x192xf32> -> vector<64x192xf32>
    %12 = arith.addf %5, %11 : vector<64x192xf32>
    %c0_11 = arith.constant 0 : index
    %c8 = arith.constant 8 : index
    %c0_12 = arith.constant 0 : index
    %13 = vector.load %arg1[%c0_11, %c8, %c0_12] : memref<1x80x48xf32, #tpu.memory_space<vmem>>, vector<1x64x48xf32>
    %14 = vector.shape_cast %13 : vector<1x64x48xf32> to vector<64x48xf32>
    %15 = arith.truncf %14 : vector<64x48xf32> to vector<64x48xbf16>
    %c2 = arith.constant 2 : index
    %c0_13 = arith.constant 0 : index
    %c0_14 = arith.constant 0 : index
    %16 = vector.load %arg2[%c2, %c0_13, %c0_14] : memref<4x48x192xbf16, #tpu.memory_space<vmem>>, vector<1x48x192xbf16>
    %17 = vector.shape_cast %16 : vector<1x48x192xbf16> to vector<48x192xbf16>
    %cst_15 = arith.constant dense<0.000000e+00> : vector<64x192xf32>
    %18 = tpu.matmul %15, %17, %cst_15 {dimension_numbers = #tpu.dot_dimension_numbers<[1], [0], [0], [1], [0, 0, 1, 1], [], []>} : vector<64x48xbf16>, vector<48x192xbf16>, vector<64x192xf32> -> vector<64x192xf32>
    %19 = arith.addf %12, %18 : vector<64x192xf32>
    %c0_16 = arith.constant 0 : index
    %c9 = arith.constant 9 : index
    %c0_17 = arith.constant 0 : index
    %20 = vector.load %arg1[%c0_16, %c9, %c0_17] : memref<1x80x48xf32, #tpu.memory_space<vmem>>, vector<1x64x48xf32>
    %21 = vector.shape_cast %20 : vector<1x64x48xf32> to vector<64x48xf32>
    %22 = arith.truncf %21 : vector<64x48xf32> to vector<64x48xbf16>
    %c3 = arith.constant 3 : index
    %c0_18 = arith.constant 0 : index
    %c0_19 = arith.constant 0 : index
    %23 = vector.load %arg2[%c3, %c0_18, %c0_19] : memref<4x48x192xbf16, #tpu.memory_space<vmem>>, vector<1x48x192xbf16>
    %24 = vector.shape_cast %23 : vector<1x48x192xbf16> to vector<48x192xbf16>
    %cst_20 = arith.constant dense<0.000000e+00> : vector<64x192xf32>
    %25 = tpu.matmul %22, %24, %cst_20 {dimension_numbers = #tpu.dot_dimension_numbers<[1], [0], [0], [1], [0, 0, 1, 1], [], []>} : vector<64x48xbf16>, vector<48x192xbf16>, vector<64x192xf32> -> vector<64x192xf32>
    %26 = arith.addf %19, %25 : vector<64x192xf32>
    %27 = vector.extract_strided_slice %26 {offsets = [0, 0], sizes = [64, 48], strides = [1, 1]} : vector<64x192xf32> to vector<64x48xf32>
    %28 = vector.extract_strided_slice %26 {offsets = [0, 48], sizes = [64, 48], strides = [1, 1]} : vector<64x192xf32> to vector<64x48xf32>
    %29 = arith.maximumf %27, %28 : vector<64x48xf32>
    %30 = vector.extract_strided_slice %26 {offsets = [0, 96], sizes = [64, 48], strides = [1, 1]} : vector<64x192xf32> to vector<64x48xf32>
    %31 = vector.extract_strided_slice %26 {offsets = [0, 144], sizes = [64, 48], strides = [1, 1]} : vector<64x192xf32> to vector<64x48xf32>
    %32 = arith.maximumf %30, %31 : vector<64x48xf32>
    %33 = arith.maximumf %29, %32 : vector<64x48xf32>
    %c0_21 = arith.constant 0 : index
    %c0_22 = arith.constant 0 : index
    %34 = vector.load %arg3[%c0_21, %c0_22] : memref<1x48xf32, #tpu.memory_space<vmem>>, vector<1x48xf32>
    %35 = vector.broadcast %34 : vector<1x48xf32> to vector<64x48xf32>
    %36 = arith.addf %33, %35 : vector<64x48xf32>
    %cst_23 = arith.constant 0.000000e+00 : f32
    %37 = vector.broadcast %cst_23 : f32 to vector<64x48xf32>
    %38 = arith.maximumf %36, %37 : vector<64x48xf32>
    %c0_24 = arith.constant 0 : index
    %c0_25 = arith.constant 0 : index
    %39 = vector.load %arg13[%c0_24, %c0_25] : memref<64x48xf32, #tpu.memory_space<vmem>>, vector<64x48xf32>
    tpu.vector_store %arg13[%c0_24, %c0_25], %38 {strides = array<i32>} : memref<64x48xf32, #tpu.memory_space<vmem>>, vector<64x48xf32>,
    %c0_26 = arith.constant 0 : index
    %c0_27 = arith.constant 0 : index
    %40 = vector.load %arg13[%c0_26, %c0_27] : memref<64x48xf32, #tpu.memory_space<vmem>>, vector<40x48xf32>
    %41 = arith.truncf %40 : vector<40x48xf32> to vector<40x48xbf16>
    %c0_28 = arith.constant 0 : index
    %c0_29 = arith.constant 0 : index
    %c0_30 = arith.constant 0 : index
    %42 = vector.load %arg4[%c0_28, %c0_29, %c0_30] : memref<9x48x144xbf16, #tpu.memory_space<vmem>>, vector<1x48x144xbf16>
    %43 = vector.shape_cast %42 : vector<1x48x144xbf16> to vector<48x144xbf16>
    %cst_31 = arith.constant dense<0.000000e+00> : vector<40x144xf32>
    %44 = tpu.matmul %41, %43, %cst_31 {dimension_numbers = #tpu.dot_dimension_numbers<[1], [0], [0], [1], [0, 0, 1, 1], [], []>} : vector<40x48xbf16>, vector<48x144xbf16>, vector<40x144xf32> -> vector<40x144xf32>
    %c1_32 = arith.constant 1 : index
    %c0_33 = arith.constant 0 : index
    %45 = vector.load %arg13[%c1_32, %c0_33] : memref<64x48xf32, #tpu.memory_space<vmem>>, vector<40x48xf32>
    %46 = arith.truncf %45 : vector<40x48xf32> to vector<40x48xbf16>
    %c1_34 = arith.constant 1 : index
    %c0_35 = arith.constant 0 : index
    %c0_36 = arith.constant 0 : index
    %47 = vector.load %arg4[%c1_34, %c0_35, %c0_36] : memref<9x48x144xbf16, #tpu.memory_space<vmem>>, vector<1x48x144xbf16>
    %48 = vector.shape_cast %47 : vector<1x48x144xbf16> to vector<48x144xbf16>
    %cst_37 = arith.constant dense<0.000000e+00> : vector<40x144xf32>
    %49 = tpu.matmul %46, %48, %cst_37 {dimension_numbers = #tpu.dot_dimension_numbers<[1], [0], [0], [1], [0, 0, 1, 1], [], []>} : vector<40x48xbf16>, vector<48x144xbf16>, vector<40x144xf32> -> vector<40x144xf32>
    %50 = arith.addf %44, %49 : vector<40x144xf32>
    %c2_38 = arith.constant 2 : index
    %c0_39 = arith.constant 0 : index
    %51 = vector.load %arg13[%c2_38, %c0_39] : memref<64x48xf32, #tpu.memory_space<vmem>>, vector<40x48xf32>
    %52 = arith.truncf %51 : vector<40x48xf32> to vector<40x48xbf16>
    %c2_40 = arith.constant 2 : index
    %c0_41 = arith.constant 0 : index
    %c0_42 = arith.constant 0 : index
    %53 = vector.load %arg4[%c2_40, %c0_41, %c0_42] : memref<9x48x144xbf16, #tpu.memory_space<vmem>>, vector<1x48x144xbf16>
    %54 = vector.shape_cast %53 : vector<1x48x144xbf16> to vector<48x144xbf16>
    %cst_43 = arith.constant dense<0.000000e+00> : vector<40x144xf32>
    %55 = tpu.matmul %52, %54, %cst_43 {dimension_numbers = #tpu.dot_dimension_numbers<[1], [0], [0], [1], [0, 0, 1, 1], [], []>} : vector<40x48xbf16>, vector<48x144xbf16>, vector<40x144xf32> -> vector<40x144xf32>
    %56 = arith.addf %50, %55 : vector<40x144xf32>
    %c8_44 = arith.constant 8 : index
    %c0_45 = arith.constant 0 : index
    %57 = vector.load %arg13[%c8_44, %c0_45] : memref<64x48xf32, #tpu.memory_space<vmem>>, vector<40x48xf32>
    %58 = arith.truncf %57 : vector<40x48xf32> to vector<40x48xbf16>
    %c3_46 = arith.constant 3 : index
    %c0_47 = arith.constant 0 : index
    %c0_48 = arith.constant 0 : index
    %59 = vector.load %arg4[%c3_46, %c0_47, %c0_48] : memref<9x48x144xbf16, #tpu.memory_space<vmem>>, vector<1x48x144xbf16>
    %60 = vector.shape_cast %59 : vector<1x48x144xbf16> to vector<48x144xbf16>
    %cst_49 = arith.constant dense<0.000000e+00> : vector<40x144xf32>
    %61 = tpu.matmul %58, %60, %cst_49 {dimension_numbers = #tpu.dot_dimension_numbers<[1], [0], [0], [1], [0, 0, 1, 1], [], []>} : vector<40x48xbf16>, vector<48x144xbf16>, vector<40x144xf32> -> vector<40x144xf32>
    %62 = arith.addf %56, %61 : vector<40x144xf32>
    %c9_50 = arith.constant 9 : index
    %c0_51 = arith.constant 0 : index
    %63 = vector.load %arg13[%c9_50, %c0_51] : memref<64x48xf32, #tpu.memory_space<vmem>>, vector<40x48xf32>
    %64 = arith.truncf %63 : vector<40x48xf32> to vector<40x48xbf16>
    %c4 = arith.constant 4 : index
    %c0_52 = arith.constant 0 : index
    %c0_53 = arith.constant 0 : index
    %65 = vector.load %arg4[%c4, %c0_52, %c0_53] : memref<9x48x144xbf16, #tpu.memory_space<vmem>>, vector<1x48x144xbf16>
    %66 = vector.shape_cast %65 : vector<1x48x144xbf16> to vector<48x144xbf16>
    %cst_54 = arith.constant dense<0.000000e+00> : vector<40x144xf32>
    %67 = tpu.matmul %64, %66, %cst_54 {dimension_numbers = #tpu.dot_dimension_numbers<[1], [0], [0], [1], [0, 0, 1, 1], [], []>} : vector<40x48xbf16>, vector<48x144xbf16>, vector<40x144xf32> -> vector<40x144xf32>
    %68 = arith.addf %62, %67 : vector<40x144xf32>
    %c10 = arith.constant 10 : index
    %c0_55 = arith.constant 0 : index
    %69 = vector.load %arg13[%c10, %c0_55] : memref<64x48xf32, #tpu.memory_space<vmem>>, vector<40x48xf32>
    %70 = arith.truncf %69 : vector<40x48xf32> to vector<40x48xbf16>
    %c5 = arith.constant 5 : index
    %c0_56 = arith.constant 0 : index
    %c0_57 = arith.constant 0 : index
    %71 = vector.load %arg4[%c5, %c0_56, %c0_57] : memref<9x48x144xbf16, #tpu.memory_space<vmem>>, vector<1x48x144xbf16>
    %72 = vector.shape_cast %71 : vector<1x48x144xbf16> to vector<48x144xbf16>
    %cst_58 = arith.constant dense<0.000000e+00> : vector<40x144xf32>
    %73 = tpu.matmul %70, %72, %cst_58 {dimension_numbers = #tpu.dot_dimension_numbers<[1], [0], [0], [1], [0, 0, 1, 1], [], []>} : vector<40x48xbf16>, vector<48x144xbf16>, vector<40x144xf32> -> vector<40x144xf32>
    %74 = arith.addf %68, %73 : vector<40x144xf32>
    %c16 = arith.constant 16 : index
    %c0_59 = arith.constant 0 : index
    %75 = vector.load %arg13[%c16, %c0_59] : memref<64x48xf32, #tpu.memory_space<vmem>>, vector<40x48xf32>
    %76 = arith.truncf %75 : vector<40x48xf32> to vector<40x48xbf16>
    %c6 = arith.constant 6 : index
    %c0_60 = arith.constant 0 : index
    %c0_61 = arith.constant 0 : index
    %77 = vector.load %arg4[%c6, %c0_60, %c0_61] : memref<9x48x144xbf16, #tpu.memory_space<vmem>>, vector<1x48x144xbf16>
    %78 = vector.shape_cast %77 : vector<1x48x144xbf16> to vector<48x144xbf16>
    %cst_62 = arith.constant dense<0.000000e+00> : vector<40x144xf32>
    %79 = tpu.matmul %76, %78, %cst_62 {dimension_numbers = #tpu.dot_dimension_numbers<[1], [0], [0], [1], [0, 0, 1, 1], [], []>} : vector<40x48xbf16>, vector<48x144xbf16>, vector<40x144xf32> -> vector<40x144xf32>
    %80 = arith.addf %74, %79 : vector<40x144xf32>
    %c17 = arith.constant 17 : index
    %c0_63 = arith.constant 0 : index
    %81 = vector.load %arg13[%c17, %c0_63] : memref<64x48xf32, #tpu.memory_space<vmem>>, vector<40x48xf32>
    %82 = arith.truncf %81 : vector<40x48xf32> to vector<40x48xbf16>
    %c7 = arith.constant 7 : index
    %c0_64 = arith.constant 0 : index
    %c0_65 = arith.constant 0 : index
    %83 = vector.load %arg4[%c7, %c0_64, %c0_65] : memref<9x48x144xbf16, #tpu.memory_space<vmem>>, vector<1x48x144xbf16>
    %84 = vector.shape_cast %83 : vector<1x48x144xbf16> to vector<48x144xbf16>
    %cst_66 = arith.constant dense<0.000000e+00> : vector<40x144xf32>
    %85 = tpu.matmul %82, %84, %cst_66 {dimension_numbers = #tpu.dot_dimension_numbers<[1], [0], [0], [1], [0, 0, 1, 1], [], []>} : vector<40x48xbf16>, vector<48x144xbf16>, vector<40x144xf32> -> vector<40x144xf32>
    %86 = arith.addf %80, %85 : vector<40x144xf32>
    %c18 = arith.constant 18 : index
    %c0_67 = arith.constant 0 : index
    %87 = vector.load %arg13[%c18, %c0_67] : memref<64x48xf32, #tpu.memory_space<vmem>>, vector<40x48xf32>
    %88 = arith.truncf %87 : vector<40x48xf32> to vector<40x48xbf16>
    %c8_68 = arith.constant 8 : index
    %c0_69 = arith.constant 0 : index
    %c0_70 = arith.constant 0 : index
    %89 = vector.load %arg4[%c8_68, %c0_69, %c0_70] : memref<9x48x144xbf16, #tpu.memory_space<vmem>>, vector<1x48x144xbf16>
    %90 = vector.shape_cast %89 : vector<1x48x144xbf16> to vector<48x144xbf16>
    %cst_71 = arith.constant dense<0.000000e+00> : vector<40x144xf32>
    %91 = tpu.matmul %88, %90, %cst_71 {dimension_numbers = #tpu.dot_dimension_numbers<[1], [0], [0], [1], [0, 0, 1, 1], [], []>} : vector<40x48xbf16>, vector<48x144xbf16>, vector<40x144xf32> -> vector<40x144xf32>
    %92 = arith.addf %86, %91 : vector<40x144xf32>
    %93 = vector.extract_strided_slice %92 {offsets = [0, 0], sizes = [40, 36], strides = [1, 1]} : vector<40x144xf32> to vector<40x36xf32>
    %94 = vector.extract_strided_slice %92 {offsets = [0, 36], sizes = [40, 36], strides = [1, 1]} : vector<40x144xf32> to vector<40x36xf32>
    %95 = arith.maximumf %93, %94 : vector<40x36xf32>
    %96 = vector.extract_strided_slice %92 {offsets = [0, 72], sizes = [40, 36], strides = [1, 1]} : vector<40x144xf32> to vector<40x36xf32>
    %97 = vector.extract_strided_slice %92 {offsets = [0, 108], sizes = [40, 36], strides = [1, 1]} : vector<40x144xf32> to vector<40x36xf32>
    %98 = arith.maximumf %96, %97 : vector<40x36xf32>
    %99 = arith.maximumf %95, %98 : vector<40x36xf32>
    %c0_72 = arith.constant 0 : index
    %c0_73 = arith.constant 0 : index
    %100 = vector.load %arg5[%c0_72, %c0_73] : memref<1x36xf32, #tpu.memory_space<vmem>>, vector<1x36xf32>
    %101 = vector.broadcast %100 : vector<1x36xf32> to vector<40x36xf32>
    %102 = arith.addf %99, %101 : vector<40x36xf32>
    %cst_74 = arith.constant 0.000000e+00 : f32
    %103 = vector.broadcast %cst_74 : f32 to vector<40x36xf32>
    %104 = arith.maximumf %102, %103 : vector<40x36xf32>
    %c0_75 = arith.constant 0 : index
    %c0_76 = arith.constant 0 : index
    %105 = vector.load %arg14[%c0_75, %c0_76] : memref<40x36xf32, #tpu.memory_space<vmem>>, vector<40x36xf32>
    tpu.vector_store %arg14[%c0_75, %c0_76], %104 {strides = array<i32>} : memref<40x36xf32, #tpu.memory_space<vmem>>, vector<40x36xf32>,
    %c0_77 = arith.constant 0 : index
    %c0_78 = arith.constant 0 : index
    %106 = vector.load %arg14[%c0_77, %c0_78] : memref<40x36xf32, #tpu.memory_space<vmem>>, vector<1x36xf32>
    %c1_79 = arith.constant 1 : index
    %c0_80 = arith.constant 0 : index
    %107 = vector.load %arg14[%c1_79, %c0_80] : memref<40x36xf32, #tpu.memory_space<vmem>>, vector<1x36xf32>
    %c2_81 = arith.constant 2 : index
    %c0_82 = arith.constant 0 : index
    %108 = vector.load %arg14[%c2_81, %c0_82] : memref<40x36xf32, #tpu.memory_space<vmem>>, vector<1x36xf32>
    %c3_83 = arith.constant 3 : index
    %c0_84 = arith.constant 0 : index
    %109 = vector.load %arg14[%c3_83, %c0_84] : memref<40x36xf32, #tpu.memory_space<vmem>>, vector<1x36xf32>
    %c4_85 = arith.constant 4 : index
    %c0_86 = arith.constant 0 : index
    %110 = vector.load %arg14[%c4_85, %c0_86] : memref<40x36xf32, #tpu.memory_space<vmem>>, vector<1x36xf32>
    %c8_87 = arith.constant 8 : index
    %c0_88 = arith.constant 0 : index
    %111 = vector.load %arg14[%c8_87, %c0_88] : memref<40x36xf32, #tpu.memory_space<vmem>>, vector<1x36xf32>
    %c9_89 = arith.constant 9 : index
    %c0_90 = arith.constant 0 : index
    %112 = vector.load %arg14[%c9_89, %c0_90] : memref<40x36xf32, #tpu.memory_space<vmem>>, vector<1x36xf32>
    %c10_91 = arith.constant 10 : index
    %c0_92 = arith.constant 0 : index
    %113 = vector.load %arg14[%c10_91, %c0_92] : memref<40x36xf32, #tpu.memory_space<vmem>>, vector<1x36xf32>
    %c11 = arith.constant 11 : index
    %c0_93 = arith.constant 0 : index
    %114 = vector.load %arg14[%c11, %c0_93] : memref<40x36xf32, #tpu.memory_space<vmem>>, vector<1x36xf32>
    %c12 = arith.constant 12 : index
    %c0_94 = arith.constant 0 : index
    %115 = vector.load %arg14[%c12, %c0_94] : memref<40x36xf32, #tpu.memory_space<vmem>>, vector<1x36xf32>
    %c16_95 = arith.constant 16 : index
    %c0_96 = arith.constant 0 : index
    %116 = vector.load %arg14[%c16_95, %c0_96] : memref<40x36xf32, #tpu.memory_space<vmem>>, vector<1x36xf32>
    %c17_97 = arith.constant 17 : index
    %c0_98 = arith.constant 0 : index
    %117 = vector.load %arg14[%c17_97, %c0_98] : memref<40x36xf32, #tpu.memory_space<vmem>>, vector<1x36xf32>
    %c18_99 = arith.constant 18 : index
    %c0_100 = arith.constant 0 : index
    %118 = vector.load %arg14[%c18_99, %c0_100] : memref<40x36xf32, #tpu.memory_space<vmem>>, vector<1x36xf32>
    %c19 = arith.constant 19 : index
    %c0_101 = arith.constant 0 : index
    %119 = vector.load %arg14[%c19, %c0_101] : memref<40x36xf32, #tpu.memory_space<vmem>>, vector<1x36xf32>
    %c20 = arith.constant 20 : index
    %c0_102 = arith.constant 0 : index
    %120 = vector.load %arg14[%c20, %c0_102] : memref<40x36xf32, #tpu.memory_space<vmem>>, vector<1x36xf32>
    %c24 = arith.constant 24 : index
    %c0_103 = arith.constant 0 : index
    %121 = vector.load %arg14[%c24, %c0_103] : memref<40x36xf32, #tpu.memory_space<vmem>>, vector<1x36xf32>
    %c25 = arith.constant 25 : index
    %c0_104 = arith.constant 0 : index
    %122 = vector.load %arg14[%c25, %c0_104] : memref<40x36xf32, #tpu.memory_space<vmem>>, vector<1x36xf32>
    %c26 = arith.constant 26 : index
    %c0_105 = arith.constant 0 : index
    %123 = vector.load %arg14[%c26, %c0_105] : memref<40x36xf32, #tpu.memory_space<vmem>>, vector<1x36xf32>
    %c27 = arith.constant 27 : index
    %c0_106 = arith.constant 0 : index
    %124 = vector.load %arg14[%c27, %c0_106] : memref<40x36xf32, #tpu.memory_space<vmem>>, vector<1x36xf32>
    %c28 = arith.constant 28 : index
    %c0_107 = arith.constant 0 : index
    %125 = vector.load %arg14[%c28, %c0_107] : memref<40x36xf32, #tpu.memory_space<vmem>>, vector<1x36xf32>
    %c32 = arith.constant 32 : index
    %c0_108 = arith.constant 0 : index
    %126 = vector.load %arg14[%c32, %c0_108] : memref<40x36xf32, #tpu.memory_space<vmem>>, vector<1x36xf32>
    %c33 = arith.constant 33 : index
    %c0_109 = arith.constant 0 : index
    %127 = vector.load %arg14[%c33, %c0_109] : memref<40x36xf32, #tpu.memory_space<vmem>>, vector<1x36xf32>
    %c34 = arith.constant 34 : index
    %c0_110 = arith.constant 0 : index
    %128 = vector.load %arg14[%c34, %c0_110] : memref<40x36xf32, #tpu.memory_space<vmem>>, vector<1x36xf32>
    %c35 = arith.constant 35 : index
    %c0_111 = arith.constant 0 : index
    %129 = vector.load %arg14[%c35, %c0_111] : memref<40x36xf32, #tpu.memory_space<vmem>>, vector<1x36xf32>
    %c36 = arith.constant 36 : index
    %c0_112 = arith.constant 0 : index
    %130 = vector.load %arg14[%c36, %c0_112] : memref<40x36xf32, #tpu.memory_space<vmem>>, vector<1x36xf32>
    %131 = tpu.concatenate %106, %107, %108, %109, %110, %111, %112, %113, %114, %115, %116, %117, %118, %119, %120, %121 in 1 : vector<1x36xf32>, vector<1x36xf32>, vector<1x36xf32>, vector<1x36xf32>, vector<1x36xf32>, vector<1x36xf32>, vector<1x36xf32>, vector<1x36xf32>, vector<1x36xf32>, vector<1x36xf32>, vector<1x36xf32>, vector<1x36xf32>, vector<1x36xf32>, vector<1x36xf32>, vector<1x36xf32>, vector<1x36xf32> -> vector<1x576xf32>
    %132 = tpu.concatenate %122, %123, %124, %125, %126, %127, %128, %129, %130 in 1 : vector<1x36xf32>, vector<1x36xf32>, vector<1x36xf32>, vector<1x36xf32>, vector<1x36xf32>, vector<1x36xf32>, vector<1x36xf32>, vector<1x36xf32>, vector<1x36xf32> -> vector<1x324xf32>
    %133 = tpu.concatenate %131, %132 in 1 : vector<1x576xf32>, vector<1x324xf32> -> vector<1x900xf32>
    %134 = arith.truncf %133 : vector<1x900xf32> to vector<1x900xbf16>
    %c0_113 = arith.constant 0 : index
    %c0_114 = arith.constant 0 : index
    %135 = vector.load %arg6[%c0_113, %c0_114] : memref<900x720xbf16, #tpu.memory_space<vmem>>, vector<900x720xbf16>
    %cst_115 = arith.constant dense<0.000000e+00> : vector<1x720xf32>
    %136 = tpu.matmul %134, %135, %cst_115 {dimension_numbers = #tpu.dot_dimension_numbers<[1], [0], [0], [1], [0, 0, 1, 1], [], []>} : vector<1x900xbf16>, vector<900x720xbf16>, vector<1x720xf32> -> vector<1x720xf32>
    %c0_116 = arith.constant 0 : index
    %c0_117 = arith.constant 0 : index
    %137 = vector.load %arg7[%c0_116, %c0_117] : memref<1x720xf32, #tpu.memory_space<vmem>>, vector<1x720xf32>
    %138 = arith.addf %136, %137 : vector<1x720xf32>
    %cst_118 = arith.constant 0.000000e+00 : f32
    %139 = vector.broadcast %cst_118 : f32 to vector<1x720xf32>
    %140 = arith.maximumf %138, %139 : vector<1x720xf32>
    %141 = arith.truncf %140 : vector<1x720xf32> to vector<1x720xbf16>
    %c0_119 = arith.constant 0 : index
    %c0_120 = arith.constant 0 : index
    %142 = vector.load %arg8[%c0_119, %c0_120] : memref<720x144xbf16, #tpu.memory_space<vmem>>, vector<720x144xbf16>
    %cst_121 = arith.constant dense<0.000000e+00> : vector<1x144xf32>
    %143 = tpu.matmul %141, %142, %cst_121 {dimension_numbers = #tpu.dot_dimension_numbers<[1], [0], [0], [1], [0, 0, 1, 1], [], []>} : vector<1x720xbf16>, vector<720x144xbf16>, vector<1x144xf32> -> vector<1x144xf32>
    %c0_122 = arith.constant 0 : index
    %c0_123 = arith.constant 0 : index
    %144 = vector.load %arg9[%c0_122, %c0_123] : memref<1x144xf32, #tpu.memory_space<vmem>>, vector<1x144xf32>
    %145 = arith.addf %143, %144 : vector<1x144xf32>
    %cst_124 = arith.constant 0.000000e+00 : f32
    %146 = vector.broadcast %cst_124 : f32 to vector<1x144xf32>
    %147 = arith.maximumf %145, %146 : vector<1x144xf32>
    %148 = arith.truncf %147 : vector<1x144xf32> to vector<1x144xbf16>
    %c0_125 = arith.constant 0 : index
    %c0_126 = arith.constant 0 : index
    %149 = vector.load %arg10[%c0_125, %c0_126] : memref<144x101xbf16, #tpu.memory_space<vmem>>, vector<144x101xbf16>
    %cst_127 = arith.constant dense<0.000000e+00> : vector<1x101xf32>
    %150 = tpu.matmul %148, %149, %cst_127 {dimension_numbers = #tpu.dot_dimension_numbers<[1], [0], [0], [1], [0, 0, 1, 1], [], []>} : vector<1x144xbf16>, vector<144x101xbf16>, vector<1x101xf32> -> vector<1x101xf32>
    %c0_128 = arith.constant 0 : index
    %c0_129 = arith.constant 0 : index
    %151 = vector.load %arg11[%c0_128, %c0_129] : memref<1x101xf32, #tpu.memory_space<vmem>>, vector<1x101xf32>
    %152 = arith.addf %150, %151 : vector<1x101xf32>
    %c0_130 = arith.constant 0 : index
    %c0_131 = arith.constant 0 : index
    %c0_132 = arith.constant 0 : index
    %153 = vector.load %arg12[%c0_130, %c0_131, %c0_132] : memref<1x1x101xf32, #tpu.memory_space<vmem>>, vector<1x1x101xf32>
    %154 = vector.shape_cast %153 : vector<1x1x101xf32> to vector<1x101xf32>
    %155 = vector.shape_cast %152 : vector<1x101xf32> to vector<1x1x101xf32>
    tpu.vector_store %arg12[%c0_130, %c0_131, %c0_132], %155 {strides = array<i32>} : memref<1x1x101xf32, #tpu.memory_space<vmem>>, vector<1x1x101xf32>,
    return
  }
  func.func @transform_0(%arg0: i32) -> (i32, i32, i32) {
    %c0_i32 = arith.constant 0 : i32
    %c0_i32_0 = arith.constant 0 : i32
    %c0_i32_1 = arith.constant 0 : i32
    return %arg0, %c0_i32, %c0_i32_0 : i32, i32, i32
  }
  func.func @transform_1(%arg0: i32) -> (i32, i32, i32) {
    %c0_i32 = arith.constant 0 : i32
    %c0_i32_0 = arith.constant 0 : i32
    %c0_i32_1 = arith.constant 0 : i32
    %c0_i32_2 = arith.constant 0 : i32
    return %c0_i32, %c0_i32_0, %c0_i32_1 : i32, i32, i32
  }
  func.func @transform_2(%arg0: i32) -> (i32, i32) {
    %c0_i32 = arith.constant 0 : i32
    %c0_i32_0 = arith.constant 0 : i32
    %c0_i32_1 = arith.constant 0 : i32
    return %c0_i32, %c0_i32_0 : i32, i32
  }
  func.func @transform_3(%arg0: i32) -> (i32, i32, i32) {
    %c0_i32 = arith.constant 0 : i32
    %c0_i32_0 = arith.constant 0 : i32
    %c0_i32_1 = arith.constant 0 : i32
    %c0_i32_2 = arith.constant 0 : i32
    return %c0_i32, %c0_i32_0, %c0_i32_1 : i32, i32, i32
  }
  func.func @transform_4(%arg0: i32) -> (i32, i32) {
    %c0_i32 = arith.constant 0 : i32
    %c0_i32_0 = arith.constant 0 : i32
    %c0_i32_1 = arith.constant 0 : i32
    return %c0_i32, %c0_i32_0 : i32, i32
  }
  func.func @transform_5(%arg0: i32) -> (i32, i32) {
    %c0_i32 = arith.constant 0 : i32
    %c0_i32_0 = arith.constant 0 : i32
    %c0_i32_1 = arith.constant 0 : i32
    return %c0_i32, %c0_i32_0 : i32, i32
  }
  func.func @transform_6(%arg0: i32) -> (i32, i32) {
    %c0_i32 = arith.constant 0 : i32
    %c0_i32_0 = arith.constant 0 : i32
    %c0_i32_1 = arith.constant 0 : i32
    return %c0_i32, %c0_i32_0 : i32, i32
  }
  func.func @transform_7(%arg0: i32) -> (i32, i32) {
    %c0_i32 = arith.constant 0 : i32
    %c0_i32_0 = arith.constant 0 : i32
    %c0_i32_1 = arith.constant 0 : i32
    return %c0_i32, %c0_i32_0 : i32, i32
  }
  func.func @transform_8(%arg0: i32) -> (i32, i32) {
    %c0_i32 = arith.constant 0 : i32
    %c0_i32_0 = arith.constant 0 : i32
    %c0_i32_1 = arith.constant 0 : i32
    return %c0_i32, %c0_i32_0 : i32, i32
  }
  func.func @transform_9(%arg0: i32) -> (i32, i32) {
    %c0_i32 = arith.constant 0 : i32
    %c0_i32_0 = arith.constant 0 : i32
    %c0_i32_1 = arith.constant 0 : i32
    return %c0_i32, %c0_i32_0 : i32, i32
  }
  func.func @transform_10(%arg0: i32) -> (i32, i32) {
    %c0_i32 = arith.constant 0 : i32
    %c0_i32_0 = arith.constant 0 : i32
    %c0_i32_1 = arith.constant 0 : i32
    return %c0_i32, %c0_i32_0 : i32, i32
  }
  func.func @transform_11(%arg0: i32) -> (i32, i32, i32) {
    %c0_i32 = arith.constant 0 : i32
    %c0_i32_0 = arith.constant 0 : i32
    %c0_i32_1 = arith.constant 0 : i32
    return %arg0, %c0_i32, %c0_i32_0 : i32, i32, i32
  }
}

</mosaic_0001>

<bundles_post_ra>
// kernel: net_forward.1
= control target key start
LH: loop header
LB: loop body
LE: loop exit
PB: predicated region body
PF: predicated region fallthrough
CT: control target
= control target key end

     0   :  { %16 = vsyncpa [#allocation5], 0  ;;  %s10044_s0 = inlined_call_operand.vmem [shape: f32[2,80,48], index: 0, kind: input, shape index: {}]   ;;  %s10045_s1 = inlined_call_operand.vmem [shape: bf16[4,48,192], index: 1, kind: input, shape index: {}]   ;;  %s10046_s2 = inlined_call_operand.vmem [shape: f32[1,48], index: 2, kind: input, shape index: {}]   ;;  %s10047_s3 = inlined_call_operand.vmem [shape: bf16[9,48,144], index: 3, kind: input, shape index: {}]   ;;  %s10048_s4 = inlined_call_operand.vmem [shape: f32[1,36], index: 4, kind: input, shape index: {}]   ;;  %s10049_s5 = inlined_call_operand.vmem [shape: bf16[900,720], index: 5, kind: input, shape index: {}]   ;;  %s10050_s6 = inlined_call_operand.vmem [shape: f32[1,720], index: 6, kind: input, shape index: {}]   ;;  %s10051_s7 = inlined_call_operand.vmem [shape: bf16[720,144], index: 7, kind: input, shape index: {}]   ;;  %s10052_s8 = inlined_call_operand.vmem [shape: f32[1,144], index: 8, kind: input, shape index: {}]   ;;  %s10053_s9 = inlined_call_operand.vmem [shape: bf16[144,101], index: 9, kind: input, shape index: {}]   ;;  %s10054_s10 = inlined_call_operand.vmem [shape: f32[1,101], index: 10, kind: input, shape index: {}]   ;;  %s10055_s11 = inlined_call_operand.hbm [shape: f32[2,1,101], index: 11, kind: output, shape index: {}]  }
   0x1   :  { %18 = vsyncpa [#allocation5 + $0x1], 0  ;;  %s7815_s17 = smov 0   ;;  %s7817_s18 = smov 0  }
   0x2   :  { %s7819_s19 = smov 0   ;;  %s7821_s20 = smov 0  }
   0x3 LB: > { %10061 = sst [smem:[#allocation7_spill]] %s7728_s19  ;;  %s7836_s21 = sadd.s32 4294967295, %s7732_s20   ;;  %s7732_s20 = sphi %s7821_s20, %s10073_s20   ;;  %s7728_s19 = sphi %s7819_s19, %s10072_s19   ;;  %s7724_s18 = sphi %s7817_s18, %s10071_s18   ;;  %s7720_s17 = sphi %s7815_s17, %s10070_s17  }
   0x4   : > { %s5992_s22 = sadd.s32 4294967294, %s7732_s20   ;;  %s7840_s23 = sadd.s32 1, %s7732_s20  }
   0x5   : > { %s267_s24 = sadd.s32 1, %s7728_s19  ;;  %s264_s25 = ssub.s32 %s7732_s20, %s7840_s23 }
   0x6   : > { %p277_p0 = scmp.ne.s32.totalorder %s7728_s19, %s7724_s18  ;;  %p265_p1 = scmp.eq.s32.totalorder %s264_s25, 0 }
   0x7   : > { %p278_p2 = scmp.eq.s32.totalorder %s7836_s21, 1  ;;  %p283_p3 = scmp.ne.s32.totalorder %s7724_s18, %s7720_s17 }
   0x8   : > { %p284_p4 = scmp.eq.s32.totalorder %s5992_s22, 1  ;;  %p5995_p7 = scmp.ge.s32.totalorder %s7732_s20, 1 }
   0x9   : > { %s7851_s26 = scalar_select %p265_p1, %s7728_s19, %s267_s24  }
   0xa   : > { %p7853_p5 = por %p278_p2, %p277_p0  ;;  %p7857_p6 = por %p284_p4, %p283_p3 }
   0xb   : > { %10062 = sst [smem:[#allocation8_spill]] %s7851_s26  ;;  %p340_p8 = scmp.lt.s32.totalorder %s7732_s20, 3 }
   0xd   : > { %p341_p9 = pnand %p5995_p7, %p340_p8 }
   0xe   : > { %v6899_v0 = vld [vmem:[%s10045_s1 + $0x34] ss:$8 sps:$4 sm:$0xff] (!%p341_p9)   ;;  %p379_p10 = scmp.lt.s32.totalorder (!%p341_p9), %s7836_s21, 1  ;;  %v6901_v1 = vld [vmem:[%s10045_s1 + $0x30] ss:$8 sps:$4 sm:$0xff] (!%p341_p9)   ;;  %v7734_v2 = vmov (!%p341_p9), 0  }
   0xf   : > { %344 = sbr.rel (%p341_p9) target bundleno = 2628 (0xa44), region = 64  ;;  %497 = vmatprep.mubr.bf16.mxu0 (!%p341_p9), %v7734_v2  ;;  %1245 = vmatprep.mubr.bf16.mxu1 (!%p341_p9), %v7734_v2  ;;  %v6902_v3 = vld [vmem:[%s10045_s1 + $0x44] ss:$8 sps:$4 sm:$0xff] (!%p341_p9)   ;;  %v6904_v4 = vld [vmem:[%s10045_s1 + $0x40] ss:$8 sps:$4 sm:$0xff] (!%p341_p9)   ;;  %vm452_vm0 = vcmask (!%p341_p9), 392192  }
  0x10   : > { %465 = vmatprep.subr.bf16.mxu0 (!%p341_p9), %v6899_v0  ;;  %v6905_v5 = vld [vmem:[%s10045_s1 + $0x54] ss:$8 sps:$4 sm:$0xff] (!%p341_p9)   ;;  %v6907_v6 = vld [vmem:[%s10045_s1 + $0x50] ss:$8 sps:$4 sm:$0xff] (!%p341_p9)   ;;  %v6910_v10 = vld [vmem:[%s10045_s1 + $0x4] ss:$8 sps:$4 sm:$0xff] (!%p341_p9)  }
  0x11   : > { %466 = vmatpush1.bf16.msra.mxu0 (!%p341_p9), %v6901_v1  ;;  %v6908_v18 = vld [vmem:[%s10045_s1] ss:$8 sps:$4 sm:$0xff] (!%p341_p9)   ;;  %v6913_v20 = vld [vmem:[%s10045_s1 + $0x14] ss:$8 sps:$4 sm:$0xff] (!%p341_p9)   ;;  %v6911_v21 = vld [vmem:[%s10045_s1 + $0x10] ss:$8 sps:$4 sm:$0xff] (!%p341_p9)  }
  0x12   : > { %467 = vmatprep.subr.bf16.mxu0 (!%p341_p9), %v6902_v3  ;;  %v6916_v22 = vld [vmem:[%s10045_s1 + $0x24] ss:$8 sps:$4 sm:$0xff] (!%p341_p9)   ;;  %v6914_v24 = vld [vmem:[%s10045_s1 + $0x20] ss:$8 sps:$4 sm:$0xff] (!%p341_p9)   ;;  %v6922_v35 = vld [vmem:[%s10045_s1 + $0x74] ss:$8 sps:$4 sm:$0xff] (!%p341_p9)  }
  0x13   : > { %v6919_v25 = vld [vmem:[%s10045_s1 + $0x64] ss:$8 sps:$4 sm:$0xff] (!%p341_p9)   ;;  %v6917_v33 = vld [vmem:[%s10045_s1 + $0x60] ss:$8 sps:$4 sm:$0xff] (!%p341_p9)   ;;  %v6920_v38 = vld [vmem:[%s10045_s1 + $0x70] ss:$8 sps:$4 sm:$0xff] (!%p341_p9)  }
  0x14   : > { %v6925_v39 = vld [vmem:[%s10045_s1 + $0x84] ss:$8 sps:$4 sm:$0xff] (!%p341_p9)   ;;  %v6923_v40 = vld [vmem:[%s10045_s1 + $0x80] ss:$8 sps:$4 sm:$0xff] (!%p341_p9)   ;;  %v6928_v42 = vld [vmem:[%s10045_s1 + $0x94] ss:$8 sps:$4 sm:$0xff] (!%p341_p9)  }
  0x15   : > { %468 = vmatpush1.bf16.msra.mxu0 (!%p341_p9), %v6904_v4  ;;  %v6926_v49 = vld [vmem:[%s10045_s1 + $0x90] ss:$8 sps:$4 sm:$0xff] (!%p341_p9)   ;;  %v6931_v51 = vld [vmem:[%s10045_s1 + $0xa4] ss:$8 sps:$4 sm:$0xff] (!%p341_p9)   ;;  %v6929_v52 = vld [vmem:[%s10045_s1 + $0xa0] ss:$8 sps:$4 sm:$0xff] (!%p341_p9)  }
  0x16   : > { %s380_s16 = scalar_select %p379_p10, %s7836_s21, 1  ;;  %469 = vmatprep.subr.bf16.mxu0 %v6905_v5  ;;  %v6934_v53 = vld [vmem:[%s10045_s1 + $0xb4] ss:$8 sps:$4 sm:$0xff]   ;;  %v6932_v54 = vld [vmem:[%s10045_s1 + $0xb0] ss:$8 sps:$4 sm:$0xff]   ;;  %vm1089_vm1 = vcmask 261120  }
  0x17   : > { %s10057_s29 = smov 32   ;;  %s7737_s24 = smov 92   ;;  %vm2289_vm2 = vcmask 752640   ;;  %vm2347_vm3 = vcmask 293888   ;;  %vm2443_vm4 = vcmask 130048   ;;  %vm2445_vm5 = vcmask 424960  }
  0x18   : > { %s6834_s30 = smul.u32 80, %s380_s16  ;;  %s7738_s25 = smov 56   ;;  %vm2447_vm6 = vcmask 719872   ;;  %vm2439_vm7 = vcmask 588800   ;;  %vm2449_vm8 = vcmask 1014784   ;;  %vm2441_vm9 = vcmask 883712  }
  0x19   : > { %470 = vmatpush1.bf16.msra.mxu0 %v6907_v6  ;;  %s7739_s22 = smov 108   ;;  %s7740_s12 = smov 52   ;;  %vm2456_vm10 = vcmask 97280   ;;  %vm2459_vm11 = vcmask 687104   ;;  %vm2461_vm12 = vcmask 982016   ;;  %vm2452_vm13 = vcmask 556032  }
  0x1a   : > { %s7888_s14 = scalar_lea.vmem %s10044_s0, %s6834_s30  ;;  %580 = vmatprep.subr.bf16.mxu0 %v6910_v10  ;;  %s7741_s13 = smov 16   ;;  %vm2454_vm14 = vcmask 850944   ;;  %vm2463_vm15 = vcmask 228352  }
  0x1b   : > { %v403_v7 = vld [vmem:[%s7888_s14 + $0x1] sm:$0xff]  ;;  %v7892_v8 = vld [vmem:[%s7888_s14 + $0x9] sm:$0xff]  ;;  %v7895_v9 = vld [vmem:[%s7888_s14 + $0x11] sm:$0xff]  ;;  %s7743_s16 = smov 36   ;;  %s7745_s19 = smov 72  }
  0x1c   : > { %v7901_v11 = vld [vmem:[%s7888_s14 + $0x19] sm:$0xff]  ;;  %v7904_v12 = vld [vmem:[%s7888_s14 + $0x21] sm:$0xff]  ;;  %v811_v13 = vpack.c.bf16 %v7895_v9, %v7892_v8  ;;  %v411_v15 = vpack.c.bf16 %v7892_v8, %v403_v7  ;;  %v7912_v16 = vld [vmem:[%s7888_s14 + $0x29] sm:$0xff]  ;;  %s10065_s26 = smov 32   ;;  %s7747_s30 = smov 68  }
  0x1d   : > { %v812_v14 = vpack.c.bf16 %v7904_v12, %v7901_v11  ;;  %v7915_v17 = vld [vmem:[%s7888_s14 + $0x31] sm:$0xff]  ;;  %v412_v23 = vpack.c.bf16 %v7901_v11, %v7895_v9  ;;  %v7942_v26 = vld [vmem:[%s7888_s14 + $0x39] sm:$0xff]  ;;  %v7945_v27 = vld [vmem:[%s7888_s14 + $0x41] sm:$0xff]  ;;  %v413_v29 = vpack.c.bf16 %v7912_v16, %v7904_v12  ;;  %s7749_s15 = smov 12  }
  0x1e   : > { %v813_v19 = vpack.c.bf16 %v7915_v17, %v7912_v16  ;;  %6009 = vmatmul.mubr.msk.bf16.vlgmr.msra.gmra.mrb[0].mxu0 %vm452_vm0, %v411_v15  ;;  %v814_v28 = vpack.c.bf16 %v7945_v27, %v7942_v26  ;;  %v414_v30 = vpack.c.bf16 %v7942_v26, %v7915_v17  ;;  %v385_v31 = vld [vmem:[%s7888_s14] sm:$0xff]  ;;  %v386_v32 = vld [vmem:[%s7888_s14 + $0x8] sm:$0xff]  ;;  %v387_v36 = vld [vmem:[%s7888_s14 + $0x10] sm:$0xff] }
  0x1f   : > { %581 = vmatpush1.bf16.msra.mxu0 %v6908_v18  ;;  %507 = vmatprep.mubr.bf16.mxu0 %v7734_v2  ;;  %v393_v34 = vpack.c.bf16 %v386_v32, %v385_v31  ;;  %v388_v37 = vld [vmem:[%s7888_s14 + $0x18] sm:$0xff]  ;;  %v389_v43 = vld [vmem:[%s7888_s14 + $0x20] sm:$0xff]  ;;  %v390_v44 = vld [vmem:[%s7888_s14 + $0x28] sm:$0xff]  ;;  %v661_v50 = vpack.c.bf16 %v387_v36, %v386_v32 }
  0x20   : > { %582 = vmatprep.subr.bf16.mxu0 %v6913_v20  ;;  %v394_v41 = vpack.c.bf16 %v388_v37, %v387_v36  ;;  %v395_v45 = vpack.c.bf16 %v390_v44, %v389_v43  ;;  %v391_v46 = vld [vmem:[%s7888_s14 + $0x30] sm:$0xff]  ;;  %v392_v47 = vld [vmem:[%s7888_s14 + $0x38] sm:$0xff]  ;;  %v662_v55 = vpack.c.bf16 %v389_v43, %v388_v37  ;;  %v660_v57 = vld [vmem:[%s7888_s14 + $0x40] sm:$0xff]  ;;  %s7735_s14 = smov 80  }
  0x21   : > { %v396_v48 = vpack.c.bf16 %v392_v47, %v391_v46  ;;  %v663_v56 = vpack.c.bf16 %v391_v46, %v390_v44  ;;  %v664_v58 = vpack.c.bf16 %v660_v57, %v392_v47  ;;  %v6935_v15 = vld [vmem:[%s10047_s3 + $0x34] ss:$8 sps:$4 sm:$0xff]   ;;  %v6937_v16 = vld [vmem:[%s10047_s3 + $0x30] ss:$8 sps:$4 sm:$0xff]   ;;  %v6938_v20 = vld [vmem:[%s10047_s3 + $0x44] ss:$8 sps:$4 sm:$0xff]  }
  0x22   : > { %1213 = vmatprep.subr.bf16.mxu1 %v6935_v15  ;;  %v6943_v26 = vld [vmem:[%s10047_s3 + $0x50] ss:$8 sps:$4 sm:$0xff]  }
  0x23   : > { %583 = vmatpush1.bf16.msra.mxu0 %v6911_v21  ;;  %1214 = vmatpush1.bf16.msra.mxu1 %v6937_v16  ;;  %v6940_v21 = vld [vmem:[%s10047_s3 + $0x40] ss:$8 sps:$4 sm:$0xff]  }
  0x24   : > { %584 = vmatprep.subr.bf16.mxu0 %v6916_v22  ;;  %1215 = vmatprep.subr.bf16.mxu1 %v6938_v20 }
  0x26   : > { %6010 = vmatmul.mubr.msk.bf16.gmra.mrb[4].mxu0 %vm452_vm0, %v412_v23 }
  0x27   : > { %517 = vmatprep.mubr.bf16.mxu0 %v7734_v2  ;;  %585 = vmatpush1.bf16.msra.mxu0 %v6914_v24 }
  0x28   : > { %714 = vmatprep.subr.bf16.mxu0 %v6919_v25  ;;  %1216 = vmatpush1.bf16.msra.mxu1 %v6940_v21  ;;  %v6941_v25 = vld [vmem:[%s10047_s3 + $0x54] ss:$8 sps:$4 sm:$0xff]  }
  0x29   : > { %1217 = vmatprep.subr.bf16.mxu1 %v6941_v25 }
  0x2c   : > { %1218 = vmatpush1.bf16.msra.mxu1 %v6943_v26 }
  0x2e   : > { %6011 = vmatmul.mubr.msk.bf16.gmra.mrb[8].mxu0 %vm452_vm0, %v413_v29 }
  0x2f   : > { %527 = vmatprep.mubr.bf16.mxu0 %v7734_v2 }
  0x36   : > { %6012 = vmatmul.mubr.msk.bf16.gmra.mrb[12].mxu0 %vm452_vm0, %v414_v30 }
  0x37   : > { %612 = vmatprep.mubr.bf16.mxu0 %v7734_v2 }
  0x3e   : > { %6019 = vmatmul.mubr.msk.bf16.vlgmr.msra.gmra.mrb[0].mxu0 %vm452_vm0, %v393_v34 }
  0x3f   : > { %715 = vmatpush1.bf16.msra.mxu0 %v6917_v33  ;;  %622 = vmatprep.mubr.bf16.mxu0 %v7734_v2 }
  0x40   : > { %716 = vmatprep.subr.bf16.mxu0 %v6922_v35  ;;  %v6946_v35 = vld [vmem:[%s10047_s3 + $0x4] ss:$8 sps:$4 sm:$0xff]  }
  0x41   : > { %1313 = vmatprep.subr.bf16.mxu1 %v6946_v35 }
  0x43   : > { %717 = vmatpush1.bf16.msra.mxu0 %v6920_v38 }
  0x44   : > { %718 = vmatprep.subr.bf16.mxu0 %v6925_v39 }
  0x46   : > { %6020 = vmatmul.mubr.msk.bf16.gmra.mrb[4].mxu0 %vm452_vm0, %v394_v41 }
  0x47   : > { %632 = vmatprep.mubr.bf16.mxu0 %v7734_v2  ;;  %719 = vmatpush1.bf16.msra.mxu0 %v6923_v40 }
  0x48   : > { %864 = vmatprep.subr.bf16.mxu0 %v6928_v42 }
  0x4e   : > { %6021 = vmatmul.mubr.msk.bf16.gmra.mrb[8].mxu0 %vm452_vm0, %v395_v45  ;;  %v8121_v45 = vld [vmem:[%s10046_s2] ss:$0 sm:$0xff] }
  0x4f   : > { %642 = vmatprep.mubr.bf16.mxu0 %v7734_v2 }
  0x56   : > { %6022 = vmatmul.mubr.msk.bf16.gmra.mrb[12].mxu0 %vm452_vm0, %v396_v48 }
  0x57   : > { %746 = vmatprep.mubr.bf16.mxu0 %v7734_v2 }
  0x5e   : > { %6035 = vmatmul.mubr.msk.bf16.vlgmr.msra.gmra.mrb[0].mxu0 %vm452_vm0, %v661_v50 }
  0x5f   : > { %865 = vmatpush1.bf16.msra.mxu0 %v6926_v49  ;;  %756 = vmatprep.mubr.bf16.mxu0 %v7734_v2 }
  0x60   : > { %866 = vmatprep.subr.bf16.mxu0 %v6931_v51 }
  0x63   : > { %867 = vmatpush1.bf16.msra.mxu0 %v6929_v52 }
  0x64   : > { %868 = vmatprep.subr.bf16.mxu0 %v6934_v53 }
  0x66   : > { %6036 = vmatmul.mubr.msk.bf16.gmra.mrb[4].mxu0 %vm452_vm0, %v662_v55 }
  0x67   : > { %766 = vmatprep.mubr.bf16.mxu0 %v7734_v2  ;;  %869 = vmatpush1.bf16.msra.mxu0 %v6932_v54 }
  0x6e   : > { %6037 = vmatmul.mubr.msk.bf16.gmra.mrb[8].mxu0 %vm452_vm0, %v663_v56 }
  0x6f   : > { %776 = vmatprep.mubr.bf16.mxu0 %v7734_v2 }
  0x76   : > { %6038 = vmatmul.mubr.msk.bf16.gmra.mrb[12].mxu0 %vm452_vm0, %v664_v58 }
  0x77   : > { %896 = vmatprep.mubr.bf16.mxu0 %v7734_v2 }
  0x7e   : > { %6051 = vmatmul.mubr.msk.bf16.vlgmr.msra.gmra.mrb[0].mxu0 %vm452_vm0, %v811_v13 }
  0x7f   : > { %906 = vmatprep.mubr.bf16.mxu0 %v7734_v2 }
  0x86   : > { %6052 = vmatmul.mubr.msk.bf16.gmra.mrb[4].mxu0 %vm452_vm0, %v812_v14 }
  0x87   : > { %916 = vmatprep.mubr.bf16.mxu0 %v7734_v2 }
  0x8e   : > { %6053 = vmatmul.mubr.msk.bf16.gmra.mrb[8].mxu0 %vm452_vm0, %v813_v19 }
  0x8f   : > { %926 = vmatprep.mubr.bf16.mxu0 %v7734_v2 }
  0x96   : > { %6054 = vmatmul.mubr.msk.bf16.gmra.mrb[12].mxu0 %vm452_vm0, %v814_v28 }
 0x151   : > { %v8036_v59 = vpop.f32.mrb[0].mxu0 }
 0x152   : > { %v900_v60 = vpop.f32.mrb[1].mxu0 }
 0x153   : > { %1001 = vrot.lane.b32.xlu0 %v900_v60, %s7735_s14  ;;  %v8039_v61 = vpop.f32.mrb[2].mxu0 }
 0x154   : > { %v904_v62 = vpop.f32.mrb[3].mxu0 }
 0x157   : > { %1003 = vrot.lane.b32.xlu0 %v904_v62, %s7735_s14 }
 0x159   : > { %v8042_v63 = vpop.f32.mrb[4].mxu0 }
 0x15a   : > { %v910_v0 = vpop.f32.mrb[5].mxu0 }
 0x15b   : > { %1005 = vrot.lane.b32.xlu1 %v910_v0, %s7735_s14  ;;  %v8045_v1 = vpop.f32.mrb[6].mxu0 }
 0x15c   : > { %v914_v3 = vpop.f32.mrb[7].mxu0 }
 0x15f   : > { %1007 = vrot.lane.b32.xlu1 %v914_v3, %s7735_s14 }
 0x161   : > { %v8048_v4 = vpop.f32.mrb[8].mxu0 }
 0x162   : > { %v920_v5 = vpop.f32.mrb[9].mxu0 }
 0x163   : > { %1009 = vrot.lane.b32.xlu0 %v920_v5, %s7735_s14  ;;  %v8051_v6 = vpop.f32.mrb[10].mxu0 }
 0x164   : > { %v924_v7 = vpop.f32.mrb[11].mxu0 }
 0x165   : > { %1011 = vrot.lane.b32.xlu1 %v924_v7, %s7735_s14 }
 0x167   : > { %961 = vrot.lane.b32.xlu0 %v8036_v59, %s7735_s14 }
 0x169   : > { %963 = vrot.lane.b32.xlu1 %v8039_v61, %s7735_s14  ;;  %v8058_v8 = vpop.f32.mrb[12].mxu0 }
 0x16a   : > { %v8060_v9 = vpop.f32.mrb[13].mxu0 }
 0x16b   : > { %965 = vrot.lane.b32.xlu0 %v8042_v63, %s7735_s14  ;;  %v8064_v10 = vpop.f32.mrb[14].mxu0 }
 0x16c   : > { %v8066_v11 = vpop.f32.mrb[15].mxu0 }
 0x16d   : > { %967 = vrot.lane.b32.xlu1 %v8045_v1, %s7735_s14 }
 0x16f   : > { %969 = vrot.lane.b32.xlu0 %v8048_v4, %s7735_s14 }
 0x1c5   : > { %v1002_v12 = vpop.permute.xlu0 %1001 }
 0x1c6   : > { %v1025_v13 = vmax.f32 %v8036_v59, %v1002_v12  ;;  %v1026_v14 = vmax.f32 %v900_v60, %v1002_v12 }
 0x1c8   : > { %1059 = vrot.lane.b32.xlu0 %v1026_v14, %s10057_s29  ;;  %1057 = vrot.lane.b32.xlu1 %v1025_v13, %s10057_s29 }
 0x1c9   : > { %v1004_v17 = vpop.permute.xlu0 %1003 }
 0x1ca   : > { %v1027_v18 = vmax.f32 %v8039_v61, %v1004_v17  ;;  %v1028_v19 = vmax.f32 %v904_v62, %v1004_v17 }
 0x1cc   : > { %1063 = vrot.lane.b32.xlu0 %v1028_v19, %s10057_s29  ;;  %1061 = vrot.lane.b32.xlu1 %v1027_v18, %s10057_s29 }
 0x1cd   : > { %v1006_v22 = vpop.permute.xlu1 %1005 }
 0x1ce   : > { %v1029_v23 = vmax.f32 %v8042_v63, %v1006_v22  ;;  %v1030_v24 = vmax.f32 %v910_v0, %v1006_v22 }
 0x1d0   : > { %1067 = vrot.lane.b32.xlu0 %v1030_v24, %s10057_s29  ;;  %1065 = vrot.lane.b32.xlu1 %v1029_v23, %s10057_s29 }
 0x1d1   : > { %v1008_v27 = vpop.permute.xlu1 %1007 }
 0x1d2   : > { %v1031_v28 = vmax.f32 %v8045_v1, %v1008_v27  ;;  %v1032_v29 = vmax.f32 %v914_v3, %v1008_v27 }
 0x1d4   : > { %1071 = vrot.lane.b32.xlu0 %v1032_v29, %s10057_s29  ;;  %1069 = vrot.lane.b32.xlu1 %v1031_v28, %s10057_s29  ;;  %v6944_v28 = vld [vmem:[%s10047_s3] ss:$8 sps:$4 sm:$0xff]  }
 0x1d5   : > { %v1010_v30 = vpop.permute.xlu0 %1009 }
 0x1d6   : > { %v1033_v31 = vmax.f32 %v8048_v4, %v1010_v30  ;;  %v1034_v32 = vmax.f32 %v920_v5, %v1010_v30 }
 0x1d7   : > { %v1012_v33 = vpop.permute.xlu1 %1011 }
 0x1d8   : > { %1075 = vrot.lane.b32.xlu0 %v1034_v32, %s10057_s29  ;;  %1073 = vrot.lane.b32.xlu1 %v1033_v31, %s10057_s29  ;;  %v1035_v34 = vmax.f32 %v8051_v6, %v1012_v33  ;;  %v1036_v36 = vmax.f32 %v924_v7, %v1012_v33  ;;  %v6949_v32 = vld [vmem:[%s10047_s3 + $0x14] ss:$8 sps:$4 sm:$0xff]  }
 0x1d9   : > { %v962_v37 = vpop.permute.xlu0 %961 }
 0x1da   : > { %v985_v42 = vmax.f32 %v8036_v59, %v962_v37 }
 0x1db   : > { %v964_v38 = vpop.permute.xlu1 %963 }
 0x1dc   : > { %971 = vrot.lane.b32.xlu1 %v8051_v6, %s7735_s14  ;;  %1077 = vrot.lane.b32.xlu0 %v1035_v34, %s10057_s29  ;;  %v986_v48 = vmax.f32 %v8039_v61, %v964_v38  ;;  %v6952_v38 = vld [vmem:[%s10047_s3 + $0x24] ss:$8 sps:$4 sm:$0xff]  }
 0x1dd   : > { %v966_v39 = vpop.permute.xlu0 %965 }
 0x1de   : > { %v987_v55 = vmax.f32 %v8042_v63, %v966_v39 }
 0x1df   : > { %v968_v40 = vpop.permute.xlu1 %967 }
 0x1e0   : > { %1079 = vrot.lane.b32.xlu1 %v1036_v36, %s10057_s29  ;;  %1013 = vrot.lane.b32.xlu0 %v8060_v9, %s7735_s14  ;;  %v988_v62 = vmax.f32 %v8045_v1, %v968_v40 }
 0x1e1   : > { %v970_v41 = vpop.permute.xlu0 %969 }
 0x1e2   : > { %v989_v13 = vmax.f32 %v8048_v4, %v970_v41 }
 0x1e4   : > { %973 = vrot.lane.b32.xlu1 %v8058_v8, %s7735_s14 }
 0x23a   : > { %v1060_v43 = vpop.permute.xlu0 %1059  ;;  %v1058_v44 = vpop.permute.xlu1 %1057 }
 0x23b   : > { %v1090_v46 = vsel %vm1089_vm1, %v1058_v44, %v1060_v43  ;;  %v6950_v43 = vld [vmem:[%s10047_s3 + $0x20] ss:$8 sps:$4 sm:$0xff]   ;;  %v6955_v44 = vld [vmem:[%s10047_s3 + $0x64] ss:$8 sps:$4 sm:$0xff]  }
 0x23c   : > { %v1106_v47 = vmax.f32 %v985_v42, %v1090_v46 }
 0x23e   : > { %v1121_v49 = vadd.f32 %v8121_v45, %v1106_v47  ;;  %v1064_v50 = vpop.permute.xlu0 %1063  ;;  %v1062_v51 = vpop.permute.xlu1 %1061 }
 0x23f   : > { %v1091_v52 = vsel %vm1089_vm1, %v1062_v51, %v1064_v50 }
 0x240   : > { %v1129_v53 = vmax.f32 %v1121_v49, 0.0  ;;  %v1107_v54 = vmax.f32 %v986_v48, %v1091_v52 }
 0x242   : > { %1137 = vst.msk [vmem:[#allocation2] sm:$0xff] %vm452_vm0, %v1129_v53  ;;  %v1122_v56 = vadd.f32 %v8121_v45, %v1107_v54  ;;  %v1068_v57 = vpop.permute.xlu0 %1067  ;;  %v1066_v58 = vpop.permute.xlu1 %1065  ;;  %v6953_v53 = vld [vmem:[%s10047_s3 + $0x60] ss:$8 sps:$4 sm:$0xff]  }
 0x243   : > { %v1092_v59 = vsel %vm1089_vm1, %v1066_v58, %v1068_v57  ;;  %v6961_v57 = vld [vmem:[%s10047_s3 + $0x84] ss:$8 sps:$4 sm:$0xff]  }
 0x244   : > { %v1130_v60 = vmax.f32 %v1122_v56, 0.0  ;;  %v1108_v61 = vmax.f32 %v987_v55, %v1092_v59  ;;  %v6958_v55 = vld [vmem:[%s10047_s3 + $0x74] ss:$8 sps:$4 sm:$0xff]   ;;  %v6956_v56 = vld [vmem:[%s10047_s3 + $0x70] ss:$8 sps:$4 sm:$0xff]  }
 0x246   : > { %1138 = vst.msk [vmem:[#allocation2 + $0x8] sm:$0xff] %vm452_vm0, %v1130_v60  ;;  %v1123_v0 = vadd.f32 %v8121_v45, %v1108_v61  ;;  %v1072_v3 = vpop.permute.xlu0 %1071  ;;  %v1070_v5 = vpop.permute.xlu1 %1069  ;;  %v6959_v60 = vld [vmem:[%s10047_s3 + $0x80] ss:$8 sps:$4 sm:$0xff]  }
 0x247   : > { %v1093_v63 = vsel %vm1089_vm1, %v1070_v5, %v1072_v3  ;;  %v6962_v5 = vld [vmem:[%s10047_s3 + $0x90] ss:$8 sps:$4 sm:$0xff]  }
 0x248   : > { %v1131_v7 = vmax.f32 %v1123_v0, 0.0  ;;  %v1109_v12 = vmax.f32 %v988_v62, %v1093_v63  ;;  %v6964_v62 = vld [vmem:[%s10047_s3 + $0x94] ss:$8 sps:$4 sm:$0xff]  }
 0x249   : > { %v1145_v52 = vld [vmem:[#allocation2] sm:$0xff] }
 0x24a   : > { %1139 = vst.msk [vmem:[#allocation2 + $0x10] sm:$0xff] %vm452_vm0, %v1131_v7  ;;  %v1124_v14 = vadd.f32 %v8121_v45, %v1109_v12  ;;  %v1076_v15 = vpop.permute.xlu0 %1075  ;;  %v1074_v16 = vpop.permute.xlu1 %1073  ;;  %v6967_v7 = vld [vmem:[%s10047_s3 + $0xa4] ss:$8 sps:$4 sm:$0xff]   ;;  %v6965_v12 = vld [vmem:[%s10047_s3 + $0xa0] ss:$8 sps:$4 sm:$0xff]  }
 0x24b   : > { %v1094_v1 = vsel %vm1089_vm1, %v1074_v16, %v1076_v15  ;;  %v6968_v15 = vld [vmem:[%s10047_s3 + $0xb0] ss:$8 sps:$4 sm:$0xff]  }
 0x24c   : > { %v1132_v17 = vmax.f32 %v1124_v14, 0.0  ;;  %v1110_v18 = vmax.f32 %v989_v13, %v1094_v1  ;;  %v6970_v13 = vld [vmem:[%s10047_s3 + $0xb4] ss:$8 sps:$4 sm:$0xff]   ;;  %v6973_v1 = vld [vmem:[%s10047_s3 + $0xc4] ss:$8 sps:$4 sm:$0xff]  }
 0x24d   : > { %v1159_v23 = vld [vmem:[#allocation2 + $0x1] sm:$0xff] }
 0x24e   : > { %1140 = vst.msk [vmem:[#allocation2 + $0x18] sm:$0xff] %vm452_vm0, %v1132_v17  ;;  %v1125_v19 = vadd.f32 %v8121_v45, %v1110_v18  ;;  %v1078_v20 = vpop.permute.xlu0 %1077  ;;  %v972_v21 = vpop.permute.xlu1 %971  ;;  %v1146_v51 = vld [vmem:[#allocation2 + $0x8] sm:$0xff] }
 0x24f   : > { %v990_v4 = vmax.f32 %v8051_v6, %v972_v21  ;;  %v1150_v54 = vpack.c.bf16 %v1146_v51, %v1145_v52  ;;  %v1374_v3 = vld [vmem:[#allocation2 + $0x2] sm:$0xff]  ;;  %v6976_v21 = vld [vmem:[%s10047_s3 + $0xd4] ss:$8 sps:$4 sm:$0xff]  }
 0x250   : > { %v1133_v22 = vmax.f32 %v1125_v19, 0.0  ;;  %v6971_v19 = vld [vmem:[%s10047_s3 + $0xc0] ss:$8 sps:$4 sm:$0xff]  }
 0x251   : > { %v8141_v24 = vld [vmem:[#allocation2 + $0x9] sm:$0xff] }
 0x252   : > { %1141 = vst.msk [vmem:[#allocation2 + $0x20] sm:$0xff] %vm452_vm0, %v1133_v22  ;;  %v1080_v25 = vpop.permute.xlu1 %1079  ;;  %v1014_v26 = vpop.permute.xlu0 %1013  ;;  %v1164_v27 = vpack.c.bf16 %v8141_v24, %v1159_v23  ;;  %v8167_v36 = vld [vmem:[#allocation2 + $0xa] sm:$0xff] }
 0x253   : > { %v1095_v29 = vsel %vm1089_vm1, %v1078_v20, %v1080_v25  ;;  %v1037_v30 = vmax.f32 %v8058_v8, %v1014_v26  ;;  %v1038_v31 = vmax.f32 %v8060_v9, %v1014_v26  ;;  %v6947_v9 = vld [vmem:[%s10047_s3 + $0x10] ss:$8 sps:$4 sm:$0xff]   ;;  %v1379_v63 = vpack.c.bf16 %v8167_v36, %v1374_v3  ;;  %v6979_v23 = vld [vmem:[%s10047_s3 + $0xe4] ss:$8 sps:$4 sm:$0xff]   ;;  %v6982_v26 = vld [vmem:[%s10047_s3 + $0xf4] ss:$8 sps:$4 sm:$0xff]  }
 0x254   : > { %v1111_v33 = vmax.f32 %v990_v4, %v1095_v29  ;;  %6068 = vmatmul.mubr.msk.bf16.vlgmr.msra.gmra.mrb[0].mxu1 %vm452_vm0, %v1164_v27  ;;  %v1147_v59 = vld [vmem:[#allocation2 + $0x10] sm:$0xff]  ;;  %v6977_v4 = vld [vmem:[%s10047_s3 + $0xe0] ss:$8 sps:$4 sm:$0xff]   ;;  %v6985_v29 = vld [vmem:[%s10047_s3 + $0x104] ss:$8 sps:$4 sm:$0xff]  }
 0x255   : > { %1083 = vrot.lane.b32.xlu1 %v1038_v31, %s10057_s29  ;;  %1081 = vrot.lane.b32.xlu0 %v1037_v30, %s10057_s29  ;;  %v8158_v6 = vld [vmem:[#allocation2 + $0x11] sm:$0xff]  ;;  %v1504_v20 = vpack.c.bf16 %v1147_v59, %v1146_v51  ;;  %v6983_v30 = vld [vmem:[%s10047_s3 + $0x100] ss:$8 sps:$4 sm:$0xff]  }
 0x256   : > { %v8160_v34 = vld [vmem:[#allocation2 + $0x12] sm:$0xff]  ;;  %v1126_v35 = vadd.f32 %v8121_v45, %v1111_v33  ;;  %1255 = vmatprep.mubr.bf16.mxu1 %v7734_v2  ;;  %1314 = vmatpush1.bf16.msra.mxu1 %v6944_v28  ;;  %v1629_v37 = vpack.c.bf16 %v8158_v6, %v8141_v24  ;;  %v6991_v33 = vld [vmem:[%s10047_s3 + $0x124] ss:$8 sps:$4 sm:$0xff]  }
 0x257   : > { %1315 = vmatprep.subr.bf16.mxu1 %v6949_v32  ;;  %v1754_v39 = vpack.c.bf16 %v8160_v34, %v8167_v36  ;;  %v1148_v58 = vld [vmem:[#allocation2 + $0x18] sm:$0xff] }
 0x258   : > { %v1134_v40 = vmax.f32 %v1126_v35, 0.0  ;;  %v8225_v61 = vpack.c.bf16 %v1148_v58, %v1147_v59  ;;  %v6974_v22 = vld [vmem:[%s10047_s3 + $0xd0] ss:$8 sps:$4 sm:$0xff]   ;;  %v6988_v31 = vld [vmem:[%s10047_s3 + $0x114] ss:$8 sps:$4 sm:$0xff]  }
 0x259   : > { %975 = vrot.lane.b32.xlu1 %v8064_v10, %s7735_s14  ;;  %1015 = vrot.lane.b32.xlu0 %v8066_v11, %s7735_s14  ;;  %v8180_v41 = vld [vmem:[#allocation2 + $0x19] sm:$0xff]  ;;  %v7003_v59 = vld [vmem:[%s10047_s3 + $0x164] ss:$8 sps:$4 sm:$0xff]   ;;  %s10060_s14 = smov 88  }
 0x25a   : > { %1142 = vst.msk [vmem:[#allocation2 + $0x28] sm:$0xff] %vm452_vm0, %v1134_v40  ;;  %v8185_v42 = vpack.c.bf16 %v8180_v41, %v8158_v6  ;;  %1316 = vmatpush1.bf16.msra.mxu1 %v6947_v9  ;;  %v8202_v49 = vld [vmem:[#allocation2 + $0x20] sm:$0xff]  ;;  %v6980_v28 = vld [vmem:[%s10047_s3 + $0xf0] ss:$8 sps:$4 sm:$0xff]   ;;  %v974_v6 = vpop.permute.xlu1 %973  ;;  %v7000_v36 = vld [vmem:[%s10047_s3 + $0x154] ss:$8 sps:$4 sm:$0xff]  }
 0x25b   : > { %1317 = vmatprep.subr.bf16.mxu1 %v6952_v38  ;;  %v1152_v0 = vpack.c.bf16 %v8202_v49, %v8202_v49  ;;  %v8252_v14 = vld [vmem:[#allocation2 + $0x1a] sm:$0xff]  ;;  %v1505_v25 = vpack.c.bf16 %v8202_v49, %v1148_v58  ;;  %v991_v35 = vmax.f32 %v8058_v8, %v974_v6 }
 0x25c   : > { %6069 = vmatmul.mubr.msk.bf16.gmra.mrb[4].mxu1 %vm452_vm0, %v8185_v42  ;;  %v8259_v16 = vpack.c.bf16 %v8252_v14, %v8160_v34  ;;  %v6986_v32 = vld [vmem:[%s10047_s3 + $0x110] ss:$8 sps:$4 sm:$0xff]  }
 0x25d   : > { %1265 = vmatprep.mubr.bf16.mxu1 %v7734_v2  ;;  %v6998_v58 = vld [vmem:[%s10047_s3 + $0x150] ss:$8 sps:$4 sm:$0xff]  }
 0x25e   : > { %1318 = vmatpush1.bf16.msra.mxu1 %v6950_v43 }
 0x25f   : > { %1428 = vmatprep.subr.bf16.mxu1 %v6955_v44 }
 0x261   : > { %v8196_v46 = vld [vmem:[#allocation2 + $0x21] sm:$0xff] }
 0x262   : > { %v8198_v47 = vld [vmem:[#allocation2 + $0x28] sm:$0xff]  ;;  %v1166_v48 = vpack.c.bf16 %v8196_v46, %v8196_v46  ;;  %v1630_v24 = vpack.c.bf16 %v8196_v46, %v8180_v41 }
 0x263   : > { %v1880_v50 = vpack.c.bf16 %v8198_v47, %v8202_v49  ;;  %v8267_v17 = vld [vmem:[#allocation2 + $0x22] sm:$0xff]  ;;  %v1506_v27 = vpack.c.bf16 %v8198_v47, %v8198_v47  ;;  %v7012_v47 = vld [vmem:[%s10047_s3 + $0x194] ss:$8 sps:$4 sm:$0xff]   ;;  %v7010_v49 = vld [vmem:[%s10047_s3 + $0x190] ss:$8 sps:$4 sm:$0xff]  }
 0x264   : > { %6070 = vmatmul.mubr.msk.bf16.gmra.mrb[8].mxu1 %vm452_vm0, %v1166_v48  ;;  %v1381_v18 = vpack.c.bf16 %v8267_v17, %v8267_v17  ;;  %v1755_v34 = vpack.c.bf16 %v8267_v17, %v8252_v14 }
 0x265   : > { %1345 = vmatprep.mubr.bf16.mxu1 %v7734_v2 }
 0x26c   : > { %6077 = vmatmul.mubr.msk.bf16.vlgmr.msra.gmra.mrb[0].mxu1 %vm452_vm0, %v1150_v54  ;;  %v6992_v54 = vld [vmem:[%s10047_s3 + $0x130] ss:$8 sps:$4 sm:$0xff]  }
 0x26d   : > { %1355 = vmatprep.mubr.bf16.mxu1 %v7734_v2  ;;  %1429 = vmatpush1.bf16.msra.mxu1 %v6953_v53  ;;  %v6989_v53 = vld [vmem:[%s10047_s3 + $0x120] ss:$8 sps:$4 sm:$0xff]  }
 0x26e   : > { %1430 = vmatprep.subr.bf16.mxu1 %v6958_v55  ;;  %v6997_v55 = vld [vmem:[%s10047_s3 + $0x144] ss:$8 sps:$4 sm:$0xff]  }
 0x271   : > { %1431 = vmatpush1.bf16.msra.mxu1 %v6956_v56  ;;  %v6995_v56 = vld [vmem:[%s10047_s3 + $0x140] ss:$8 sps:$4 sm:$0xff]  }
 0x272   : > { %1432 = vmatprep.subr.bf16.mxu1 %v6961_v57 }
 0x274   : > { %6078 = vmatmul.mubr.msk.bf16.gmra.mrb[4].mxu1 %vm452_vm0, %v8225_v61 }
 0x275   : > { %1365 = vmatprep.mubr.bf16.mxu1 %v7734_v2  ;;  %1433 = vmatpush1.bf16.msra.mxu1 %v6959_v60  ;;  %v7001_v60 = vld [vmem:[%s10047_s3 + $0x160] ss:$8 sps:$4 sm:$0xff]  }
 0x276   : > { %1553 = vmatprep.subr.bf16.mxu1 %v6964_v62  ;;  %v7006_v62 = vld [vmem:[%s10047_s3 + $0x174] ss:$8 sps:$4 sm:$0xff]  }
 0x27c   : > { %6079 = vmatmul.mubr.msk.bf16.gmra.mrb[8].mxu1 %vm452_vm0, %v1152_v0  ;;  %v7004_v0 = vld [vmem:[%s10047_s3 + $0x170] ss:$8 sps:$4 sm:$0xff]  }
 0x27d   : > { %1460 = vmatprep.mubr.bf16.mxu1 %v7734_v2 }
 0x284   : > { %6092 = vmatmul.mubr.msk.bf16.vlgmr.msra.gmra.mrb[0].mxu1 %vm452_vm0, %v1379_v63  ;;  %v7007_v63 = vld [vmem:[%s10047_s3 + $0x180] ss:$8 sps:$4 sm:$0xff]  }
 0x285   : > { %1470 = vmatprep.mubr.bf16.mxu1 %v7734_v2  ;;  %1554 = vmatpush1.bf16.msra.mxu1 %v6962_v5 }
 0x286   : > { %1555 = vmatprep.subr.bf16.mxu1 %v6967_v7  ;;  %v7013_v7 = vld [vmem:[%s10047_s3 + $0x1a0] ss:$8 sps:$4 sm:$0xff]  }
 0x289   : > { %1556 = vmatpush1.bf16.msra.mxu1 %v6965_v12 }
 0x28a   : > { %1557 = vmatprep.subr.bf16.mxu1 %v6970_v13 }
 0x28c   : > { %6093 = vmatmul.mubr.msk.bf16.gmra.mrb[4].mxu1 %vm452_vm0, %v8259_v16 }
 0x28d   : > { %1480 = vmatprep.mubr.bf16.mxu1 %v7734_v2  ;;  %1558 = vmatpush1.bf16.msra.mxu1 %v6968_v15 }
 0x28e   : > { %1678 = vmatprep.subr.bf16.mxu1 %v6973_v1 }
 0x294   : > { %6094 = vmatmul.mubr.msk.bf16.gmra.mrb[8].mxu1 %vm452_vm0, %v1381_v18 }
 0x295   : > { %1585 = vmatprep.mubr.bf16.mxu1 %v7734_v2 }
 0x29c   : > { %6107 = vmatmul.mubr.msk.bf16.vlgmr.msra.gmra.mrb[0].mxu1 %vm452_vm0, %v1504_v20 }
 0x29d   : > { %1595 = vmatprep.mubr.bf16.mxu1 %v7734_v2  ;;  %1679 = vmatpush1.bf16.msra.mxu1 %v6971_v19 }
 0x29e   : > { %1680 = vmatprep.subr.bf16.mxu1 %v6976_v21 }
 0x2a1   : > { %1681 = vmatpush1.bf16.msra.mxu1 %v6974_v22 }
 0x2a2   : > { %1682 = vmatprep.subr.bf16.mxu1 %v6979_v23 }
 0x2a4   : > { %6108 = vmatmul.mubr.msk.bf16.gmra.mrb[4].mxu1 %vm452_vm0, %v1505_v25 }
 0x2a5   : > { %1605 = vmatprep.mubr.bf16.mxu1 %v7734_v2  ;;  %1683 = vmatpush1.bf16.msra.mxu1 %v6977_v4 }
 0x2a6   : > { %1803 = vmatprep.subr.bf16.mxu1 %v6982_v26 }
 0x2ac   : > { %6109 = vmatmul.mubr.msk.bf16.gmra.mrb[8].mxu1 %vm452_vm0, %v1506_v27 }
 0x2ad   : > { %1710 = vmatprep.mubr.bf16.mxu1 %v7734_v2 }
 0x2b4   : > { %6122 = vmatmul.mubr.msk.bf16.vlgmr.msra.gmra.mrb[0].mxu1 %vm452_vm0, %v1629_v37 }
 0x2b5   : > { %1720 = vmatprep.mubr.bf16.mxu1 %v7734_v2  ;;  %1804 = vmatpush1.bf16.msra.mxu1 %v6980_v28 }
 0x2b6   : > { %1805 = vmatprep.subr.bf16.mxu1 %v6985_v29 }
 0x2b9   : > { %1806 = vmatpush1.bf16.msra.mxu1 %v6983_v30 }
 0x2ba   : > { %1807 = vmatprep.subr.bf16.mxu1 %v6988_v31 }
 0x2bc   : > { %6123 = vmatmul.mubr.msk.bf16.gmra.mrb[4].mxu1 %vm452_vm0, %v1630_v24 }
 0x2bd   : > { %1730 = vmatprep.mubr.bf16.mxu1 %v7734_v2  ;;  %1808 = vmatpush1.bf16.msra.mxu1 %v6986_v32 }
 0x2be   : > { %1928 = vmatprep.subr.bf16.mxu1 %v6991_v33 }
 0x2c7   : > { %v1084_v9 = vpop.permute.xlu1 %1083  ;;  %v1082_v37 = vpop.permute.xlu0 %1081 }
 0x2c8   : > { %v1096_v38 = vsel %vm1089_vm1, %v1082_v37, %v1084_v9 }
 0x2c9   : > { %v1112_v40 = vmax.f32 %v991_v35, %v1096_v38 }
 0x2cb   : > { %v1127_v41 = vadd.f32 %v8121_v45, %v1112_v40  ;;  %v1016_v43 = vpop.permute.xlu0 %1015 }
 0x2cc   : > { %v1039_v44 = vmax.f32 %v8064_v10, %v1016_v43  ;;  %v1040_v48 = vmax.f32 %v8066_v11, %v1016_v43  ;;  %v6994_v11 = vld [vmem:[%s10047_s3 + $0x134] ss:$8 sps:$4 sm:$0xff]  }
 0x2cd   : > { %v1135_v51 = vmax.f32 %v1127_v41, 0.0 }
 0x2ce   : > { %1087 = vrot.lane.b32.xlu1 %v1040_v48, %s10057_s29  ;;  %1085 = vrot.lane.b32.xlu0 %v1039_v44, %s10057_s29  ;;  %s10059_s29 = smov 124  }
 0x2cf   : > { %1143 = vst.msk [vmem:[#allocation2 + $0x30] sm:$0xff] %vm452_vm0, %v1135_v51 }
 0x2d6   : > { %v1628_v8 = vld [vmem:[#allocation2 + $0x29] sm:$0xff] }
 0x2d7   : > { %v1631_v52 = vpack.c.bf16 %v1628_v8, %v1628_v8  ;;  %v1878_v3 = vld [vmem:[#allocation2 + $0x30] sm:$0xff]  ;;  %v2005_v12 = vpack.c.bf16 %v1628_v8, %v8196_v46 }
 0x2d8   : > { %v1881_v5 = vpack.c.bf16 %v1878_v3, %v1878_v3  ;;  %v7042_v3 = vld [vmem:[%s10049_s5 + $0xc4] ss:$24 sps:$4 sm:$0xff]  }
 0x2d9   : > { %6124 = vmatmul.mubr.msk.bf16.gmra.mrb[8].mxu1 %vm452_vm0, %v1631_v52  ;;  %v7016_v52 = vld [vmem:[%s10049_s5] ss:$24 sps:$4 sm:$0xff]  }
 0x2da   : > { %1835 = vmatprep.mubr.bf16.mxu1 %v7734_v2 }
 0x2e1   : > { %6137 = vmatmul.mubr.msk.bf16.vlgmr.msra.gmra.mrb[0].mxu1 %vm452_vm0, %v1754_v39  ;;  %v1753_v39 = vld [vmem:[#allocation2 + $0x2a] sm:$0xff] }
 0x2e2   : > { %1845 = vmatprep.mubr.bf16.mxu1 %v7734_v2  ;;  %1929 = vmatpush1.bf16.msra.mxu1 %v6989_v53  ;;  %v1756_v57 = vpack.c.bf16 %v1753_v39, %v1753_v39  ;;  %v7018_v53 = vld [vmem:[%s10049_s5 + $0x4] ss:$24 sps:$4 sm:$0xff]  }
 0x2e3   : > { %1930 = vmatprep.subr.bf16.mxu1 %v6994_v11  ;;  %v7019_v11 = vld [vmem:[%s10049_s5 + $0x8] ss:$24 sps:$4 sm:$0xff]   ;;  %4619 = vmatprep.subr.bf16.mxu0 %v7018_v53 }
 0x2e4   : > { %4620 = vmatpush1.bf16.msra.mxu0 %v7016_v52  ;;  %v7088_v52 = vld [vmem:[%s10049_s5 + $0x240] ss:$24 sps:$4 sm:$0xff]  }
 0x2e5   : > { %v7091_v53 = vld [vmem:[%s10049_s5 + $0x248] ss:$24 sps:$4 sm:$0xff]  }
 0x2e6   : > { %1931 = vmatpush1.bf16.msra.mxu1 %v6992_v54  ;;  %v7021_v54 = vld [vmem:[%s10049_s5 + $0xc] ss:$24 sps:$4 sm:$0xff]  }
 0x2e7   : > { %1932 = vmatprep.subr.bf16.mxu1 %v6997_v55  ;;  %v7024_v55 = vld [vmem:[%s10049_s5 + $0x34] ss:$24 sps:$4 sm:$0xff]  }
 0x2e8   : > { %4621 = vmatprep.subr.bf16.mxu0 %v7024_v55 }
 0x2e9   : > { %6138 = vmatmul.mubr.msk.bf16.gmra.mrb[4].mxu1 %vm452_vm0, %v1755_v34  ;;  %v7022_v34 = vld [vmem:[%s10049_s5 + $0x30] ss:$24 sps:$4 sm:$0xff]  }
 0x2ea   : > { %1855 = vmatprep.mubr.bf16.mxu1 %v7734_v2  ;;  %1933 = vmatpush1.bf16.msra.mxu1 %v6995_v56  ;;  %v7027_v56 = vld [vmem:[%s10049_s5 + $0x3c] ss:$24 sps:$4 sm:$0xff]  }
 0x2eb   : > { %2053 = vmatprep.subr.bf16.mxu1 %v7000_v36  ;;  %v7025_v36 = vld [vmem:[%s10049_s5 + $0x38] ss:$24 sps:$4 sm:$0xff]   ;;  %4622 = vmatpush1.bf16.msra.mxu0 %v7022_v34  ;;  %v7099_v34 = vld [vmem:[%s10049_s5 + $0x27c] ss:$24 sps:$4 sm:$0xff]  }
 0x2f1   : > { %6139 = vmatmul.mubr.msk.bf16.gmra.mrb[8].mxu1 %vm452_vm0, %v1756_v57  ;;  %v7033_v57 = vld [vmem:[%s10049_s5 + $0x6c] ss:$24 sps:$4 sm:$0xff]  }
 0x2f2   : > { %1960 = vmatprep.mubr.bf16.mxu1 %v7734_v2 }
 0x2f9   : > { %6152 = vmatmul.mubr.msk.bf16.vlgmr.msra.gmra.mrb[0].mxu1 %vm452_vm0, %v8225_v61  ;;  %v7009_v61 = vld [vmem:[%s10047_s3 + $0x184] ss:$8 sps:$4 sm:$0xff]  }
 0x2fa   : > { %1970 = vmatprep.mubr.bf16.mxu1 %v7734_v2  ;;  %2054 = vmatpush1.bf16.msra.mxu1 %v6998_v58  ;;  %v7028_v58 = vld [vmem:[%s10049_s5 + $0x60] ss:$24 sps:$4 sm:$0xff]  }
 0x2fb   : > { %2055 = vmatprep.subr.bf16.mxu1 %v7003_v59  ;;  %v7031_v59 = vld [vmem:[%s10049_s5 + $0x68] ss:$24 sps:$4 sm:$0xff]  }
 0x2fe   : > { %2056 = vmatpush1.bf16.msra.mxu1 %v7001_v60  ;;  %v7036_v60 = vld [vmem:[%s10049_s5 + $0x94] ss:$24 sps:$4 sm:$0xff]  }
 0x2ff   : > { %2057 = vmatprep.subr.bf16.mxu1 %v7006_v62  ;;  %v7039_v62 = vld [vmem:[%s10049_s5 + $0x9c] ss:$24 sps:$4 sm:$0xff]  }
 0x301   : > { %6153 = vmatmul.mubr.msk.bf16.gmra.mrb[4].mxu1 %vm452_vm0, %v1880_v50  ;;  %v7015_v50 = vld [vmem:[%s10047_s3 + $0x1a4] ss:$8 sps:$4 sm:$0xff]  }
 0x302   : > { %1980 = vmatprep.mubr.bf16.mxu1 %v7734_v2  ;;  %2058 = vmatpush1.bf16.msra.mxu1 %v7004_v0  ;;  %v7034_v0 = vld [vmem:[%s10049_s5 + $0x90] ss:$24 sps:$4 sm:$0xff]  }
 0x303   : > { %2178 = vmatprep.subr.bf16.mxu1 %v7009_v61  ;;  %v7037_v61 = vld [vmem:[%s10049_s5 + $0x98] ss:$24 sps:$4 sm:$0xff]  }
 0x309   : > { %6154 = vmatmul.mubr.msk.bf16.gmra.mrb[8].mxu1 %vm452_vm0, %v1881_v5  ;;  %v7045_v5 = vld [vmem:[%s10049_s5 + $0xcc] ss:$24 sps:$4 sm:$0xff]  }
 0x30a   : > { %2085 = vmatprep.mubr.bf16.mxu1 %v7734_v2 }
 0x311   : > { %6167 = vmatmul.mubr.msk.bf16.vlgmr.msra.gmra.mrb[0].mxu1 %vm452_vm0, %v8185_v42  ;;  %v976_v42 = vpop.permute.xlu1 %975 }
 0x312   : > { %2095 = vmatprep.mubr.bf16.mxu1 %v7734_v2  ;;  %2179 = vmatpush1.bf16.msra.mxu1 %v7007_v63  ;;  %v992_v13 = vmax.f32 %v8064_v10, %v976_v42  ;;  %v2130_v10 = vpack.c.bf16 %v1753_v39, %v8267_v17  ;;  %v7030_v39 = vld [vmem:[%s10049_s5 + $0x64] ss:$24 sps:$4 sm:$0xff]   ;;  %v7040_v63 = vld [vmem:[%s10049_s5 + $0xc0] ss:$24 sps:$4 sm:$0xff]  }
 0x313   : > { %2180 = vmatprep.subr.bf16.mxu1 %v7012_v47  ;;  %4623 = vmatprep.subr.bf16.mxu0 %v7030_v39  ;;  %v7043_v47 = vld [vmem:[%s10049_s5 + $0xc8] ss:$24 sps:$4 sm:$0xff]   ;;  %v7054_v42 = vld [vmem:[%s10049_s5 + $0x124] ss:$24 sps:$4 sm:$0xff]  }
 0x314   : > { %4624 = vmatpush1.bf16.msra.mxu0 %v7028_v58 }
 0x315   : > { %4625 = vmatprep.subr.bf16.mxu0 %v7036_v60  ;;  %v7100_v60 = vld [vmem:[%s10049_s5 + $0x2a0] ss:$24 sps:$4 sm:$0xff]  }
 0x316   : > { %2181 = vmatpush1.bf16.msra.mxu1 %v7010_v49  ;;  %v7048_v49 = vld [vmem:[%s10049_s5 + $0xf4] ss:$24 sps:$4 sm:$0xff]  }
 0x317   : > { %2182 = vmatprep.subr.bf16.mxu1 %v7015_v50  ;;  %v7051_v50 = vld [vmem:[%s10049_s5 + $0xfc] ss:$24 sps:$4 sm:$0xff]  }
 0x318   : > { %4626 = vmatpush1.bf16.msra.mxu0 %v7034_v0 }
 0x319   : > { %6168 = vmatmul.mubr.msk.bf16.gmra.mrb[4].mxu1 %vm452_vm0, %v2005_v12  ;;  %4627 = vmatprep.subr.bf16.mxu0 %v7042_v3  ;;  %v7049_v12 = vld [vmem:[%s10049_s5 + $0xf8] ss:$24 sps:$4 sm:$0xff]   ;;  %v7105_v3 = vld [vmem:[%s10049_s5 + $0x2ac] ss:$24 sps:$4 sm:$0xff]  }
 0x31a   : > { %2105 = vmatprep.mubr.bf16.mxu1 %v7734_v2  ;;  %2183 = vmatpush1.bf16.msra.mxu1 %v7013_v7  ;;  %v7046_v7 = vld [vmem:[%s10049_s5 + $0xf0] ss:$24 sps:$4 sm:$0xff]  }
 0x31b   : > { %4783 = vmatprep.subr.bf16.mxu1 %v7021_v54 }
 0x31c   : > { %4628 = vmatpush1.bf16.msra.mxu0 %v7040_v63 }
 0x31d   : > { %4629 = vmatprep.subr.bf16.mxu0 %v7048_v49 }
 0x320   : > { %4630 = vmatpush1.bf16.msra.mxu0 %v7046_v7  ;;  %v7106_v7 = vld [vmem:[%s10049_s5 + $0x2d0] ss:$24 sps:$4 sm:$0xff]  }
 0x321   : > { %4631 = vmatprep.subr.bf16.mxu0 %v7054_v42  ;;  %v7109_v42 = vld [vmem:[%s10049_s5 + $0x2d8] ss:$24 sps:$4 sm:$0xff]  }
 0x340   : > { %v1088_v14 = vpop.permute.xlu1 %1087  ;;  %v1086_v15 = vpop.permute.xlu0 %1085 }
 0x341   : > { %v1097_v1 = vsel %vm1089_vm1, %v1086_v15, %v1088_v14  ;;  %v7052_v14 = vld [vmem:[%s10049_s5 + $0x120] ss:$24 sps:$4 sm:$0xff]  }
 0x342   : > { %v1113_v18 = vmax.f32 %v992_v13, %v1097_v1  ;;  %v7057_v13 = vld [vmem:[%s10049_s5 + $0x12c] ss:$24 sps:$4 sm:$0xff]   ;;  %v7055_v15 = vld [vmem:[%s10049_s5 + $0x128] ss:$24 sps:$4 sm:$0xff]   ;;  %4632 = vmatpush1.bf16.msra.mxu0 %v7052_v14  ;;  %v7111_v14 = vld [vmem:[%s10049_s5 + $0x2dc] ss:$24 sps:$4 sm:$0xff]  }
 0x343   : > { %v7060_v1 = vld [vmem:[%s10049_s5 + $0x154] ss:$24 sps:$4 sm:$0xff]  }
 0x344   : > { %v1128_v19 = vadd.f32 %v8121_v45, %v1113_v18  ;;  %v7063_v18 = vld [vmem:[%s10049_s5 + $0x15c] ss:$24 sps:$4 sm:$0xff]   ;;  %4633 = vmatprep.subr.bf16.mxu0 %v7060_v1 }
 0x345   : > { %v7114_v1 = vld [vmem:[%s10049_s5 + $0x304] ss:$24 sps:$4 sm:$0xff]  }
 0x346   : > { %v1136_v20 = vmax.f32 %v1128_v19, 0.0  ;;  %v7058_v19 = vld [vmem:[%s10049_s5 + $0x150] ss:$24 sps:$4 sm:$0xff]  }
 0x347   : > { %4634 = vmatpush1.bf16.msra.mxu0 %v7058_v19 }
 0x348   : > { %1144 = vst.msk [vmem:[#allocation2 + $0x38] sm:$0xff] %vm452_vm0, %v1136_v20  ;;  %v7061_v20 = vld [vmem:[%s10049_s5 + $0x158] ss:$24 sps:$4 sm:$0xff]  }
 0x34f   : > { %v2003_v46 = vld [vmem:[#allocation2 + $0x31] sm:$0xff] }
 0x350   : > { %v2006_v21 = vpack.c.bf16 %v2003_v46, %v2003_v46  ;;  %v2128_v45 = vld [vmem:[#allocation2 + $0x32] sm:$0xff]  ;;  %v7066_v46 = vld [vmem:[%s10049_s5 + $0x184] ss:$24 sps:$4 sm:$0xff]  }
 0x351   : > { %v2131_v22 = vpack.c.bf16 %v2128_v45, %v2128_v45  ;;  %4635 = vmatprep.subr.bf16.mxu0 %v7066_v46  ;;  %v7067_v45 = vld [vmem:[%s10049_s5 + $0x188] ss:$24 sps:$4 sm:$0xff]  }
 0x352   : > { %6169 = vmatmul.mubr.msk.bf16.gmra.mrb[8].mxu1 %vm452_vm0, %v2006_v21  ;;  %v7069_v21 = vld [vmem:[%s10049_s5 + $0x18c] ss:$24 sps:$4 sm:$0xff]  }
 0x353   : > { %2210 = vmatprep.mubr.bf16.mxu1 %v7734_v2 }
 0x35a   : > { %6182 = vmatmul.mubr.msk.bf16.vlgmr.msra.gmra.mrb[0].mxu1 %vm452_vm0, %v8259_v16 }
 0x35b   : > { %2220 = vmatprep.mubr.bf16.mxu1 %v7734_v2  ;;  %4784 = vmatpush1.bf16.msra.mxu1 %v7019_v11 }
 0x35c   : > { %4785 = vmatprep.subr.bf16.mxu1 %v7027_v56  ;;  %v7096_v56 = vld [vmem:[%s10049_s5 + $0x274] ss:$24 sps:$4 sm:$0xff]  }
 0x35f   : > { %4786 = vmatpush1.bf16.msra.mxu1 %v7025_v36  ;;  %v7094_v36 = vld [vmem:[%s10049_s5 + $0x270] ss:$24 sps:$4 sm:$0xff]  }
 0x360   : > { %4787 = vmatprep.subr.bf16.mxu1 %v7033_v57 }
 0x362   : > { %6183 = vmatmul.mubr.msk.bf16.gmra.mrb[4].mxu1 %vm452_vm0, %v2130_v10  ;;  %v7064_v10 = vld [vmem:[%s10049_s5 + $0x180] ss:$24 sps:$4 sm:$0xff]  }
 0x363   : > { %2230 = vmatprep.mubr.bf16.mxu1 %v7734_v2  ;;  %4788 = vmatpush1.bf16.msra.mxu1 %v7031_v59 }
 0x364   : > { %4789 = vmatprep.subr.bf16.mxu1 %v7039_v62  ;;  %4636 = vmatpush1.bf16.msra.mxu0 %v7064_v10  ;;  %v7102_v62 = vld [vmem:[%s10049_s5 + $0x2a4] ss:$24 sps:$4 sm:$0xff]  }
 0x367   : > { %4790 = vmatpush1.bf16.msra.mxu1 %v7037_v61  ;;  %v7103_v61 = vld [vmem:[%s10049_s5 + $0x2a8] ss:$24 sps:$4 sm:$0xff]  }
 0x368   : > { %4791 = vmatprep.subr.bf16.mxu1 %v7045_v5 }
 0x36a   : > { %6184 = vmatmul.mubr.msk.bf16.gmra.mrb[8].mxu1 %vm452_vm0, %v2131_v22  ;;  %v7072_v22 = vld [vmem:[%s10049_s5 + $0x1b4] ss:$24 sps:$4 sm:$0xff]  }
 0x36b   : > { %4792 = vmatpush1.bf16.msra.mxu1 %v7043_v47  ;;  %4637 = vmatprep.subr.bf16.mxu0 %v7072_v22 }
 0x36c   : > { %4793 = vmatprep.subr.bf16.mxu1 %v7051_v50 }
 0x36f   : > { %4794 = vmatpush1.bf16.msra.mxu1 %v7049_v12 }
 0x370   : > { %4795 = vmatprep.subr.bf16.mxu1 %v7057_v13 }
 0x373   : > { %4796 = vmatpush1.bf16.msra.mxu1 %v7055_v15 }
 0x374   : > { %4797 = vmatprep.subr.bf16.mxu1 %v7063_v18 }
 0x377   : > { %4798 = vmatpush1.bf16.msra.mxu1 %v7061_v20  ;;  %v7117_v20 = vld [vmem:[%s10049_s5 + $0x30c] ss:$24 sps:$4 sm:$0xff]  }
 0x378   : > { %4799 = vmatprep.subr.bf16.mxu1 %v7069_v21 }
 0x37b   : > { %4800 = vmatpush1.bf16.msra.mxu1 %v7067_v45 }
 0x42d   : > { %v8428_v23 = vpop.f32.mrb[0].mxu1 }
 0x42e   : > { %2254 = vrot.lane.b32.xlu0 %v8428_v23, %s7737_s24  ;;  %v2214_v4 = vpop.f32.mrb[1].mxu1 }
 0x42f   : > { %2279 = vrot.lane.b32.xlu1 %v2214_v4, %s7737_s24  ;;  %v8433_v16 = vpop.f32.mrb[2].mxu1  ;;  %v7075_v4 = vld [vmem:[%s10049_s5 + $0x1bc] ss:$24 sps:$4 sm:$0xff]  }
 0x430   : > { %v2218_v17 = vpop.f32.mrb[3].mxu1  ;;  %4801 = vmatprep.subr.bf16.mxu1 %v7075_v4 }
 0x432   : > { %2256 = vrot.lane.b32.xlu0 %v8433_v16, %s7737_s24 }
 0x433   : > { %2281 = vrot.lane.b32.xlu1 %v2218_v17, %s7737_s24  ;;  %v7070_v17 = vld [vmem:[%s10049_s5 + $0x1b0] ss:$24 sps:$4 sm:$0xff]  }
 0x434   : > { %4638 = vmatpush1.bf16.msra.mxu0 %v7070_v17 }
 0x435   : > { %v8438_v25 = vpop.f32.mrb[4].mxu1 }
 0x436   : > { %2258 = vrot.lane.b32.xlu0 %v8438_v25, %s7737_s24  ;;  %v2224_v26 = vpop.f32.mrb[5].mxu1 }
 0x437   : > { %2283 = vrot.lane.b32.xlu1 %v2224_v26, %s7737_s24  ;;  %v8443_v27 = vpop.f32.mrb[6].mxu1  ;;  %v7073_v26 = vld [vmem:[%s10049_s5 + $0x1b8] ss:$24 sps:$4 sm:$0xff]  }
 0x438   : > { %v2228_v28 = vpop.f32.mrb[7].mxu1  ;;  %4802 = vmatpush1.bf16.msra.mxu1 %v7073_v26 }
 0x43d   : > { %v8445_v29 = vpop.f32.mrb[8].mxu1 }
 0x43e   : > { %v2234_v30 = vpop.f32.mrb[9].mxu1 }
 0x43f   : > { %v2236_v31 = vpop.f32.mrb[10].mxu1 }
 0x440   : > { %v2237_v32 = vpop.f32.mrb[11].mxu1  ;;  %v7076_v31 = vld [vmem:[%s10049_s5 + $0x1e0] ss:$24 sps:$4 sm:$0xff]  }
 0x441   : > { %v7079_v32 = vld [vmem:[%s10049_s5 + $0x1e8] ss:$24 sps:$4 sm:$0xff]  }
 0x4a0   : > { %v8447_v24 = vpop.permute.xlu0 %2254 }
 0x4a1   : > { %v2269_v33 = vmax.f32 %v8428_v23, %v8447_v24  ;;  %v2280_v6 = vpop.permute.xlu1 %2279 }
 0x4a2   : > { %v2290_v35 = vsel %vm2289_vm2, %v8447_v24, %v2280_v6  ;;  %v7084_v6 = vld [vmem:[%s10049_s5 + $0x214] ss:$24 sps:$4 sm:$0xff]  }
 0x4a3   : > { %v2300_v9 = vmax.f32 %v8428_v23, %v2290_v35  ;;  %v7087_v35 = vld [vmem:[%s10049_s5 + $0x21c] ss:$24 sps:$4 sm:$0xff]  }
 0x4a4   : > { %v8454_v37 = vpop.permute.xlu0 %2256 }
 0x4a5   : > { %v2270_v38 = vmax.f32 %v8433_v16, %v8454_v37  ;;  %v2282_v40 = vpop.permute.xlu1 %2281  ;;  %2310 = vrot.lane.b32.xlu0 %v2300_v9, %s7738_s25  ;;  %v7082_v9 = vld [vmem:[%s10049_s5 + $0x210] ss:$24 sps:$4 sm:$0xff]  }
 0x4a6   : > { %v2291_v41 = vsel %vm2289_vm2, %v8454_v37, %v2282_v40  ;;  %v7085_v40 = vld [vmem:[%s10049_s5 + $0x218] ss:$24 sps:$4 sm:$0xff]  }
 0x4a7   : > { %v2301_v43 = vmax.f32 %v8433_v16, %v2291_v41  ;;  %v8622_v41 = vld [vmem:[%s10048_s4] ss:$0 sm:$0xff]  ;;  %v7097_v16 = vld [vmem:[%s10049_s5 + $0x278] ss:$24 sps:$4 sm:$0xff]  }
 0x4a8   : > { %v8462_v44 = vpop.permute.xlu0 %2258 }
 0x4a9   : > { %2312 = vrot.lane.b32.xlu1 %v2301_v43, %s7738_s25  ;;  %v2284_v48 = vpop.permute.xlu1 %2283  ;;  %2260 = vrot.lane.b32.xlu0 %v8443_v27, %s7737_s24  ;;  %v2271_v5 = vmax.f32 %v8438_v25, %v8462_v44 }
 0x4aa   : > { %v2292_v51 = vsel %vm2289_vm2, %v8462_v44, %v2284_v48 }
 0x4ab   : > { %v2302_v8 = vmax.f32 %v8438_v25, %v2292_v51  ;;  %v7090_v51 = vld [vmem:[%s10049_s5 + $0x244] ss:$24 sps:$4 sm:$0xff]   ;;  %v7108_v25 = vld [vmem:[%s10049_s5 + $0x2d4] ss:$24 sps:$4 sm:$0xff]  }
 0x4ad   : > { %2285 = vrot.lane.b32.xlu0 %v2228_v28, %s7737_s24  ;;  %2262 = vrot.lane.b32.xlu1 %v8445_v29, %s7737_s24  ;;  %v7078_v28 = vld [vmem:[%s10049_s5 + $0x1e4] ss:$24 sps:$4 sm:$0xff]  }
 0x4ae   : > { %4639 = vmatprep.subr.bf16.mxu0 %v7078_v28 }
 0x4af   : > { %4640 = vmatpush1.bf16.msra.mxu0 %v7076_v31 }
 0x4b0   : > { %4641 = vmatprep.subr.bf16.mxu0 %v7084_v6 }
 0x4b1   : > { %2314 = vrot.lane.b32.xlu0 %v2302_v8, %s7738_s25  ;;  %2287 = vrot.lane.b32.xlu1 %v2234_v30, %s7737_s24  ;;  %v7081_v30 = vld [vmem:[%s10049_s5 + $0x1ec] ss:$24 sps:$4 sm:$0xff]   ;;  %s7746_s24 = smov 104  }
 0x4b2   : > { %4803 = vmatprep.subr.bf16.mxu1 %v7081_v30  ;;  %v7093_v8 = vld [vmem:[%s10049_s5 + $0x24c] ss:$24 sps:$4 sm:$0xff]  }
 0x4b3   : > { %4804 = vmatpush1.bf16.msra.mxu1 %v7079_v32  ;;  %4642 = vmatpush1.bf16.msra.mxu0 %v7082_v9 }
 0x4b4   : > { %4805 = vmatprep.subr.bf16.mxu1 %v7087_v35  ;;  %4643 = vmatprep.subr.bf16.mxu0 %v7090_v51 }
 0x4b7   : > { %4806 = vmatpush1.bf16.msra.mxu1 %v7085_v40  ;;  %4644 = vmatpush1.bf16.msra.mxu0 %v7088_v52 }
 0x4b8   : > { %4807 = vmatprep.subr.bf16.mxu1 %v7093_v8  ;;  %4645 = vmatprep.subr.bf16.mxu0 %v7096_v56 }
 0x4bb   : > { %4808 = vmatpush1.bf16.msra.mxu1 %v7091_v53  ;;  %4646 = vmatpush1.bf16.msra.mxu0 %v7094_v36 }
 0x4bc   : > { %4809 = vmatprep.subr.bf16.mxu1 %v7099_v34  ;;  %4647 = vmatprep.subr.bf16.mxu0 %v7102_v62 }
 0x4bf   : > { %4810 = vmatpush1.bf16.msra.mxu1 %v7097_v16  ;;  %4648 = vmatpush1.bf16.msra.mxu0 %v7100_v60  ;;  %v7112_v16 = vld [vmem:[%s10049_s5 + $0x300] ss:$24 sps:$4 sm:$0xff]  }
 0x4c0   : > { %4811 = vmatprep.subr.bf16.mxu1 %v7105_v3  ;;  %4649 = vmatprep.subr.bf16.mxu0 %v7108_v25  ;;  %v7118_v3 = vld [vmem:[%s10049_s5 + $0x330] ss:$24 sps:$4 sm:$0xff]   ;;  %v7129_v25 = vld [vmem:[%s10049_s5 + $0x36c] ss:$24 sps:$4 sm:$0xff]  }
 0x4c3   : > { %4812 = vmatpush1.bf16.msra.mxu1 %v7103_v61  ;;  %4650 = vmatpush1.bf16.msra.mxu0 %v7106_v7  ;;  %v7123_v61 = vld [vmem:[%s10049_s5 + $0x33c] ss:$24 sps:$4 sm:$0xff]  }
 0x4c4   : > { %4813 = vmatprep.subr.bf16.mxu1 %v7111_v14  ;;  %4660 = vmatprep.subr.bf16.mxu0 %v7114_v1  ;;  %v7126_v7 = vld [vmem:[%s10049_s5 + $0x364] ss:$24 sps:$4 sm:$0xff]   ;;  %v7132_v1 = vld [vmem:[%s10049_s5 + $0x394] ss:$24 sps:$4 sm:$0xff]  }
 0x4c7   : > { %4814 = vmatpush1.bf16.msra.mxu1 %v7109_v42 }
 0x4c8   : > { %4824 = vmatprep.subr.bf16.mxu1 %v7117_v20  ;;  %v7130_v20 = vld [vmem:[%s10049_s5 + $0x390] ss:$24 sps:$4 sm:$0xff]  }
 0x517   : > { %v2311_v43 = vpop.permute.xlu0 %2310 }
 0x518   : > { %v2325_v48 = vmax.f32 %v2269_v33, %v2311_v43 }
 0x51a   : > { %v2337_v11 = vadd.f32 %v8622_v41, %v2325_v48 }
 0x51b   : > { %v2313_v23 = vpop.permute.xlu1 %2312  ;;  %v8640_v24 = vpop.permute.xlu0 %2260 }
 0x51c   : > { %v2342_v33 = vmax.f32 %v2337_v11, 0.0  ;;  %v2326_v54 = vmax.f32 %v2270_v38, %v2313_v23  ;;  %v2272_v55 = vmax.f32 %v8443_v27, %v8640_v24 }
 0x51e   : > { %2348 = vst.msk [vmem:[#allocation3] sm:$0xff] %vm2347_vm3, %v2342_v33  ;;  %v2338_v37 = vadd.f32 %v8622_v41, %v2326_v54 }
 0x51f   : > { %v2286_v38 = vpop.permute.xlu0 %2285  ;;  %v8661_v39 = vpop.permute.xlu1 %2262 }
 0x520   : > { %v2343_v57 = vmax.f32 %v2338_v37, 0.0  ;;  %v2293_v58 = vsel %vm2289_vm2, %v8640_v24, %v2286_v38  ;;  %v2273_v59 = vmax.f32 %v8445_v29, %v8661_v39 }
 0x521   : > { %v2303_v0 = vmax.f32 %v8443_v27, %v2293_v58  ;;  %v7115_v58 = vld [vmem:[%s10049_s5 + $0x308] ss:$24 sps:$4 sm:$0xff]  }
 0x522   : > { %2349 = vst.msk [vmem:[#allocation3 + $0x8] sm:$0xff] %vm2347_vm3, %v2343_v57 }
 0x523   : > { %v2315_v63 = vpop.permute.xlu0 %2314  ;;  %2316 = vrot.lane.b32.xlu1 %v2303_v0, %s7738_s25  ;;  %v2288_v47 = vpop.permute.xlu1 %2287  ;;  %v7120_v0 = vld [vmem:[%s10049_s5 + $0x334] ss:$24 sps:$4 sm:$0xff]  }
 0x524   : > { %v2327_v49 = vmax.f32 %v2271_v5, %v2315_v63  ;;  %v2294_v50 = vsel %vm2289_vm2, %v8661_v39, %v2288_v47  ;;  %v7121_v47 = vld [vmem:[%s10049_s5 + $0x338] ss:$24 sps:$4 sm:$0xff]   ;;  %vm4600_vm2 = vcmask 1041408  }
 0x525   : > { %v2304_v44 = vmax.f32 %v8445_v29, %v2294_v50  ;;  %v2356_v12 = vld [vmem:[#allocation3 + $0x3] sm:$0x1]  ;;  %v2357_v19 = vld [vmem:[#allocation3 + $0x4] sm:$0x1]  ;;  %v2354_v21 = vld [vmem:[#allocation3 + $0x1] sm:$0x1] }
 0x526   : > { %v2339_v13 = vadd.f32 %v8622_v41, %v2327_v49  ;;  %v2355_v45 = vld [vmem:[#allocation3 + $0x2] sm:$0x1]  ;;  %v2353_v33 = vld [vmem:[#allocation3] sm:$0x1] }
 0x527   : > { %2387 = vrot.lane.b32.xlu1 %v2356_v12, %s7739_s22  ;;  %2318 = vrot.lane.b32.xlu0 %v2304_v44, %s7738_s25  ;;  %s7748_s25 = smov 48   ;;  %v7124_v44 = vld [vmem:[%s10049_s5 + $0x360] ss:$24 sps:$4 sm:$0xff]  }
 0x528   : > { %v2344_v15 = vmax.f32 %v2339_v13, 0.0  ;;  %v7127_v12 = vld [vmem:[%s10049_s5 + $0x368] ss:$24 sps:$4 sm:$0xff]  }
 0x529   : > { %v2358_v18 = vld [vmem:[#allocation3 + $0x8] sm:$0x1]  ;;  %v2359_v46 = vld [vmem:[#allocation3 + $0x9] sm:$0x1]  ;;  %v2360_v10 = vld [vmem:[#allocation3 + $0xa] sm:$0x1] }
 0x52a   : > { %2350 = vst.msk [vmem:[#allocation3 + $0x10] sm:$0xff] %vm2347_vm3, %v2344_v15  ;;  %v2361_v22 = vld [vmem:[#allocation3 + $0xb] sm:$0x1]  ;;  %v2362_v17 = vld [vmem:[#allocation3 + $0xc] sm:$0x1] }
 0x52b   : > { %2395 = vrot.lane.b32.xlu1 %v2358_v18, %s7740_s12  ;;  %2391 = vrot.lane.b32.xlu0 %v2357_v19, %s7741_s13  ;;  %v7135_v18 = vld [vmem:[%s10049_s5 + $0x39c] ss:$24 sps:$4 sm:$0xff]  }
 0x52f   : > { %2399 = vrot.lane.b32.xlu1 %v2359_v46, %s10060_s14  ;;  %2379 = vrot.lane.b32.xlu0 %v2354_v21, %s7743_s16  ;;  %s7751_s14 = smov 120  }
 0x531   : > { %v2363_v4 = vld [vmem:[#allocation3 + $0x10] sm:$0x1]  ;;  %v2365_v26 = vld [vmem:[#allocation3 + $0x12] sm:$0x1]  ;;  %v2364_v28 = vld [vmem:[#allocation3 + $0x11] sm:$0x1] }
 0x532   : > { %v2366_v30 = vld [vmem:[#allocation3 + $0x13] sm:$0x1]  ;;  %v2367_v31 = vld [vmem:[#allocation3 + $0x14] sm:$0x1] }
 0x533   : > { %2403 = vrot.lane.b32.xlu1 %v2360_v10, %s10059_s29  ;;  %2383 = vrot.lane.b32.xlu0 %v2355_v45, %s7745_s19  ;;  %s7750_s29 = smov 84   ;;  %v7133_v45 = vld [vmem:[%s10049_s5 + $0x398] ss:$24 sps:$4 sm:$0xff]  }
 0x537   : > { %2407 = vrot.lane.b32.xlu1 %v2361_v22, %s10065_s26  ;;  %2415 = vrot.lane.b32.xlu0 %v2363_v4, %s7746_s24  ;;  %v7138_v4 = vld [vmem:[%s10049_s5 + $0x3c4] ss:$24 sps:$4 sm:$0xff]  }
 0x53b   : > { %2411 = vrot.lane.b32.xlu1 %v2362_v17, %s7747_s30  ;;  %2423 = vrot.lane.b32.xlu0 %v2365_v26, %s7748_s25  ;;  %v7141_v17 = vld [vmem:[%s10049_s5 + $0x3cc] ss:$24 sps:$4 sm:$0xff]  }
 0x53f   : > { %2419 = vrot.lane.b32.xlu1 %v2364_v28, %s7749_s15  ;;  %2427 = vrot.lane.b32.xlu0 %v2366_v30, %s7750_s29  ;;  %s10067_s29 = smov 124  }
 0x543   : > { %2431 = vrot.lane.b32.xlu0 %v2367_v31, %s7751_s14  ;;  %v7136_v31 = vld [vmem:[%s10049_s5 + $0x3c0] ss:$24 sps:$4 sm:$0xff]  }
 0x595   : > { %v2317_v32 = vpop.permute.xlu1 %2316 }
 0x596   : > { %v2328_v6 = vmax.f32 %v2272_v55, %v2317_v32  ;;  %v7139_v32 = vld [vmem:[%s10049_s5 + $0x3c8] ss:$24 sps:$4 sm:$0xff]  }
 0x598   : > { %v2340_v35 = vadd.f32 %v8622_v41, %v2328_v6  ;;  %v7144_v6 = vld [vmem:[%s10049_s5 + $0x3f4] ss:$24 sps:$4 sm:$0xff]  }
 0x599   : > { %v2319_v9 = vpop.permute.xlu0 %2318  ;;  %v2388_v40 = vpop.permute.xlu1 %2387 }
 0x59a   : > { %v2345_v43 = vmax.f32 %v2340_v35, 0.0  ;;  %v2329_v48 = vmax.f32 %v2273_v59, %v2319_v9  ;;  %v7147_v35 = vld [vmem:[%s10049_s5 + $0x3fc] ss:$24 sps:$4 sm:$0xff]   ;;  %v7142_v9 = vld [vmem:[%s10049_s5 + $0x3f0] ss:$24 sps:$4 sm:$0xff]  }
 0x59c   : > { %2351 = vst.msk [vmem:[#allocation3 + $0x18] sm:$0xff] %vm2347_vm3, %v2345_v43  ;;  %v2341_v51 = vadd.f32 %v8622_v41, %v2329_v48  ;;  %v7150_v43 = vld [vmem:[%s10049_s5 + $0x424] ss:$24 sps:$4 sm:$0xff]  }
 0x59d   : > { %v2392_v8 = vpop.permute.xlu0 %2391  ;;  %v2396_v52 = vpop.permute.xlu1 %2395  ;;  %v7153_v48 = vld [vmem:[%s10049_s5 + $0x42c] ss:$24 sps:$4 sm:$0xff]  }
 0x59e   : > { %v2346_v53 = vmax.f32 %v2341_v51, 0.0  ;;  %v2444_v27 = vsel %vm2443_vm4, %v2388_v40, %v2392_v8  ;;  %v7148_v51 = vld [vmem:[%s10049_s5 + $0x420] ss:$24 sps:$4 sm:$0xff]  }
 0x59f   : > { %v2446_v29 = vsel %vm2445_vm5, %v2444_v27, %v2396_v52  ;;  %v7151_v8 = vld [vmem:[%s10049_s5 + $0x428] ss:$24 sps:$4 sm:$0xff]   ;;  %v7156_v52 = vld [vmem:[%s10049_s5 + $0x454] ss:$24 sps:$4 sm:$0xff]  }
 0x5a0   : > { %2352 = vst.msk [vmem:[#allocation3 + $0x20] sm:$0xff] %vm2347_vm3, %v2346_v53  ;;  %v7159_v53 = vld [vmem:[%s10049_s5 + $0x45c] ss:$24 sps:$4 sm:$0xff]   ;;  %v7154_v27 = vld [vmem:[%s10049_s5 + $0x450] ss:$24 sps:$4 sm:$0xff]  }
 0x5a1   : > { %v2380_v11 = vpop.permute.xlu0 %2379  ;;  %v2400_v23 = vpop.permute.xlu1 %2399 }
 0x5a2   : > { %v2438_v41 = vsel %vm2347_vm3, %v2353_v33, %v2380_v11  ;;  %v2448_v54 = vsel %vm2447_vm6, %v2446_v29, %v2400_v23  ;;  %v7157_v11 = vld [vmem:[%s10049_s5 + $0x458] ss:$24 sps:$4 sm:$0xff]   ;;  %v7162_v23 = vld [vmem:[%s10049_s5 + $0x484] ss:$24 sps:$4 sm:$0xff]   ;;  %v7163_v33 = vld [vmem:[%s10049_s5 + $0x488] ss:$24 sps:$4 sm:$0xff]  }
 0x5a3   : > { %v2372_v24 = vld [vmem:[#allocation3 + $0x1c] sm:$0x1]  ;;  %v2370_v57 = vld [vmem:[#allocation3 + $0x1a] sm:$0x1]  ;;  %v2371_v63 = vld [vmem:[#allocation3 + $0x1b] sm:$0x1] }
 0x5a4   : > { %2474 = vrot.lane.b32.xlu1 %v2372_v24, %s7739_s22  ;;  %v2368_v10 = vld [vmem:[#allocation3 + $0x18] sm:$0x1]  ;;  %v7165_v24 = vld [vmem:[%s10049_s5 + $0x48c] ss:$24 sps:$4 sm:$0xff]  }
 0x5a5   : > { %v2384_v55 = vpop.permute.xlu0 %2383  ;;  %v8731_v56 = vpop.permute.xlu1 %2403  ;;  %v7160_v29 = vld [vmem:[%s10049_s5 + $0x480] ss:$24 sps:$4 sm:$0xff]  }
 0x5a6   : > { %v2440_v34 = vsel %vm2439_vm7, %v2438_v41, %v2384_v55  ;;  %v2450_v36 = vsel %vm2449_vm8, %v2448_v54, %v8731_v56  ;;  %v7168_v41 = vld [vmem:[%s10049_s5 + $0x4b4] ss:$24 sps:$4 sm:$0xff]   ;;  %v7166_v55 = vld [vmem:[%s10049_s5 + $0x4b0] ss:$24 sps:$4 sm:$0xff]  }
 0x5a7   : > { %v2442_v37 = vsel %vm2441_vm9, %v2440_v34, %v2388_v40  ;;  %v8740_v38 = vpack.c.bf16 %v2450_v36, %v2450_v36  ;;  %v2373_v39 = vld [vmem:[#allocation3 + $0x20] sm:$0x1]  ;;  %v2374_v5 = vld [vmem:[#allocation3 + $0x21] sm:$0x1]  ;;  %v2375_v42 = vld [vmem:[#allocation3 + $0x22] sm:$0x1] }
 0x5a8   : > { %v8745_v59 = vpack.c.bf16 %v2442_v37, %v2442_v37  ;;  %2478 = vrot.lane.b32.xlu0 %v2373_v39, %s7741_s13  ;;  %2466 = vrot.lane.b32.xlu1 %v2370_v57, %s7743_s16  ;;  %v2376_v13 = vld [vmem:[#allocation3 + $0x23] sm:$0x1]  ;;  %v2377_v21 = vld [vmem:[#allocation3 + $0x24] sm:$0x1]  ;;  %s7752_s16 = smov 28  }
 0x5a9   : > { %v8749_v60 = vpop.permute.xlu0 %2415  ;;  %4651 = vmatprep.mubr.bf16.mxu0 %v8740_v38  ;;  %4815 = vmatprep.mubr.bf16.mxu1 %v8740_v38  ;;  %v8753_v62 = vpop.permute.xlu1 %2407  ;;  %v7145_v40 = vld [vmem:[%s10049_s5 + $0x3f8] ss:$24 sps:$4 sm:$0xff]   ;;  %v7171_v54 = vld [vmem:[%s10049_s5 + $0x4bc] ss:$24 sps:$4 sm:$0xff]   ;;  %v7175_v39 = vld [vmem:[%s10049_s5 + $0x4e8] ss:$24 sps:$4 sm:$0xff]  }
 0x5aa   : > { %4652 = vmatmul.mubr.bf16.vlgmr.msra.gmra.mrb[16].mxu0 %v8745_v59  ;;  %4816 = vmatmul.mubr.bf16.vlgmr.msra.gmra.mrb[12].mxu1 %v8745_v59  ;;  %v7169_v34 = vld [vmem:[%s10049_s5 + $0x4b8] ss:$24 sps:$4 sm:$0xff]   ;;  %v7174_v36 = vld [vmem:[%s10049_s5 + $0x4e4] ss:$24 sps:$4 sm:$0xff]   ;;  %v7180_v57 = vld [vmem:[%s10049_s5 + $0x514] ss:$24 sps:$4 sm:$0xff]  }
 0x5ab   : > { %4661 = vmatpush1.bf16.msra.mxu0 %v7112_v16  ;;  %4825 = vmatpush1.bf16.msra.mxu1 %v7115_v58  ;;  %v7177_v16 = vld [vmem:[%s10049_s5 + $0x4ec] ss:$24 sps:$4 sm:$0xff]   ;;  %v7172_v37 = vld [vmem:[%s10049_s5 + $0x4e0] ss:$24 sps:$4 sm:$0xff]   ;;  %v7183_v58 = vld [vmem:[%s10049_s5 + $0x51c] ss:$24 sps:$4 sm:$0xff]  }
 0x5ac   : > { %2482 = vrot.lane.b32.xlu0 %v2374_v5, %s7740_s12  ;;  %2470 = vrot.lane.b32.xlu1 %v2371_v63, %s7745_s19  ;;  %s10066_s19 = smov 88   ;;  %v7189_v5 = vld [vmem:[%s10049_s5 + $0x54c] ss:$24 sps:$4 sm:$0xff]   ;;  %v7184_v63 = vld [vmem:[%s10049_s5 + $0x540] ss:$24 sps:$4 sm:$0xff]  }
 0x5ad   : > { %v2424_v49 = vpop.permute.xlu0 %2423  ;;  %4662 = vmatprep.subr.bf16.mxu0 %v7120_v0  ;;  %4826 = vmatprep.subr.bf16.mxu1 %v7123_v61  ;;  %v8771_v50 = vpop.permute.xlu1 %2411  ;;  %v7178_v0 = vld [vmem:[%s10049_s5 + $0x510] ss:$24 sps:$4 sm:$0xff]  }
 0x5ae   : > { %v7181_v61 = vld [vmem:[%s10049_s5 + $0x518] ss:$24 sps:$4 sm:$0xff]  }
 0x5af   : > { %4663 = vmatpush1.bf16.msra.mxu0 %v7118_v3  ;;  %4827 = vmatpush1.bf16.msra.mxu1 %v7121_v47  ;;  %v7186_v3 = vld [vmem:[%s10049_s5 + $0x544] ss:$24 sps:$4 sm:$0xff]   ;;  %v7187_v47 = vld [vmem:[%s10049_s5 + $0x548] ss:$24 sps:$4 sm:$0xff]  }
 0x5b0   : > { %2486 = vrot.lane.b32.xlu0 %v2375_v42, %s10066_s19  ;;  %2490 = vrot.lane.b32.xlu1 %v2376_v13, %s10067_s29  ;;  %v7201_v42 = vld [vmem:[%s10049_s5 + $0x5ac] ss:$24 sps:$4 sm:$0xff]   ;;  %v7196_v13 = vld [vmem:[%s10049_s5 + $0x5a0] ss:$24 sps:$4 sm:$0xff]   ;;  %s7753_s19 = smov 64   ;;  %s377_s29 = sand.u32 1, %s7724_s18  }
 0x5b1   : > { %v2428_v14 = vpop.permute.xlu0 %2427  ;;  %4664 = vmatprep.subr.bf16.mxu0 %v7126_v7  ;;  %4828 = vmatprep.subr.bf16.mxu1 %v7129_v25  ;;  %v2420_v15 = vpop.permute.xlu1 %2419  ;;  %v7195_v7 = vld [vmem:[%s10049_s5 + $0x57c] ss:$24 sps:$4 sm:$0xff]   ;;  %v7190_v25 = vld [vmem:[%s10049_s5 + $0x570] ss:$24 sps:$4 sm:$0xff]   ;;  %s378_s30 = scalar_lea.vmem [#allocation4], %s377_s29 }
 0x5b2   : > { %v2457_v19 = vsel %vm2456_vm10, %v8749_v60, %v2420_v15  ;;  %v7204_v15 = vld [vmem:[%s10049_s5 + $0x5d4] ss:$24 sps:$4 sm:$0xff]   ;;  %s5937_s25 = sshll.u32 %s378_s30, 4  ;;  %s10004_s25 = int_to_ptr.vmem [resolvable:$true] %s5937_s25 }
 0x5b3   : > { %v2458_v46 = vsel %vm452_vm0, %v2457_v19, %v2424_v49  ;;  %4665 = vmatpush1.bf16.msra.mxu0 %v7124_v44  ;;  %4829 = vmatpush1.bf16.msra.mxu1 %v7127_v12  ;;  %v7192_v49 = vld [vmem:[%s10049_s5 + $0x574] ss:$24 sps:$4 sm:$0xff]   ;;  %v7193_v44 = vld [vmem:[%s10049_s5 + $0x578] ss:$24 sps:$4 sm:$0xff]   ;;  %v7198_v12 = vld [vmem:[%s10049_s5 + $0x5a4] ss:$24 sps:$4 sm:$0xff]  }
 0x5b4   : > { %2494 = vrot.lane.b32.xlu0 %v2377_v21, %s10065_s26  ;;  %2435 = vrot.lane.b32.xlu1 %v2368_v10, %s7752_s16  ;;  %v2460_v22 = vsel %vm2459_vm11, %v2458_v46, %v2428_v14  ;;  %v7199_v14 = vld [vmem:[%s10049_s5 + $0x5a8] ss:$24 sps:$4 sm:$0xff]   ;;  %v7205_v46 = vld [vmem:[%s10049_s5 + $0x5d8] ss:$24 sps:$4 sm:$0xff]   ;;  %vm2514_vm0 = vcmask 523264   ;;  %s6635_s26 = sshll.u32 %s7836_s21, 4 }
 0x5b5   : > { %v8808_v26 = vpop.permute.xlu0 %2431  ;;  %4666 = vmatprep.subr.bf16.mxu0 %v7132_v1  ;;  %4830 = vmatprep.subr.bf16.mxu1 %v7135_v18  ;;  %v7207_v1 = vld [vmem:[%s10049_s5 + $0x5dc] ss:$24 sps:$4 sm:$0xff]   ;;  %v2451_v18 = vsel %vm1089_vm1, %v8731_v56, %v8753_v62  ;;  %v7213_v56 = vld [vmem:[%s10049_s5 + $0x60c] ss:$24 sps:$4 sm:$0xff]   ;;  %v7211_v10 = vld [vmem:[%s10049_s5 + $0x608] ss:$24 sps:$4 sm:$0xff]   ;;  %s10002_s13 = scalar_lea.hbm %s10055_s11, %s6635_s26 }
 0x5b6   : > { %v2462_v28 = vsel %vm2461_vm12, %v2460_v22, %v8808_v26  ;;  %v2453_v19 = vsel %vm2452_vm13, %v2451_v18, %v8771_v50  ;;  %v7210_v21 = vld [vmem:[%s10049_s5 + $0x604] ss:$24 sps:$4 sm:$0xff]   ;;  %v7208_v50 = vld [vmem:[%s10049_s5 + $0x600] ss:$24 sps:$4 sm:$0xff]   ;;  %v7216_v22 = vld [vmem:[%s10049_s5 + $0x634] ss:$24 sps:$4 sm:$0xff]  }
 0x5b7   : > { %v8812_v30 = vpack.c.bf16 %v2462_v28, %v2462_v28  ;;  %4667 = vmatpush1.bf16.msra.mxu0 %v7130_v20  ;;  %4831 = vmatpush1.bf16.msra.mxu1 %v7133_v45  ;;  %v7202_v20 = vld [vmem:[%s10049_s5 + $0x5d0] ss:$24 sps:$4 sm:$0xff]   ;;  %v2455_v62 = vsel %vm2454_vm14, %v2453_v19, %v8749_v60  ;;  %v7219_v60 = vld [vmem:[%s10049_s5 + $0x63c] ss:$24 sps:$4 sm:$0xff]   ;;  %s5925_s21 = scalar_lea.sflag [#allocation5], %s377_s29  ;;  %s7670_s12 = scalar_lea.vmem %s10004_s25, 16 }
 0x5b8   : > { %4668 = vmatprep.subr.bf16.mxu0 %v7138_v4  ;;  %4832 = vmatprep.subr.bf16.mxu1 %v7141_v17  ;;  %v8971_v45 = vpack.c.bf16 %v2455_v62, %v2455_v62  ;;  %v7214_v4 = vld [vmem:[%s10049_s5 + $0x630] ss:$24 sps:$4 sm:$0xff]   ;;  %v7222_v28 = vld [vmem:[%s10049_s5 + $0x664] ss:$24 sps:$4 sm:$0xff]   ;;  %v7288_v18 = vld [vmem:[%s10049_s5 + $0x874] ss:$24 sps:$4 sm:$0xff]   ;;  %p7671_p11 = scmp.ne.s32.totalorder %s10004_s25, %s7670_s12 }
 0x5b9   : > { %4692 = vmatprep.mubr.bf16.mxu0 %v8812_v30  ;;  %4856 = vmatprep.mubr.bf16.mxu1 %v8812_v30  ;;  %v7217_v17 = vld [vmem:[%s10049_s5 + $0x638] ss:$24 sps:$4 sm:$0xff]   ;;  %v7291_v19 = vld [vmem:[%s10049_s5 + $0x87c] ss:$24 sps:$4 sm:$0xff]   ;;  %s7754_s16 = smov [#allocation4]  }
 0x5ba   : > { %v7294_v62 = vld [vmem:[%s10049_s5 + $0x8a4] ss:$24 sps:$4 sm:$0xff]   ;;  %p7672_p12 = pnand %p7671_p11, %p7853_p5 }
 0x5bb   : > { %4669 = vmatpush1.bf16.msra.mxu0 %v7136_v31  ;;  %4833 = vmatpush1.bf16.msra.mxu1 %v7139_v32  ;;  %v7225_v31 = vld [vmem:[%s10049_s5 + $0x66c] ss:$24 sps:$4 sm:$0xff]   ;;  %v7220_v32 = vld [vmem:[%s10049_s5 + $0x660] ss:$24 sps:$4 sm:$0xff]  }
 0x5bc   : > { %4670 = vmatprep.subr.bf16.mxu0 %v7144_v6  ;;  %4834 = vmatprep.subr.bf16.mxu1 %v7147_v35  ;;  %v7223_v6 = vld [vmem:[%s10049_s5 + $0x668] ss:$24 sps:$4 sm:$0xff]   ;;  %v7228_v35 = vld [vmem:[%s10049_s5 + $0x694] ss:$24 sps:$4 sm:$0xff]   ;;  %p7673_p13 = pneg %p7672_p12 }
 0x5bf   : > { %4671 = vmatpush1.bf16.msra.mxu0 %v7142_v9  ;;  %4835 = vmatpush1.bf16.msra.mxu1 %v7145_v40  ;;  %v7231_v9 = vld [vmem:[%s10049_s5 + $0x69c] ss:$24 sps:$4 sm:$0xff]   ;;  %v7226_v40 = vld [vmem:[%s10049_s5 + $0x690] ss:$24 sps:$4 sm:$0xff]  }
 0x5c0   : > { %4672 = vmatprep.subr.bf16.mxu0 %v7150_v43  ;;  %4836 = vmatprep.subr.bf16.mxu1 %v7153_v48  ;;  %v7229_v43 = vld [vmem:[%s10049_s5 + $0x698] ss:$24 sps:$4 sm:$0xff]   ;;  %v7234_v48 = vld [vmem:[%s10049_s5 + $0x6c4] ss:$24 sps:$4 sm:$0xff]  }
 0x5c3   : > { %4673 = vmatpush1.bf16.msra.mxu0 %v7148_v51  ;;  %4837 = vmatpush1.bf16.msra.mxu1 %v7151_v8  ;;  %v7237_v51 = vld [vmem:[%s10049_s5 + $0x6cc] ss:$24 sps:$4 sm:$0xff]   ;;  %v7232_v8 = vld [vmem:[%s10049_s5 + $0x6c0] ss:$24 sps:$4 sm:$0xff]  }
 0x5c4   : > { %4674 = vmatprep.subr.bf16.mxu0 %v7156_v52  ;;  %4838 = vmatprep.subr.bf16.mxu1 %v7159_v53  ;;  %v7235_v52 = vld [vmem:[%s10049_s5 + $0x6c8] ss:$24 sps:$4 sm:$0xff]   ;;  %v7240_v53 = vld [vmem:[%s10049_s5 + $0x6f4] ss:$24 sps:$4 sm:$0xff]  }
 0x5c7   : > { %4675 = vmatpush1.bf16.msra.mxu0 %v7154_v27  ;;  %4839 = vmatpush1.bf16.msra.mxu1 %v7157_v11  ;;  %v7243_v27 = vld [vmem:[%s10049_s5 + $0x6fc] ss:$24 sps:$4 sm:$0xff]   ;;  %v7238_v11 = vld [vmem:[%s10049_s5 + $0x6f0] ss:$24 sps:$4 sm:$0xff]  }
 0x5c8   : > { %4676 = vmatprep.subr.bf16.mxu0 %v7162_v23  ;;  %4840 = vmatprep.subr.bf16.mxu1 %v7165_v24  ;;  %v7241_v23 = vld [vmem:[%s10049_s5 + $0x6f8] ss:$24 sps:$4 sm:$0xff]   ;;  %v7246_v24 = vld [vmem:[%s10049_s5 + $0x724] ss:$24 sps:$4 sm:$0xff]  }
 0x5cb   : > { %4677 = vmatpush1.bf16.msra.mxu0 %v7160_v29  ;;  %4841 = vmatpush1.bf16.msra.mxu1 %v7163_v33  ;;  %v7249_v29 = vld [vmem:[%s10049_s5 + $0x72c] ss:$24 sps:$4 sm:$0xff]   ;;  %v7244_v33 = vld [vmem:[%s10049_s5 + $0x720] ss:$24 sps:$4 sm:$0xff]  }
 0x5cc   : > { %4678 = vmatprep.subr.bf16.mxu0 %v7168_v41  ;;  %4842 = vmatprep.subr.bf16.mxu1 %v7171_v54  ;;  %v7247_v41 = vld [vmem:[%s10049_s5 + $0x728] ss:$24 sps:$4 sm:$0xff]   ;;  %v7252_v54 = vld [vmem:[%s10049_s5 + $0x754] ss:$24 sps:$4 sm:$0xff]  }
 0x5cf   : > { %4679 = vmatpush1.bf16.msra.mxu0 %v7166_v55  ;;  %4843 = vmatpush1.bf16.msra.mxu1 %v7169_v34  ;;  %v7255_v55 = vld [vmem:[%s10049_s5 + $0x75c] ss:$24 sps:$4 sm:$0xff]   ;;  %v7250_v34 = vld [vmem:[%s10049_s5 + $0x750] ss:$24 sps:$4 sm:$0xff]  }
 0x5d0   : > { %4680 = vmatprep.subr.bf16.mxu0 %v7174_v36  ;;  %4844 = vmatprep.subr.bf16.mxu1 %v7177_v16  ;;  %v7253_v36 = vld [vmem:[%s10049_s5 + $0x758] ss:$24 sps:$4 sm:$0xff]   ;;  %v7258_v16 = vld [vmem:[%s10049_s5 + $0x784] ss:$24 sps:$4 sm:$0xff]  }
 0x5d3   : > { %4681 = vmatpush1.bf16.msra.mxu0 %v7172_v37  ;;  %4845 = vmatpush1.bf16.msra.mxu1 %v7175_v39  ;;  %v7261_v37 = vld [vmem:[%s10049_s5 + $0x78c] ss:$24 sps:$4 sm:$0xff]   ;;  %v7256_v39 = vld [vmem:[%s10049_s5 + $0x780] ss:$24 sps:$4 sm:$0xff]  }
 0x5d4   : > { %4682 = vmatprep.subr.bf16.mxu0 %v7180_v57  ;;  %4846 = vmatprep.subr.bf16.mxu1 %v7183_v58  ;;  %v7259_v57 = vld [vmem:[%s10049_s5 + $0x788] ss:$24 sps:$4 sm:$0xff]   ;;  %v7264_v58 = vld [vmem:[%s10049_s5 + $0x7b4] ss:$24 sps:$4 sm:$0xff]  }
 0x5d7   : > { %4683 = vmatpush1.bf16.msra.mxu0 %v7178_v0  ;;  %4847 = vmatpush1.bf16.msra.mxu1 %v7181_v61  ;;  %v7267_v0 = vld [vmem:[%s10049_s5 + $0x7bc] ss:$24 sps:$4 sm:$0xff]   ;;  %v7262_v61 = vld [vmem:[%s10049_s5 + $0x7b0] ss:$24 sps:$4 sm:$0xff]  }
 0x5d8   : > { %4684 = vmatprep.subr.bf16.mxu0 %v7186_v3  ;;  %4848 = vmatprep.subr.bf16.mxu1 %v7189_v5  ;;  %v7265_v3 = vld [vmem:[%s10049_s5 + $0x7b8] ss:$24 sps:$4 sm:$0xff]   ;;  %v7270_v5 = vld [vmem:[%s10049_s5 + $0x7e4] ss:$24 sps:$4 sm:$0xff]  }
 0x5db   : > { %4685 = vmatpush1.bf16.msra.mxu0 %v7184_v63  ;;  %4849 = vmatpush1.bf16.msra.mxu1 %v7187_v47  ;;  %v7273_v63 = vld [vmem:[%s10049_s5 + $0x7ec] ss:$24 sps:$4 sm:$0xff]   ;;  %v7268_v47 = vld [vmem:[%s10049_s5 + $0x7e0] ss:$24 sps:$4 sm:$0xff]  }
 0x5dc   : > { %4686 = vmatprep.subr.bf16.mxu0 %v7192_v49  ;;  %4850 = vmatprep.subr.bf16.mxu1 %v7195_v7  ;;  %v7271_v49 = vld [vmem:[%s10049_s5 + $0x7e8] ss:$24 sps:$4 sm:$0xff]   ;;  %v7276_v7 = vld [vmem:[%s10049_s5 + $0x814] ss:$24 sps:$4 sm:$0xff]  }
 0x5df   : > { %4687 = vmatpush1.bf16.msra.mxu0 %v7190_v25  ;;  %4851 = vmatpush1.bf16.msra.mxu1 %v7193_v44  ;;  %v7279_v25 = vld [vmem:[%s10049_s5 + $0x81c] ss:$24 sps:$4 sm:$0xff]   ;;  %v7274_v44 = vld [vmem:[%s10049_s5 + $0x810] ss:$24 sps:$4 sm:$0xff]  }
 0x5e0   : > { %4688 = vmatprep.subr.bf16.mxu0 %v7198_v12  ;;  %4852 = vmatprep.subr.bf16.mxu1 %v7201_v42  ;;  %v7277_v12 = vld [vmem:[%s10049_s5 + $0x818] ss:$24 sps:$4 sm:$0xff]   ;;  %v7282_v42 = vld [vmem:[%s10049_s5 + $0x844] ss:$24 sps:$4 sm:$0xff]  }
 0x5e3   : > { %4689 = vmatpush1.bf16.msra.mxu0 %v7196_v13  ;;  %4853 = vmatpush1.bf16.msra.mxu1 %v7199_v14  ;;  %v7285_v13 = vld [vmem:[%s10049_s5 + $0x84c] ss:$24 sps:$4 sm:$0xff]  }
 0x5e4   : > { %4690 = vmatprep.subr.bf16.mxu0 %v7204_v15  ;;  %4854 = vmatprep.subr.bf16.mxu1 %v7207_v1  ;;  %v7280_v15 = vld [vmem:[%s10049_s5 + $0x840] ss:$24 sps:$4 sm:$0xff]  }
 0x5e5   : > { %v7283_v1 = vld [vmem:[%s10049_s5 + $0x848] ss:$24 sps:$4 sm:$0xff]  }
 0x5e7   : > { %4691 = vmatpush1.bf16.msra.mxu0 %v7202_v20  ;;  %4855 = vmatpush1.bf16.msra.mxu1 %v7205_v46 }
 0x5e8   : > { %4701 = vmatprep.subr.bf16.mxu0 %v7210_v21  ;;  %4865 = vmatprep.subr.bf16.mxu1 %v7213_v56  ;;  %v7286_v21 = vld [vmem:[%s10049_s5 + $0x870] ss:$24 sps:$4 sm:$0xff]  }
 0x5e9   : > { %v7289_v56 = vld [vmem:[%s10049_s5 + $0x878] ss:$24 sps:$4 sm:$0xff]  }
 0x5ea   : > { %4693 = vmatmul.mubr.bf16.vlgmr.msra.gmra.mrb[16].mxu0 %v8971_v45  ;;  %4857 = vmatmul.mubr.bf16.vlgmr.msra.gmra.mrb[12].mxu1 %v8971_v45 }
 0x5eb   : > { %4702 = vmatpush1.bf16.msra.mxu0 %v7208_v50  ;;  %4866 = vmatpush1.bf16.msra.mxu1 %v7211_v10  ;;  %v7297_v50 = vld [vmem:[%s10049_s5 + $0x8ac] ss:$24 sps:$4 sm:$0xff]  }
 0x5ec   : > { %4703 = vmatprep.subr.bf16.mxu0 %v7216_v22  ;;  %4867 = vmatprep.subr.bf16.mxu1 %v7219_v60  ;;  %v2369_v60 = vld [vmem:[#allocation3 + $0x19] sm:$0x1] }
 0x5ef   : > { %4704 = vmatpush1.bf16.msra.mxu0 %v7214_v4  ;;  %4868 = vmatpush1.bf16.msra.mxu1 %v7217_v17  ;;  %v7292_v4 = vld [vmem:[%s10049_s5 + $0x8a0] ss:$24 sps:$4 sm:$0xff]  }
 0x5f0   : > { %4705 = vmatprep.subr.bf16.mxu0 %v7222_v28  ;;  %4869 = vmatprep.subr.bf16.mxu1 %v7225_v31  ;;  %v7295_v17 = vld [vmem:[%s10049_s5 + $0x8a8] ss:$24 sps:$4 sm:$0xff]   ;;  %v7300_v31 = vld [vmem:[%s10049_s5 + $0x8d4] ss:$24 sps:$4 sm:$0xff]  }
 0x5f3   : > { %4706 = vmatpush1.bf16.msra.mxu0 %v7220_v32  ;;  %4870 = vmatpush1.bf16.msra.mxu1 %v7223_v6  ;;  %v7303_v32 = vld [vmem:[%s10049_s5 + $0x8dc] ss:$24 sps:$4 sm:$0xff]  }
 0x5f4   : > { %4707 = vmatprep.subr.bf16.mxu0 %v7228_v35  ;;  %4871 = vmatprep.subr.bf16.mxu1 %v7231_v9 }
 0x5f7   : > { %4708 = vmatpush1.bf16.msra.mxu0 %v7226_v40  ;;  %4872 = vmatpush1.bf16.msra.mxu1 %v7229_v43 }
 0x5f8   : > { %4709 = vmatprep.subr.bf16.mxu0 %v7234_v48  ;;  %4873 = vmatprep.subr.bf16.mxu1 %v7237_v51  ;;  %v7298_v51 = vld [vmem:[%s10049_s5 + $0x8d0] ss:$24 sps:$4 sm:$0xff]  }
 0x5fb   : > { %4710 = vmatpush1.bf16.msra.mxu0 %v7232_v8  ;;  %4874 = vmatpush1.bf16.msra.mxu1 %v7235_v52 }
 0x5fc   : > { %4711 = vmatprep.subr.bf16.mxu0 %v7240_v53  ;;  %4875 = vmatprep.subr.bf16.mxu1 %v7243_v27  ;;  %v7301_v53 = vld [vmem:[%s10049_s5 + $0x8d8] ss:$24 sps:$4 sm:$0xff]  }
 0x5ff   : > { %4712 = vmatpush1.bf16.msra.mxu0 %v7238_v11  ;;  %4876 = vmatpush1.bf16.msra.mxu1 %v7241_v23  ;;  %v7306_v11 = vld [vmem:[%s10049_s5 + $0x904] ss:$24 sps:$4 sm:$0xff]  }
 0x600   : > { %4713 = vmatprep.subr.bf16.mxu0 %v7246_v24  ;;  %4877 = vmatprep.subr.bf16.mxu1 %v7249_v29  ;;  %v7309_v23 = vld [vmem:[%s10049_s5 + $0x90c] ss:$24 sps:$4 sm:$0xff]  }
 0x603   : > { %4714 = vmatpush1.bf16.msra.mxu0 %v7244_v33  ;;  %4878 = vmatpush1.bf16.msra.mxu1 %v7247_v41 }
 0x604   : > { %4715 = vmatprep.subr.bf16.mxu0 %v7252_v54  ;;  %4879 = vmatprep.subr.bf16.mxu1 %v7255_v55 }
 0x607   : > { %4716 = vmatpush1.bf16.msra.mxu0 %v7250_v34  ;;  %4880 = vmatpush1.bf16.msra.mxu1 %v7253_v36 }
 0x608   : > { %4717 = vmatprep.subr.bf16.mxu0 %v7258_v16  ;;  %4881 = vmatprep.subr.bf16.mxu1 %v7261_v37 }
 0x60b   : > { %4718 = vmatpush1.bf16.msra.mxu0 %v7256_v39  ;;  %4882 = vmatpush1.bf16.msra.mxu1 %v7259_v57 }
 0x60c   : > { %4719 = vmatprep.subr.bf16.mxu0 %v7264_v58  ;;  %4883 = vmatprep.subr.bf16.mxu1 %v7267_v0  ;;  %v7304_v58 = vld [vmem:[%s10049_s5 + $0x900] ss:$24 sps:$4 sm:$0xff]   ;;  %v7312_v0 = vld [vmem:[%s10049_s5 + $0x934] ss:$24 sps:$4 sm:$0xff]  }
 0x60f   : > { %4720 = vmatpush1.bf16.msra.mxu0 %v7262_v61  ;;  %4884 = vmatpush1.bf16.msra.mxu1 %v7265_v3  ;;  %v7315_v61 = vld [vmem:[%s10049_s5 + $0x93c] ss:$24 sps:$4 sm:$0xff]  }
 0x610   : > { %4721 = vmatprep.subr.bf16.mxu0 %v7270_v5  ;;  %4885 = vmatprep.subr.bf16.mxu1 %v7273_v63  ;;  %v7310_v5 = vld [vmem:[%s10049_s5 + $0x930] ss:$24 sps:$4 sm:$0xff]  }
 0x611   : > { %v7313_v63 = vld [vmem:[%s10049_s5 + $0x938] ss:$24 sps:$4 sm:$0xff]  }
 0x613   : > { %4722 = vmatpush1.bf16.msra.mxu0 %v7268_v47  ;;  %4886 = vmatpush1.bf16.msra.mxu1 %v7271_v49  ;;  %v7318_v47 = vld [vmem:[%s10049_s5 + $0x964] ss:$24 sps:$4 sm:$0xff]  }
 0x614   : > { %4723 = vmatprep.subr.bf16.mxu0 %v7276_v7  ;;  %4887 = vmatprep.subr.bf16.mxu1 %v7279_v25  ;;  %v7321_v49 = vld [vmem:[%s10049_s5 + $0x96c] ss:$24 sps:$4 sm:$0xff]   ;;  %v7316_v7 = vld [vmem:[%s10049_s5 + $0x960] ss:$24 sps:$4 sm:$0xff]  }
 0x615   : > { %v7319_v25 = vld [vmem:[%s10049_s5 + $0x968] ss:$24 sps:$4 sm:$0xff]  }
 0x616   : > { %v2475_v14 = vpop.permute.xlu1 %2474 }
 0x617   : > { %4724 = vmatpush1.bf16.msra.mxu0 %v7274_v44  ;;  %4888 = vmatpush1.bf16.msra.mxu1 %v7277_v12  ;;  %v7324_v44 = vld [vmem:[%s10049_s5 + $0x994] ss:$24 sps:$4 sm:$0xff]  }
 0x618   : > { %4725 = vmatprep.subr.bf16.mxu0 %v7282_v42  ;;  %4889 = vmatprep.subr.bf16.mxu1 %v7285_v13  ;;  %v7327_v12 = vld [vmem:[%s10049_s5 + $0x99c] ss:$24 sps:$4 sm:$0xff]   ;;  %v7322_v42 = vld [vmem:[%s10049_s5 + $0x990] ss:$24 sps:$4 sm:$0xff]  }
 0x619   : > { %v7325_v13 = vld [vmem:[%s10049_s5 + $0x998] ss:$24 sps:$4 sm:$0xff]  }
 0x61a   : > { %v2479_v20 = vpop.permute.xlu0 %2478  ;;  %v2467_v46 = vpop.permute.xlu1 %2466 }
 0x61b   : > { %4726 = vmatpush1.bf16.msra.mxu0 %v7280_v15  ;;  %4890 = vmatpush1.bf16.msra.mxu1 %v7283_v1  ;;  %v2497_v28 = vsel %vm2347_vm3, %v2369_v60, %v2467_v46  ;;  %v2500_v6 = vsel %vm2443_vm4, %v2475_v14, %v2479_v20  ;;  %v7333_v15 = vld [vmem:[%s10049_s5 + $0x9cc] ss:$24 sps:$4 sm:$0xff]   ;;  %v7328_v1 = vld [vmem:[%s10049_s5 + $0x9c0] ss:$24 sps:$4 sm:$0xff]   ;;  %v7339_v20 = vld [vmem:[%s10049_s5 + $0x9fc] ss:$24 sps:$4 sm:$0xff]  }
 0x61c   : > { %4727 = vmatprep.subr.bf16.mxu0 %v7288_v18  ;;  %4891 = vmatprep.subr.bf16.mxu1 %v7291_v19  ;;  %v7331_v18 = vld [vmem:[%s10049_s5 + $0x9c8] ss:$24 sps:$4 sm:$0xff]   ;;  %v7336_v19 = vld [vmem:[%s10049_s5 + $0x9f4] ss:$24 sps:$4 sm:$0xff]   ;;  %vm5675_vm3 = vcmask 654336  }
 0x61d   : > { %v7334_v46 = vld [vmem:[%s10049_s5 + $0x9f0] ss:$24 sps:$4 sm:$0xff]   ;;  %v7351_v60 = vld [vmem:[%s10049_s5 + $0xa5c] ss:$24 sps:$4 sm:$0xff]  }
 0x61e   : > { %v2483_v10 = vpop.permute.xlu0 %2482  ;;  %v2471_v22 = vpop.permute.xlu1 %2470 }
 0x61f   : > { %4728 = vmatpush1.bf16.msra.mxu0 %v7286_v21  ;;  %4892 = vmatpush1.bf16.msra.mxu1 %v7289_v56  ;;  %v2498_v35 = vsel %vm2439_vm7, %v2497_v28, %v2471_v22  ;;  %v2501_v9 = vsel %vm2445_vm5, %v2500_v6, %v2483_v10  ;;  %v7337_v21 = vld [vmem:[%s10049_s5 + $0x9f8] ss:$24 sps:$4 sm:$0xff]   ;;  %v7342_v56 = vld [vmem:[%s10049_s5 + $0xa24] ss:$24 sps:$4 sm:$0xff]   ;;  %v7343_v10 = vld [vmem:[%s10049_s5 + $0xa28] ss:$24 sps:$4 sm:$0xff]  }
 0x620   : > { %4729 = vmatprep.subr.bf16.mxu0 %v7294_v62  ;;  %4893 = vmatprep.subr.bf16.mxu1 %v7297_v50  ;;  %v2499_v8 = vsel %vm2441_vm9, %v2498_v35, %v2475_v14  ;;  %v7330_v14 = vld [vmem:[%s10049_s5 + $0x9c4] ss:$24 sps:$4 sm:$0xff]   ;;  %v7340_v50 = vld [vmem:[%s10049_s5 + $0xa20] ss:$24 sps:$4 sm:$0xff]   ;;  %v7348_v22 = vld [vmem:[%s10049_s5 + $0xa54] ss:$24 sps:$4 sm:$0xff]  }
 0x621   : > { %v7345_v62 = vld [vmem:[%s10049_s5 + $0xa2c] ss:$24 sps:$4 sm:$0xff]   ;;  %v7346_v28 = vld [vmem:[%s10049_s5 + $0xa50] ss:$24 sps:$4 sm:$0xff]   ;;  %vm5922_vm5 = vcmask 819200  }
 0x622   : > { %v2487_v40 = vpop.permute.xlu0 %2486  ;;  %v2491_v43 = vpop.permute.xlu1 %2490 }
 0x623   : > { %v2502_v48 = vsel %vm2447_vm6, %v2501_v9, %v2487_v40  ;;  %4730 = vmatpush1.bf16.msra.mxu0 %v7292_v4  ;;  %4894 = vmatpush1.bf16.msra.mxu1 %v7295_v17  ;;  %v2866_v4 = vld [vmem:[%s10049_s5 + $0xa80] sm:$0x33]  ;;  %v2867_v17 = vld [vmem:[%s10049_s5 + $0xa88] sm:$0x33] }
 0x624   : > { %v2503_v52 = vsel %vm2449_vm8, %v2502_v48, %v2491_v43  ;;  %4731 = vmatprep.subr.bf16.mxu0 %v7300_v31  ;;  %4895 = vmatprep.subr.bf16.mxu1 %v7303_v32  ;;  %v7349_v31 = vld [vmem:[%s10049_s5 + $0xa58] ss:$24 sps:$4 sm:$0xff]   ;;  %v6523_v32 = vcombine.high %v2866_v4, %v2866_v4  ;;  %v6525_v6 = vcombine.high %v2867_v17, %v2867_v17  ;;  %v7358_v48 = vld [vmem:[%s10049_s5 + $0x14] ss:$24 sps:$4 sm:$0xff]  }
 0x625   : > { %v6894_v27 = vpack.i.bf16 %v2503_v52, %v2499_v8  ;;  %v6522_v35 = vcombine.low %v2866_v4, %v2866_v4  ;;  %v6524_v9 = vcombine.low %v2867_v17, %v2867_v17  ;;  %v7356_v8 = vld [vmem:[%s10049_s5 + $0x10] ss:$24 sps:$4 sm:$0xff]   ;;  %v7517_v4 = vld [vmem:[%s10051_s7 + $0x74] ss:$8 sps:$4 sm:$0xff]  }
 0x626   : > { %v2495_v24 = vpop.permute.xlu0 %2494  ;;  %v2436_v33 = vpop.permute.xlu1 %2435  ;;  %v7403_v17 = vld [vmem:[%s10049_s5 + $0x2e4] ss:$24 sps:$4 sm:$0xff]  }
 0x627   : > { %6895 = vrot.lane.b32.xlu0 %v6894_v27, %s7753_s19  ;;  %v2504_v29 = vsel %vm1089_vm1, %v2491_v43, %v2495_v24  ;;  %4732 = vmatpush1.bf16.msra.mxu0 %v7298_v51  ;;  %v2464_v34 = vsel %vm2463_vm15, %v8808_v26, %v2436_v33  ;;  %v7307_v26 = vld [vmem:[%s10049_s5 + $0x908] ss:$24 sps:$4 sm:$0xff]   ;;  %vm4596_vm1 = vcmask 31744   ;;  %v4602_v40 = vsel %vm4600_vm2, %v6522_v35, 0  ;;  %v7367_v24 = vld [vmem:[%s10049_s5 + $0xa4] ss:$24 sps:$4 sm:$0xff]  }
 0x628   : > { %2512 = vrot.lane.b32.xlu1 %v2504_v29, %s7753_s19  ;;  %4896 = vmatpush1.bf16.msra.mxu1 %v7301_v53  ;;  %v4608_v43 = vsel %vm4600_vm2, %v6524_v9, 0  ;;  %v7361_v53 = vld [vmem:[%s10049_s5 + $0x44] ss:$24 sps:$4 sm:$0xff]   ;;  %v7359_v27 = vld [vmem:[%s10049_s5 + $0x40] ss:$24 sps:$4 sm:$0xff]   ;;  %s7674_s19 = sshll.u32 %s7754_s16, 4  ;;  %s7675_s19 = int_to_ptr.vmem [resolvable:$false] %s7674_s19 }
 0x629   : > { %4742 = vmatprep.subr.bf16.mxu0 %v7306_v11  ;;  %4906 = vmatprep.subr.bf16.mxu1 %v7309_v23  ;;  %v7364_v11 = vld [vmem:[%s10049_s5 + $0x74] ss:$24 sps:$4 sm:$0xff]   ;;  %v7362_v23 = vld [vmem:[%s10049_s5 + $0x70] ss:$24 sps:$4 sm:$0xff]   ;;  %s7676_s22 = scalar_lea.vmem %s7675_s19, 32  ;;  %p7677_p0 = scmp.lt.s32.totalorder %s10004_s25, %s7675_s19 }
 0x62a   : > { %v7370_v29 = vld [vmem:[%s10049_s5 + $0xd4] ss:$24 sps:$4 sm:$0xff]   ;;  %v7368_v33 = vld [vmem:[%s10049_s5 + $0xd0] ss:$24 sps:$4 sm:$0xff]   ;;  %p7678_p1 = scmp.lt.s32.totalorder %s7676_s22, %s7670_s12 }
 0x62b   : > { %v7404_v35 = vld [vmem:[%s10049_s5 + $0x310] ss:$24 sps:$4 sm:$0xff]  }
 0x62c   : > { %v7527_v9 = vld [vmem:[%s10051_s7 + $0x90] ss:$8 sps:$4 sm:$0xff]   ;;  %p7679_p2 = por %p7678_p1, %p7677_p0 }
 0x62e   : > { %p7680_p3 = pnand %p7679_p2, %p7673_p13 }
 0x699   : > { %v9169_v41 = vpop.permute.xlu0 %6895 }
 0x69a   : > { %v6898_v54 = vunpack.i.h.bf16 %v9169_v41  ;;  %v6897_v55 = vunpack.i.l.bf16 %v9169_v41  ;;  %v9180_v39 = vpop.permute.xlu1 %2512  ;;  %v7373_v41 = vld [vmem:[%s10049_s5 + $0x104] ss:$24 sps:$4 sm:$0xff]  }
 0x69b   : > { %v9200_v3 = vpack.c.bf16 %v9180_v39, %v9180_v39 }
 0x69c   : > { %v2521_v36 = vsel %vm2514_vm0, %v2464_v34, %v6897_v55  ;;  %v2515_v16 = vsel %vm2514_vm0, %v6897_v55, %v6898_v54  ;;  %v2516_v51 = vsel %vm2514_vm0, %v6898_v54, %v9180_v39  ;;  %v7371_v54 = vld [vmem:[%s10049_s5 + $0x100] ss:$24 sps:$4 sm:$0xff]   ;;  %v7376_v55 = vld [vmem:[%s10049_s5 + $0x134] ss:$24 sps:$4 sm:$0xff]   ;;  %v7374_v34 = vld [vmem:[%s10049_s5 + $0x130] ss:$24 sps:$4 sm:$0xff]  }
 0x69d   : > { %v9178_v37 = vpack.c.bf16 %v2521_v36, %v2521_v36  ;;  %v9182_v57 = vpack.c.bf16 %v2515_v16, %v2515_v16  ;;  %v9306_v52 = vpack.c.bf16 %v2516_v51, %v2516_v51  ;;  %v7379_v36 = vld [vmem:[%s10049_s5 + $0x164] ss:$24 sps:$4 sm:$0xff]   ;;  %v7377_v16 = vld [vmem:[%s10049_s5 + $0x160] ss:$24 sps:$4 sm:$0xff]  }
 0x69e   : > { %v7473_v39 = vld [vmem:[%s10051_s7] ss:$8 sps:$4 sm:$0xff]  }
 0x69f   : > { %4733 = vmatprep.mubr.bf16.mxu0 %v9182_v57  ;;  %4897 = vmatprep.mubr.bf16.mxu1 %v9182_v57  ;;  %v7533_v51 = vld [vmem:[%s10051_s7 + $0xa0] ss:$8 sps:$4 sm:$0xff]  }
 0x6a0   : > { %4734 = vmatmul.mubr.bf16.vlgmr.msra.gmra.mrb[16].mxu0 %v9178_v37  ;;  %4898 = vmatmul.mubr.bf16.vlgmr.msra.gmra.mrb[12].mxu1 %v9178_v37 }
 0x6a1   : > { %4743 = vmatpush1.bf16.msra.mxu0 %v7304_v58  ;;  %4907 = vmatpush1.bf16.msra.mxu1 %v7307_v26  ;;  %v7475_v58 = vld [vmem:[%s10051_s7 + $0x4] ss:$8 sps:$4 sm:$0xff]  }
 0x6a2   : > { %6529 = vmatprep.mubr.msk.bf16.mxu0 %vm4596_vm1, %v9200_v3  ;;  %6531 = vmatprep.mubr.msk.bf16.mxu1 %vm4596_vm1, %v9200_v3  ;;  %v7382_v26 = vld [vmem:[%s10049_s5 + $0x194] ss:$24 sps:$4 sm:$0xff]  }
 0x6a3   : > { %4744 = vmatprep.subr.bf16.mxu0 %v7312_v0  ;;  %4908 = vmatprep.subr.bf16.mxu1 %v7315_v61  ;;  %v7380_v0 = vld [vmem:[%s10049_s5 + $0x190] ss:$24 sps:$4 sm:$0xff]  }
 0x6a4   : > { %v7479_v61 = vld [vmem:[%s10051_s7 + $0x10] ss:$8 sps:$4 sm:$0xff]  }
 0x6a5   : > { %4745 = vmatpush1.bf16.msra.mxu0 %v7310_v5  ;;  %4909 = vmatpush1.bf16.msra.mxu1 %v7313_v63  ;;  %v7481_v5 = vld [vmem:[%s10051_s7 + $0x14] ss:$8 sps:$4 sm:$0xff]  }
 0x6a6   : > { %4746 = vmatprep.subr.bf16.mxu0 %v7318_v47  ;;  %4910 = vmatprep.subr.bf16.mxu1 %v7321_v49  ;;  %v7385_v63 = vld [vmem:[%s10049_s5 + $0x1c4] ss:$24 sps:$4 sm:$0xff]   ;;  %v7383_v47 = vld [vmem:[%s10049_s5 + $0x1c0] ss:$24 sps:$4 sm:$0xff]  }
 0x6a7   : > { %v7485_v49 = vld [vmem:[%s10051_s7 + $0x20] ss:$8 sps:$4 sm:$0xff]  }
 0x6a9   : > { %4747 = vmatpush1.bf16.msra.mxu0 %v7316_v7  ;;  %4911 = vmatpush1.bf16.msra.mxu1 %v7319_v25  ;;  %v7487_v7 = vld [vmem:[%s10051_s7 + $0x24] ss:$8 sps:$4 sm:$0xff]  }
 0x6aa   : > { %4748 = vmatprep.subr.bf16.mxu0 %v7324_v44  ;;  %4912 = vmatprep.subr.bf16.mxu1 %v7327_v12  ;;  %v7388_v25 = vld [vmem:[%s10049_s5 + $0x1f4] ss:$24 sps:$4 sm:$0xff]   ;;  %v7386_v44 = vld [vmem:[%s10049_s5 + $0x1f0] ss:$24 sps:$4 sm:$0xff]  }
 0x6ab   : > { %v7491_v12 = vld [vmem:[%s10051_s7 + $0x30] ss:$8 sps:$4 sm:$0xff]  }
 0x6ad   : > { %4749 = vmatpush1.bf16.msra.mxu0 %v7322_v42  ;;  %4913 = vmatpush1.bf16.msra.mxu1 %v7325_v13  ;;  %v7493_v42 = vld [vmem:[%s10051_s7 + $0x34] ss:$8 sps:$4 sm:$0xff]  }
 0x6ae   : > { %4750 = vmatprep.subr.bf16.mxu0 %v7330_v14  ;;  %4914 = vmatprep.subr.bf16.mxu1 %v7333_v15  ;;  %v7391_v13 = vld [vmem:[%s10049_s5 + $0x224] ss:$24 sps:$4 sm:$0xff]   ;;  %v7389_v14 = vld [vmem:[%s10049_s5 + $0x220] ss:$24 sps:$4 sm:$0xff]  }
 0x6af   : > { %v7497_v15 = vld [vmem:[%s10051_s7 + $0x40] ss:$8 sps:$4 sm:$0xff]  }
 0x6b1   : > { %4751 = vmatpush1.bf16.msra.mxu0 %v7328_v1  ;;  %4915 = vmatpush1.bf16.msra.mxu1 %v7331_v18  ;;  %v7499_v1 = vld [vmem:[%s10051_s7 + $0x44] ss:$8 sps:$4 sm:$0xff]  }
 0x6b2   : > { %4752 = vmatprep.subr.bf16.mxu0 %v7336_v19  ;;  %4916 = vmatprep.subr.bf16.mxu1 %v7339_v20  ;;  %v7394_v18 = vld [vmem:[%s10049_s5 + $0x254] ss:$24 sps:$4 sm:$0xff]   ;;  %v7392_v19 = vld [vmem:[%s10049_s5 + $0x250] ss:$24 sps:$4 sm:$0xff]  }
 0x6b3   : > { %v7503_v20 = vld [vmem:[%s10051_s7 + $0x50] ss:$8 sps:$4 sm:$0xff]  }
 0x6b5   : > { %4753 = vmatpush1.bf16.msra.mxu0 %v7334_v46  ;;  %4917 = vmatpush1.bf16.msra.mxu1 %v7337_v21  ;;  %v7505_v46 = vld [vmem:[%s10051_s7 + $0x54] ss:$8 sps:$4 sm:$0xff]  }
 0x6b6   : > { %4754 = vmatprep.subr.bf16.mxu0 %v7342_v56  ;;  %4918 = vmatprep.subr.bf16.mxu1 %v7345_v62  ;;  %v7397_v21 = vld [vmem:[%s10049_s5 + $0x284] ss:$24 sps:$4 sm:$0xff]   ;;  %v7395_v56 = vld [vmem:[%s10049_s5 + $0x280] ss:$24 sps:$4 sm:$0xff]  }
 0x6b7   : > { %v7509_v62 = vld [vmem:[%s10051_s7 + $0x60] ss:$8 sps:$4 sm:$0xff]  }
 0x6b9   : > { %4755 = vmatpush1.bf16.msra.mxu0 %v7340_v50  ;;  %4919 = vmatpush1.bf16.msra.mxu1 %v7343_v10  ;;  %v7511_v50 = vld [vmem:[%s10051_s7 + $0x64] ss:$8 sps:$4 sm:$0xff]  }
 0x6ba   : > { %4756 = vmatprep.subr.bf16.mxu0 %v7348_v22  ;;  %4920 = vmatprep.subr.bf16.mxu1 %v7351_v60  ;;  %v7400_v10 = vld [vmem:[%s10049_s5 + $0x2b4] ss:$24 sps:$4 sm:$0xff]   ;;  %v7398_v22 = vld [vmem:[%s10049_s5 + $0x2b0] ss:$24 sps:$4 sm:$0xff]  }
 0x6bb   : > { %v7515_v60 = vld [vmem:[%s10051_s7 + $0x70] ss:$8 sps:$4 sm:$0xff]  }
 0x6bd   : > { %4757 = vmatpush1.bf16.msra.mxu0 %v7346_v28  ;;  %4921 = vmatpush1.bf16.msra.mxu1 %v7349_v31  ;;  %v7401_v28 = vld [vmem:[%s10049_s5 + $0x2e0] ss:$24 sps:$4 sm:$0xff]  }
 0x6be   : > { %6528 = vmatprep.subr.msk.bf16.mxu0 %vm4600_vm2, %v6523_v32  ;;  %6530 = vmatprep.subr.msk.bf16.mxu1 %vm4600_vm2, %v6525_v6  ;;  %v7521_v31 = vld [vmem:[%s10051_s7 + $0x80] ss:$8 sps:$4 sm:$0xff]   ;;  %v7523_v32 = vld [vmem:[%s10051_s7 + $0x84] ss:$8 sps:$4 sm:$0xff]  }
 0x6bf   : > { %v7406_v6 = vld [vmem:[%s10049_s5 + $0x314] ss:$24 sps:$4 sm:$0xff]  }
 0x6c1   : > { %4759 = vmatpush1.bf16.msra.mxu0 %v4602_v40  ;;  %4923 = vmatpush1.bf16.msra.mxu1 %v4608_v43  ;;  %v7529_v40 = vld [vmem:[%s10051_s7 + $0x94] ss:$8 sps:$4 sm:$0xff]  }
 0x6c2   : > { %4947 = vmatprep.subr.bf16.mxu0 %v7358_v48  ;;  %5679 = vmatprep.subr.bf16.mxu1 %v7475_v58  ;;  %v7409_v43 = vld [vmem:[%s10049_s5 + $0x344] ss:$24 sps:$4 sm:$0xff]   ;;  %v7407_v48 = vld [vmem:[%s10049_s5 + $0x340] ss:$24 sps:$4 sm:$0xff]   ;;  %v7422_v58 = vld [vmem:[%s10049_s5 + $0x430] ss:$24 sps:$4 sm:$0xff]  }
 0x6c4   : > { %4775 = vmatmul.mubr.bf16.vlgmr.msra.gmra.mrb[16].mxu0 %v9306_v52  ;;  %4939 = vmatmul.mubr.bf16.vlgmr.msra.gmra.mrb[12].mxu1 %v9306_v52 }
 0x6c5   : > { %4948 = vmatpush1.bf16.msra.mxu0 %v7356_v8  ;;  %4979 = vmatprep.mubr.bf16.mxu0 %v8740_v38  ;;  %v7365_v38 = vld [vmem:[%s10049_s5 + $0xa0] ss:$24 sps:$4 sm:$0xff]   ;;  %v7535_v8 = vld [vmem:[%s10051_s7 + $0xa4] ss:$8 sps:$4 sm:$0xff]  }
 0x6c6   : > { %4949 = vmatprep.subr.bf16.mxu0 %v7361_v53  ;;  %5680 = vmatpush1.bf16.msra.mxu1 %v7473_v39  ;;  %v7539_v53 = vld [vmem:[%s10051_s7 + $0xb0] ss:$8 sps:$4 sm:$0xff]   ;;  %v7557_v39 = vld [vmem:[%s10051_s7 + $0xe0] ss:$8 sps:$4 sm:$0xff]  }
 0x6c7   : > { %5681 = vmatprep.subr.bf16.mxu1 %v7481_v5  ;;  %v7425_v5 = vld [vmem:[%s10049_s5 + $0x460] ss:$24 sps:$4 sm:$0xff]  }
 0x6c9   : > { %4950 = vmatpush1.bf16.msra.mxu0 %v7359_v27  ;;  %v7541_v27 = vld [vmem:[%s10051_s7 + $0xb4] ss:$8 sps:$4 sm:$0xff]  }
 0x6ca   : > { %4951 = vmatprep.subr.bf16.mxu0 %v7364_v11  ;;  %5682 = vmatpush1.bf16.msra.mxu1 %v7479_v61  ;;  %v7415_v11 = vld [vmem:[%s10049_s5 + $0x3a4] ss:$24 sps:$4 sm:$0xff]   ;;  %v7563_v61 = vld [vmem:[%s10051_s7 + $0xf0] ss:$8 sps:$4 sm:$0xff]  }
 0x6cb   : > { %5683 = vmatprep.subr.bf16.mxu1 %v7487_v7  ;;  %v7433_v7 = vld [vmem:[%s10049_s5 + $0x4c4] ss:$24 sps:$4 sm:$0xff]  }
 0x6cd   : > { %4952 = vmatpush1.bf16.msra.mxu0 %v7362_v23  ;;  %v7413_v23 = vld [vmem:[%s10049_s5 + $0x3a0] ss:$24 sps:$4 sm:$0xff]  }
 0x6ce   : > { %4953 = vmatprep.subr.bf16.mxu0 %v7367_v24  ;;  %5684 = vmatpush1.bf16.msra.mxu1 %v7485_v49  ;;  %v7545_v24 = vld [vmem:[%s10051_s7 + $0xc0] ss:$8 sps:$4 sm:$0xff]  }
 0x6cf   : > { %5685 = vmatprep.subr.bf16.mxu1 %v7493_v42  ;;  %v7428_v49 = vld [vmem:[%s10049_s5 + $0x490] ss:$24 sps:$4 sm:$0xff]   ;;  %v7439_v42 = vld [vmem:[%s10049_s5 + $0x524] ss:$24 sps:$4 sm:$0xff]  }
 0x6d1   : > { %4954 = vmatpush1.bf16.msra.mxu0 %v7365_v38  ;;  %v7547_v38 = vld [vmem:[%s10051_s7 + $0xc4] ss:$8 sps:$4 sm:$0xff]  }
 0x6d2   : > { %4955 = vmatprep.subr.bf16.mxu0 %v7370_v29  ;;  %5686 = vmatpush1.bf16.msra.mxu1 %v7491_v12  ;;  %v7418_v29 = vld [vmem:[%s10049_s5 + $0x3d4] ss:$24 sps:$4 sm:$0xff]   ;;  %v7434_v12 = vld [vmem:[%s10049_s5 + $0x4f0] ss:$24 sps:$4 sm:$0xff]  }
 0x6d3   : > { %5687 = vmatprep.subr.bf16.mxu1 %v7499_v1  ;;  %v7445_v1 = vld [vmem:[%s10049_s5 + $0x584] ss:$24 sps:$4 sm:$0xff]  }
 0x6d5   : > { %4956 = vmatpush1.bf16.msra.mxu0 %v7368_v33  ;;  %v7416_v33 = vld [vmem:[%s10049_s5 + $0x3d0] ss:$24 sps:$4 sm:$0xff]  }
 0x6d6   : > { %4957 = vmatprep.subr.bf16.mxu0 %v7373_v41  ;;  %5688 = vmatpush1.bf16.msra.mxu1 %v7497_v15  ;;  %v7551_v41 = vld [vmem:[%s10051_s7 + $0xd0] ss:$8 sps:$4 sm:$0xff]  }
 0x6d7   : > { %5689 = vmatprep.subr.bf16.mxu1 %v7505_v46  ;;  %v7440_v15 = vld [vmem:[%s10049_s5 + $0x550] ss:$24 sps:$4 sm:$0xff]   ;;  %v7451_v46 = vld [vmem:[%s10049_s5 + $0x5e4] ss:$24 sps:$4 sm:$0xff]  }
 0x6d9   : > { %4958 = vmatpush1.bf16.msra.mxu0 %v7371_v54  ;;  %v7553_v54 = vld [vmem:[%s10051_s7 + $0xd4] ss:$8 sps:$4 sm:$0xff]  }
 0x6da   : > { %4959 = vmatprep.subr.bf16.mxu0 %v7376_v55  ;;  %5690 = vmatpush1.bf16.msra.mxu1 %v7503_v20  ;;  %v7421_v55 = vld [vmem:[%s10049_s5 + $0x404] ss:$24 sps:$4 sm:$0xff]   ;;  %v7446_v20 = vld [vmem:[%s10049_s5 + $0x5b0] ss:$24 sps:$4 sm:$0xff]  }
 0x6db   : > { %5691 = vmatprep.subr.bf16.mxu1 %v7511_v50  ;;  %v7457_v50 = vld [vmem:[%s10049_s5 + $0x644] ss:$24 sps:$4 sm:$0xff]  }
 0x6dd   : > { %4960 = vmatpush1.bf16.msra.mxu0 %v7374_v34  ;;  %v7419_v34 = vld [vmem:[%s10049_s5 + $0x400] ss:$24 sps:$4 sm:$0xff]  }
 0x6de   : > { %4961 = vmatprep.subr.bf16.mxu0 %v7379_v36  ;;  %5692 = vmatpush1.bf16.msra.mxu1 %v7509_v62  ;;  %v7559_v36 = vld [vmem:[%s10051_s7 + $0xe4] ss:$8 sps:$4 sm:$0xff]   ;;  %v7452_v62 = vld [vmem:[%s10049_s5 + $0x610] ss:$24 sps:$4 sm:$0xff]  }
 0x6df   : > { %5693 = vmatprep.subr.bf16.mxu1 %v7517_v4  ;;  %v7466_v4 = vld [vmem:[%s10049_s5 + $0x6d4] ss:$24 sps:$4 sm:$0xff]  }
 0x6e1   : > { %4962 = vmatpush1.bf16.msra.mxu0 %v7377_v16  ;;  %v7424_v16 = vld [vmem:[%s10049_s5 + $0x434] ss:$24 sps:$4 sm:$0xff]  }
 0x6e2   : > { %4963 = vmatprep.subr.bf16.mxu0 %v7382_v26  ;;  %5694 = vmatpush1.bf16.msra.mxu1 %v7515_v60  ;;  %v7565_v26 = vld [vmem:[%s10051_s7 + $0xf4] ss:$8 sps:$4 sm:$0xff]   ;;  %v7458_v60 = vld [vmem:[%s10049_s5 + $0x670] ss:$24 sps:$4 sm:$0xff]  }
 0x6e3   : > { %5695 = vmatprep.subr.bf16.mxu1 %v7523_v32  ;;  %v7472_v32 = vld [vmem:[%s10049_s5 + $0x734] ss:$24 sps:$4 sm:$0xff]  }
 0x6e5   : > { %4964 = vmatpush1.bf16.msra.mxu0 %v7380_v0  ;;  %v7427_v0 = vld [vmem:[%s10049_s5 + $0x464] ss:$24 sps:$4 sm:$0xff]  }
 0x6e6   : > { %4965 = vmatprep.subr.bf16.mxu0 %v7385_v63  ;;  %5696 = vmatpush1.bf16.msra.mxu1 %v7521_v31  ;;  %v7571_v63 = vld [vmem:[%s10051_s7 + $0x104] ss:$8 sps:$4 sm:$0xff]   ;;  %v7467_v31 = vld [vmem:[%s10049_s5 + $0x700] ss:$24 sps:$4 sm:$0xff]  }
 0x6e7   : > { %5697 = vmatprep.subr.bf16.mxu1 %v7529_v40  ;;  %v7484_v40 = vld [vmem:[%s10049_s5 + $0x794] ss:$24 sps:$4 sm:$0xff]  }
 0x6e9   : > { %4966 = vmatpush1.bf16.msra.mxu0 %v7383_v47  ;;  %v7430_v47 = vld [vmem:[%s10049_s5 + $0x494] ss:$24 sps:$4 sm:$0xff]  }
 0x6ea   : > { %4967 = vmatprep.subr.bf16.mxu0 %v7388_v25  ;;  %5698 = vmatpush1.bf16.msra.mxu1 %v7527_v9  ;;  %v7431_v25 = vld [vmem:[%s10049_s5 + $0x4c0] ss:$24 sps:$4 sm:$0xff]  }
 0x6eb   : > { %5699 = vmatprep.subr.bf16.mxu1 %v7535_v8  ;;  %v7476_v9 = vld [vmem:[%s10049_s5 + $0x760] ss:$24 sps:$4 sm:$0xff]   ;;  %v7496_v8 = vld [vmem:[%s10049_s5 + $0x7f4] ss:$24 sps:$4 sm:$0xff]  }
 0x6ed   : > { %4968 = vmatpush1.bf16.msra.mxu0 %v7386_v44  ;;  %v7436_v44 = vld [vmem:[%s10049_s5 + $0x4f4] ss:$24 sps:$4 sm:$0xff]  }
 0x6ee   : > { %4969 = vmatprep.subr.bf16.mxu0 %v7391_v13  ;;  %5700 = vmatpush1.bf16.msra.mxu1 %v7533_v51  ;;  %v7437_v13 = vld [vmem:[%s10049_s5 + $0x520] ss:$24 sps:$4 sm:$0xff]  }
 0x6ef   : > { %5701 = vmatprep.subr.bf16.mxu1 %v7541_v27  ;;  %v7488_v51 = vld [vmem:[%s10049_s5 + $0x7c0] ss:$24 sps:$4 sm:$0xff]   ;;  %v7508_v27 = vld [vmem:[%s10049_s5 + $0x854] ss:$24 sps:$4 sm:$0xff]  }
 0x6f1   : > { %4970 = vmatpush1.bf16.msra.mxu0 %v7389_v14  ;;  %v7442_v14 = vld [vmem:[%s10049_s5 + $0x554] ss:$24 sps:$4 sm:$0xff]  }
 0x6f2   : > { %4971 = vmatprep.subr.bf16.mxu0 %v7394_v18  ;;  %5702 = vmatpush1.bf16.msra.mxu1 %v7539_v53  ;;  %v7443_v18 = vld [vmem:[%s10049_s5 + $0x580] ss:$24 sps:$4 sm:$0xff]  }
 0x6f3   : > { %5703 = vmatprep.subr.bf16.mxu1 %v7547_v38  ;;  %v7500_v53 = vld [vmem:[%s10049_s5 + $0x820] ss:$24 sps:$4 sm:$0xff]   ;;  %v7520_v38 = vld [vmem:[%s10049_s5 + $0x8b4] ss:$24 sps:$4 sm:$0xff]  }
 0x6f5   : > { %4972 = vmatpush1.bf16.msra.mxu0 %v7392_v19  ;;  %v7448_v19 = vld [vmem:[%s10049_s5 + $0x5b4] ss:$24 sps:$4 sm:$0xff]  }
 0x6f6   : > { %4973 = vmatprep.subr.bf16.mxu0 %v7397_v21  ;;  %5704 = vmatpush1.bf16.msra.mxu1 %v7545_v24  ;;  %v7449_v21 = vld [vmem:[%s10049_s5 + $0x5e0] ss:$24 sps:$4 sm:$0xff]  }
 0x6f7   : > { %5705 = vmatprep.subr.bf16.mxu1 %v7553_v54  ;;  %v7512_v24 = vld [vmem:[%s10049_s5 + $0x880] ss:$24 sps:$4 sm:$0xff]   ;;  %v7532_v54 = vld [vmem:[%s10049_s5 + $0x914] ss:$24 sps:$4 sm:$0xff]  }
 0x6f9   : > { %4974 = vmatpush1.bf16.msra.mxu0 %v7395_v56  ;;  %v7454_v56 = vld [vmem:[%s10049_s5 + $0x614] ss:$24 sps:$4 sm:$0xff]  }
 0x6fa   : > { %4975 = vmatprep.subr.bf16.mxu0 %v7400_v10  ;;  %5706 = vmatpush1.bf16.msra.mxu1 %v7551_v41  ;;  %v7455_v10 = vld [vmem:[%s10049_s5 + $0x640] ss:$24 sps:$4 sm:$0xff]  }
 0x6fb   : > { %5707 = vmatprep.subr.bf16.mxu1 %v7559_v36  ;;  %v7524_v41 = vld [vmem:[%s10049_s5 + $0x8e0] ss:$24 sps:$4 sm:$0xff]  }
 0x6fc   : > { %v7536_v36 = vld [vmem:[%s10049_s5 + $0x940] ss:$24 sps:$4 sm:$0xff]  }
 0x6fd   : > { %4976 = vmatpush1.bf16.msra.mxu0 %v7398_v22  ;;  %v7460_v22 = vld [vmem:[%s10049_s5 + $0x674] ss:$24 sps:$4 sm:$0xff]  }
 0x6fe   : > { %4977 = vmatprep.subr.bf16.mxu0 %v7403_v17  ;;  %5708 = vmatpush1.bf16.msra.mxu1 %v7557_v39  ;;  %v7464_v17 = vld [vmem:[%s10049_s5 + $0x6d0] ss:$24 sps:$4 sm:$0xff]   ;;  %v4566_v39 = vlaneseq }
 0x6ff   : > { %5709 = vmatprep.subr.bf16.mxu1 %v7565_v26  ;;  %v7548_v26 = vld [vmem:[%s10049_s5 + $0x9a0] ss:$24 sps:$4 sm:$0xff]  }
 0x701   : > { %4978 = vmatpush1.bf16.msra.mxu0 %v7401_v28  ;;  %v7469_v28 = vld [vmem:[%s10049_s5 + $0x704] ss:$24 sps:$4 sm:$0xff]  }
 0x702   : > { %4988 = vmatprep.subr.bf16.mxu0 %v7406_v6  ;;  %5710 = vmatpush1.bf16.msra.mxu1 %v7563_v61  ;;  %v7470_v6 = vld [vmem:[%s10049_s5 + $0x730] ss:$24 sps:$4 sm:$0xff]  }
 0x703   : > { %5720 = vmatprep.subr.bf16.mxu1 %v7571_v63  ;;  %v9735_v63 = vld [vmem:[%s10050_s6] sm:$0x3f] }
 0x704   : > { %4980 = vmatmul.mubr.bf16.vlgmr.msra.gmra.mrb[20].mxu0 %v8745_v59  ;;  %v7412_v59 = vld [vmem:[%s10049_s5 + $0x374] ss:$24 sps:$4 sm:$0xff]  }
 0x705   : > { %4989 = vmatpush1.bf16.msra.mxu0 %v7404_v35  ;;  %5020 = vmatprep.mubr.bf16.mxu0 %v8812_v30  ;;  %v7410_v30 = vld [vmem:[%s10049_s5 + $0x370] ss:$24 sps:$4 sm:$0xff]   ;;  %v7478_v35 = vld [vmem:[%s10049_s5 + $0x764] ss:$24 sps:$4 sm:$0xff]  }
 0x706   : > { %4990 = vmatprep.subr.bf16.mxu0 %v7409_v43  ;;  %v7482_v43 = vld [vmem:[%s10049_s5 + $0x790] ss:$24 sps:$4 sm:$0xff]  }
 0x709   : > { %4991 = vmatpush1.bf16.msra.mxu0 %v7407_v48  ;;  %v7490_v48 = vld [vmem:[%s10049_s5 + $0x7c4] ss:$24 sps:$4 sm:$0xff]  }
 0x70a   : > { %4992 = vmatprep.subr.bf16.mxu0 %v7412_v59  ;;  %v7494_v59 = vld [vmem:[%s10049_s5 + $0x7f0] ss:$24 sps:$4 sm:$0xff]  }
 0x70d   : > { %4993 = vmatpush1.bf16.msra.mxu0 %v7410_v30  ;;  %v7502_v30 = vld [vmem:[%s10049_s5 + $0x824] ss:$24 sps:$4 sm:$0xff]  }
 0x70e   : > { %4994 = vmatprep.subr.bf16.mxu0 %v7415_v11  ;;  %v7506_v11 = vld [vmem:[%s10049_s5 + $0x850] ss:$24 sps:$4 sm:$0xff]  }
 0x711   : > { %4995 = vmatpush1.bf16.msra.mxu0 %v7413_v23  ;;  %v7514_v23 = vld [vmem:[%s10049_s5 + $0x884] ss:$24 sps:$4 sm:$0xff]  }
 0x712   : > { %4996 = vmatprep.subr.bf16.mxu0 %v7418_v29  ;;  %v7518_v29 = vld [vmem:[%s10049_s5 + $0x8b0] ss:$24 sps:$4 sm:$0xff]  }
 0x715   : > { %4997 = vmatpush1.bf16.msra.mxu0 %v7416_v33  ;;  %v7526_v33 = vld [vmem:[%s10049_s5 + $0x8e4] ss:$24 sps:$4 sm:$0xff]  }
 0x716   : > { %4998 = vmatprep.subr.bf16.mxu0 %v7421_v55  ;;  %v7530_v55 = vld [vmem:[%s10049_s5 + $0x910] ss:$24 sps:$4 sm:$0xff]  }
 0x719   : > { %4999 = vmatpush1.bf16.msra.mxu0 %v7419_v34  ;;  %v7538_v34 = vld [vmem:[%s10049_s5 + $0x944] ss:$24 sps:$4 sm:$0xff]  }
 0x71a   : > { %5000 = vmatprep.subr.bf16.mxu0 %v7424_v16  ;;  %v7544_v16 = vld [vmem:[%s10049_s5 + $0x974] ss:$24 sps:$4 sm:$0xff]  }
 0x71d   : > { %5001 = vmatpush1.bf16.msra.mxu0 %v7422_v58  ;;  %v7542_v58 = vld [vmem:[%s10049_s5 + $0x970] ss:$24 sps:$4 sm:$0xff]  }
 0x71e   : > { %5002 = vmatprep.subr.bf16.mxu0 %v7427_v0  ;;  %v7556_v0 = vld [vmem:[%s10049_s5 + $0x9d4] ss:$24 sps:$4 sm:$0xff]  }
 0x721   : > { %5003 = vmatpush1.bf16.msra.mxu0 %v7425_v5  ;;  %v7554_v5 = vld [vmem:[%s10049_s5 + $0x9d0] ss:$24 sps:$4 sm:$0xff]  }
 0x722   : > { %5004 = vmatprep.subr.bf16.mxu0 %v7430_v47 }
 0x725   : > { %5005 = vmatpush1.bf16.msra.mxu0 %v7428_v49 }
 0x726   : > { %5006 = vmatprep.subr.bf16.mxu0 %v7433_v7  ;;  %v7562_v7 = vld [vmem:[%s10049_s5 + $0xa04] ss:$24 sps:$4 sm:$0xff]  }
 0x729   : > { %5007 = vmatpush1.bf16.msra.mxu0 %v7431_v25 }
 0x72a   : > { %5008 = vmatprep.subr.bf16.mxu0 %v7436_v44 }
 0x72d   : > { %5009 = vmatpush1.bf16.msra.mxu0 %v7434_v12 }
 0x72e   : > { %5010 = vmatprep.subr.bf16.mxu0 %v7439_v42  ;;  %v7560_v42 = vld [vmem:[%s10049_s5 + $0xa00] ss:$24 sps:$4 sm:$0xff]  }
 0x731   : > { %5011 = vmatpush1.bf16.msra.mxu0 %v7437_v13  ;;  %v7568_v13 = vld [vmem:[%s10049_s5 + $0xa34] ss:$24 sps:$4 sm:$0xff]  }
 0x732   : > { %5012 = vmatprep.subr.bf16.mxu0 %v7442_v14 }
 0x735   : > { %5013 = vmatpush1.bf16.msra.mxu0 %v7440_v15 }
 0x736   : > { %5014 = vmatprep.subr.bf16.mxu0 %v7445_v1 }
 0x739   : > { %5015 = vmatpush1.bf16.msra.mxu0 %v7443_v18 }
 0x73a   : > { %5016 = vmatprep.subr.bf16.mxu0 %v7448_v19 }
 0x73d   : > { %5017 = vmatpush1.bf16.msra.mxu0 %v7446_v20 }
 0x73e   : > { %5018 = vmatprep.subr.bf16.mxu0 %v7451_v46 }
 0x741   : > { %5019 = vmatpush1.bf16.msra.mxu0 %v7449_v21 }
 0x742   : > { %5029 = vmatprep.subr.bf16.mxu0 %v7454_v56 }
 0x744   : > { %5021 = vmatmul.mubr.bf16.vlgmr.msra.gmra.mrb[20].mxu0 %v8971_v45  ;;  %v7463_v45 = vld [vmem:[%s10049_s5 + $0x6a4] ss:$24 sps:$4 sm:$0xff]  }
 0x745   : > { %5030 = vmatpush1.bf16.msra.mxu0 %v7452_v62  ;;  %5061 = vmatprep.mubr.bf16.mxu0 %v9182_v57  ;;  %v7461_v57 = vld [vmem:[%s10049_s5 + $0x6a0] ss:$24 sps:$4 sm:$0xff]   ;;  %v7566_v62 = vld [vmem:[%s10049_s5 + $0xa30] ss:$24 sps:$4 sm:$0xff]  }
 0x746   : > { %5031 = vmatprep.subr.bf16.mxu0 %v7457_v50 }
 0x749   : > { %5032 = vmatpush1.bf16.msra.mxu0 %v7455_v10 }
 0x74a   : > { %5033 = vmatprep.subr.bf16.mxu0 %v7460_v22 }
 0x74d   : > { %5034 = vmatpush1.bf16.msra.mxu0 %v7458_v60  ;;  %v7574_v60 = vld [vmem:[%s10049_s5 + $0xa64] ss:$24 sps:$4 sm:$0xff]  }
 0x74e   : > { %5035 = vmatprep.subr.bf16.mxu0 %v7463_v45 }
 0x751   : > { %5036 = vmatpush1.bf16.msra.mxu0 %v7461_v57  ;;  %v2868_v57 = vld [vmem:[%s10049_s5 + $0xa90] sm:$0x33] }
 0x752   : > { %5037 = vmatprep.subr.bf16.mxu0 %v7466_v4 }
 0x755   : > { %5038 = vmatpush1.bf16.msra.mxu0 %v7464_v17 }
 0x756   : > { %5039 = vmatprep.subr.bf16.mxu0 %v7469_v28  ;;  %v7569_v28 = vld [vmem:[%s10051_s7 + $0x100] ss:$8 sps:$4 sm:$0xff]  }
 0x759   : > { %5040 = vmatpush1.bf16.msra.mxu0 %v7467_v31  ;;  %v7572_v31 = vld [vmem:[%s10049_s5 + $0xa60] ss:$24 sps:$4 sm:$0xff]  }
 0x75a   : > { %5041 = vmatprep.subr.bf16.mxu0 %v7472_v32 }
 0x75d   : > { %5042 = vmatpush1.bf16.msra.mxu0 %v7470_v6  ;;  %v7577_v6 = vld [vmem:[%s10051_s7 + $0x114] ss:$8 sps:$4 sm:$0xff]  }
 0x75e   : > { %5043 = vmatprep.subr.bf16.mxu0 %v7478_v35  ;;  %v6526_v35 = vcombine.low %v2868_v57, %v2868_v57 }
 0x761   : > { %5044 = vmatpush1.bf16.msra.mxu0 %v7476_v9  ;;  %v6527_v9 = vcombine.high %v2868_v57, %v2868_v57  ;;  %v7645_v57 = vld [vmem:[%s10051_s7 + $0x274] ss:$8 sps:$4 sm:$0xff]  }
 0x762   : > { %5045 = vmatprep.subr.bf16.mxu0 %v7484_v40 }
 0x765   : > { %5046 = vmatpush1.bf16.msra.mxu0 %v7482_v43  ;;  %v7575_v43 = vld [vmem:[%s10051_s7 + $0x110] ss:$8 sps:$4 sm:$0xff]  }
 0x766   : > { %5047 = vmatprep.subr.bf16.mxu0 %v7490_v48  ;;  %v4614_v48 = vsel %vm4600_vm2, %v6526_v35, 0  ;;  %v7661_v35 = vld [vmem:[%s10053_s9] sm:$0xff]  }
 0x769   : > { %5048 = vmatpush1.bf16.msra.mxu0 %v7488_v51  ;;  %v7582_v51 = vld [vmem:[%s10051_s7 + $0x124] ss:$8 sps:$4 sm:$0xff]  }
 0x76a   : > { %5049 = vmatprep.subr.bf16.mxu0 %v7496_v8  ;;  %v7580_v8 = vld [vmem:[%s10051_s7 + $0x120] ss:$8 sps:$4 sm:$0xff]  }
 0x76d   : > { %5050 = vmatpush1.bf16.msra.mxu0 %v7494_v59  ;;  %v7585_v59 = vld [vmem:[%s10051_s7 + $0x134] ss:$8 sps:$4 sm:$0xff]  }
 0x76e   : > { %5051 = vmatprep.subr.bf16.mxu0 %v7502_v30  ;;  %v7583_v30 = vld [vmem:[%s10051_s7 + $0x130] ss:$8 sps:$4 sm:$0xff]  }
 0x771   : > { %5052 = vmatpush1.bf16.msra.mxu0 %v7500_v53  ;;  %v7588_v53 = vld [vmem:[%s10051_s7 + $0x144] ss:$8 sps:$4 sm:$0xff]  }
 0x772   : > { %5053 = vmatprep.subr.bf16.mxu0 %v7508_v27  ;;  %v7586_v27 = vld [vmem:[%s10051_s7 + $0x140] ss:$8 sps:$4 sm:$0xff]  }
 0x775   : > { %5054 = vmatpush1.bf16.msra.mxu0 %v7506_v11  ;;  %v7589_v11 = vld [vmem:[%s10051_s7 + $0x150] ss:$8 sps:$4 sm:$0xff]  }
 0x776   : > { %5055 = vmatprep.subr.bf16.mxu0 %v7514_v23  ;;  %v7594_v23 = vld [vmem:[%s10051_s7 + $0x164] ss:$8 sps:$4 sm:$0xff]  }
 0x779   : > { %5056 = vmatpush1.bf16.msra.mxu0 %v7512_v24  ;;  %v7592_v24 = vld [vmem:[%s10051_s7 + $0x160] ss:$8 sps:$4 sm:$0xff]  }
 0x77a   : > { %5057 = vmatprep.subr.bf16.mxu0 %v7520_v38  ;;  %v7597_v38 = vld [vmem:[%s10051_s7 + $0x174] ss:$8 sps:$4 sm:$0xff]  }
 0x77d   : > { %5058 = vmatpush1.bf16.msra.mxu0 %v7518_v29  ;;  %v7595_v29 = vld [vmem:[%s10051_s7 + $0x170] ss:$8 sps:$4 sm:$0xff]  }
 0x77e   : > { %5059 = vmatprep.subr.bf16.mxu0 %v7526_v33  ;;  %v7600_v33 = vld [vmem:[%s10051_s7 + $0x184] ss:$8 sps:$4 sm:$0xff]  }
 0x781   : > { %5060 = vmatpush1.bf16.msra.mxu0 %v7524_v41  ;;  %v7598_v41 = vld [vmem:[%s10051_s7 + $0x180] ss:$8 sps:$4 sm:$0xff]  }
 0x782   : > { %5070 = vmatprep.subr.bf16.mxu0 %v7532_v54  ;;  %v7603_v54 = vld [vmem:[%s10051_s7 + $0x194] ss:$8 sps:$4 sm:$0xff]  }
 0x784   : > { %5062 = vmatmul.mubr.bf16.vlgmr.msra.gmra.mrb[20].mxu0 %v9178_v37  ;;  %v7550_v37 = vld [vmem:[%s10049_s5 + $0x9a4] ss:$24 sps:$4 sm:$0xff]  }
 0x785   : > { %5071 = vmatpush1.bf16.msra.mxu0 %v7530_v55  ;;  %6533 = vmatprep.mubr.msk.bf16.mxu0 %vm4596_vm1, %v9200_v3  ;;  %v9720_v3 = vshrl.u32 %v4566_v39, 7  ;;  %v7601_v55 = vld [vmem:[%s10051_s7 + $0x190] ss:$8 sps:$4 sm:$0xff]  }
 0x786   : > { %5072 = vmatprep.subr.bf16.mxu0 %v7538_v34  ;;  %v7606_v34 = vld [vmem:[%s10051_s7 + $0x1a4] ss:$8 sps:$4 sm:$0xff]   ;;  %v7607_v39 = vld [vmem:[%s10051_s7 + $0x1b0] ss:$8 sps:$4 sm:$0xff]  }
 0x787   : > { %v4568_v61 = vsub.s32 0, %v9720_v3  ;;  %v4572_v47 = vsub.s32 1, %v9720_v3  ;;  %v4580_v49 = vsub.s32 3, %v9720_v3 }
 0x789   : > { %5073 = vmatpush1.bf16.msra.mxu0 %v7536_v36  ;;  %v4569_v25 = vrot.slane %v9735_v63, %v4568_v61  ;;  %v4573_v44 = vrot.slane %v9735_v63, %v4572_v47  ;;  %v4581_v12 = vrot.slane %v9735_v63, %v4580_v49  ;;  %v7604_v36 = vld [vmem:[%s10051_s7 + $0x1a0] ss:$8 sps:$4 sm:$0xff]  }
 0x78a   : > { %5074 = vmatprep.subr.bf16.mxu0 %v7544_v16  ;;  %v7609_v16 = vld [vmem:[%s10051_s7 + $0x1b4] ss:$8 sps:$4 sm:$0xff]  }
 0x78d   : > { %5075 = vmatpush1.bf16.msra.mxu0 %v7542_v58  ;;  %v7612_v58 = vld [vmem:[%s10051_s7 + $0x1c4] ss:$8 sps:$4 sm:$0xff]  }
 0x78e   : > { %5076 = vmatprep.subr.bf16.mxu0 %v7550_v37  ;;  %v7610_v37 = vld [vmem:[%s10051_s7 + $0x1c0] ss:$8 sps:$4 sm:$0xff]  }
 0x791   : > { %5077 = vmatpush1.bf16.msra.mxu0 %v7548_v26  ;;  %v4576_v26 = vsub.s32 2, %v9720_v3 }
 0x792   : > { %5078 = vmatprep.subr.bf16.mxu0 %v7556_v0  ;;  %v7615_v0 = vld [vmem:[%s10051_s7 + $0x1d4] ss:$8 sps:$4 sm:$0xff]  }
 0x793   : > { %v4577_v49 = vrot.slane %v9735_v63, %v4576_v26  ;;  %v5213_v26 = vld [vmem:[%s10052_s8] sm:$0x3] }
 0x795   : > { %5079 = vmatpush1.bf16.msra.mxu0 %v7554_v5  ;;  %v7613_v5 = vld [vmem:[%s10051_s7 + $0x1d0] ss:$8 sps:$4 sm:$0xff]  }
 0x796   : > { %5080 = vmatprep.subr.bf16.mxu0 %v7562_v7  ;;  %v7618_v7 = vld [vmem:[%s10051_s7 + $0x1e4] ss:$8 sps:$4 sm:$0xff]  }
 0x797   : > { %v4776_v14 = vpop.f32.mrb[16].mxu0  ;;  %v9755_v15 = vpop.f32.mrb[12].mxu1 }
 0x798   : > { %v6638_v1 = vadd.f32 %v4776_v14, %v4569_v25  ;;  %v4778_v18 = vpop.f32.mrb[17].mxu0  ;;  %v4942_v19 = vpop.f32.mrb[13].mxu1  ;;  %v7616_v25 = vld [vmem:[%s10051_s7 + $0x1e0] ss:$8 sps:$4 sm:$0xff]   ;;  %v7624_v14 = vld [vmem:[%s10051_s7 + $0x204] ss:$8 sps:$4 sm:$0xff]  }
 0x799   : > { %v6639_v20 = vadd.f32 %v4778_v18, %v4573_v44  ;;  %v6641_v46 = vadd.f32 %v4942_v19, %v4581_v12  ;;  %v4780_v21 = vpop.f32.mrb[18].mxu0  ;;  %v4944_v56 = vpop.f32.mrb[14].mxu1  ;;  %5081 = vmatpush1.bf16.msra.mxu0 %v7560_v42  ;;  %v6640_v44 = vadd.f32 %v9755_v15, %v4577_v49  ;;  %v7621_v12 = vld [vmem:[%s10051_s7 + $0x1f4] ss:$8 sps:$4 sm:$0xff]   ;;  %v7619_v42 = vld [vmem:[%s10051_s7 + $0x1f0] ss:$8 sps:$4 sm:$0xff]  }
 0x79a   : > { %v5111_v50 = vmax.f32 %v6638_v1, 0.0  ;;  %v4781_v10 = vpop.f32.mrb[19].mxu0  ;;  %v4945_v22 = vpop.f32.mrb[15].mxu1  ;;  %5082 = vmatprep.subr.bf16.mxu0 %v7568_v13  ;;  %v7622_v15 = vld [vmem:[%s10051_s7 + $0x200] ss:$8 sps:$4 sm:$0xff]  }
 0x79b   : > { %v5112_v45 = vmax.f32 %v6639_v20, 0.0  ;;  %v5114_v4 = vmax.f32 %v6641_v46, 0.0  ;;  %v5113_v13 = vmax.f32 %v6640_v44, 0.0  ;;  %v7627_v18 = vld [vmem:[%s10051_s7 + $0x214] ss:$8 sps:$4 sm:$0xff]  }
 0x79c   : > { %v5117_v32 = vpack.c.bf16 %v5111_v50, %v5111_v50  ;;  %v7625_v19 = vld [vmem:[%s10051_s7 + $0x210] ss:$8 sps:$4 sm:$0xff]   ;;  %v7630_v20 = vld [vmem:[%s10051_s7 + $0x224] ss:$8 sps:$4 sm:$0xff]   ;;  %v7628_v46 = vld [vmem:[%s10051_s7 + $0x220] ss:$8 sps:$4 sm:$0xff]  }
 0x79d   : > { %v5118_v17 = vpack.c.bf16 %v5112_v45, %v5112_v45  ;;  %5083 = vmatpush1.bf16.msra.mxu0 %v7566_v62  ;;  %v5120_v40 = vpack.c.bf16 %v5114_v4, %v5114_v4  ;;  %v5119_v1 = vpack.c.bf16 %v5113_v13, %v5113_v13  ;;  %v7633_v21 = vld [vmem:[%s10051_s7 + $0x234] ss:$8 sps:$4 sm:$0xff]   ;;  %v7631_v56 = vld [vmem:[%s10051_s7 + $0x230] ss:$8 sps:$4 sm:$0xff]   ;;  %v7636_v62 = vld [vmem:[%s10051_s7 + $0x244] ss:$8 sps:$4 sm:$0xff]  }
 0x79e   : > { %5084 = vmatprep.subr.bf16.mxu0 %v7574_v60  ;;  %v7634_v50 = vld [vmem:[%s10051_s7 + $0x240] ss:$8 sps:$4 sm:$0xff]   ;;  %v7639_v10 = vld [vmem:[%s10051_s7 + $0x254] ss:$8 sps:$4 sm:$0xff]   ;;  %v7637_v22 = vld [vmem:[%s10051_s7 + $0x250] ss:$8 sps:$4 sm:$0xff]  }
 0x79f   : > { %5711 = vmatprep.mubr.bf16.mxu1 %v5118_v17  ;;  %v7642_v60 = vld [vmem:[%s10051_s7 + $0x264] ss:$8 sps:$4 sm:$0xff]   ;;  %v7640_v45 = vld [vmem:[%s10051_s7 + $0x260] ss:$8 sps:$4 sm:$0xff]   ;;  %v7643_v4 = vld [vmem:[%s10051_s7 + $0x270] ss:$8 sps:$4 sm:$0xff]  }
 0x7a0   : > { %5712 = vmatmul.mubr.bf16.vlgmr.msra.gmra.mrb[16].mxu1 %v5117_v32  ;;  %v7648_v17 = vld [vmem:[%s10051_s7 + $0x284] ss:$8 sps:$4 sm:$0xff]   ;;  %v7649_v32 = vld [vmem:[%s10051_s7 + $0x290] ss:$8 sps:$4 sm:$0xff]  }
 0x7a1   : > { %5721 = vmatpush1.bf16.msra.mxu1 %v7569_v28  ;;  %5085 = vmatpush1.bf16.msra.mxu0 %v7572_v31  ;;  %v7646_v28 = vld [vmem:[%s10051_s7 + $0x280] ss:$8 sps:$4 sm:$0xff]   ;;  %v7651_v31 = vld [vmem:[%s10051_s7 + $0x294] ss:$8 sps:$4 sm:$0xff]  }
 0x7a2   : > { %5752 = vmatprep.mubr.bf16.mxu1 %v5120_v40  ;;  %5722 = vmatprep.subr.bf16.mxu1 %v7577_v6  ;;  %v7654_v6 = vld [vmem:[%s10051_s7 + $0x2a4] ss:$8 sps:$4 sm:$0xff]   ;;  %v7657_v40 = vld [vmem:[%s10051_s7 + $0x2b4] ss:$8 sps:$4 sm:$0xff]  }
 0x7a3   : > { %6532 = vmatprep.subr.msk.bf16.mxu0 %vm4600_vm2, %v6527_v9  ;;  %v7652_v9 = vld [vmem:[%s10051_s7 + $0x2a0] ss:$8 sps:$4 sm:$0xff]  }
 0x7a5   : > { %5723 = vmatpush1.bf16.msra.mxu1 %v7575_v43  ;;  %5087 = vmatpush1.bf16.msra.mxu0 %v4614_v48  ;;  %v7662_v43 = vld [vmem:[%s10053_s9 + $0x8] sm:$0xff]   ;;  %v7655_v48 = vld [vmem:[%s10051_s7 + $0x2b0] ss:$8 sps:$4 sm:$0xff]  }
 0x7a6   : > { %5724 = vmatprep.subr.bf16.mxu1 %v7582_v51  ;;  %5882 = vmatprep.subr.bf16.mxu0 %v7734_v2  ;;  %v7660_v51 = vld [vmem:[%s10051_s7 + $0x2c4] ss:$8 sps:$4 sm:$0xff]  }
 0x7a8   : > { %5103 = vmatmul.mubr.bf16.vlgmr.msra.gmra.mrb[20].mxu0 %v9306_v52  ;;  %v7591_v52 = vld [vmem:[%s10051_s7 + $0x154] ss:$8 sps:$4 sm:$0xff]  }
 0x7a9   : > { %5725 = vmatpush1.bf16.msra.mxu1 %v7580_v8  ;;  %5883 = vmatpush1.bf16.msra.mxu0 %v7661_v35  ;;  %v7663_v8 = vld [vmem:[%s10053_s9 + $0x10] sm:$0xff]  }
 0x7aa   : > { %5726 = vmatprep.subr.bf16.mxu1 %v7585_v59  ;;  %5884 = vmatprep.subr.bf16.mxu0 %v7734_v2  ;;  %v7658_v59 = vld [vmem:[%s10051_s7 + $0x2c0] ss:$8 sps:$4 sm:$0xff]  }
 0x7ad   : > { %5727 = vmatpush1.bf16.msra.mxu1 %v7583_v30  ;;  %5885 = vmatpush1.bf16.msra.mxu0 %v7662_v43  ;;  %v7664_v30 = vld [vmem:[%s10053_s9 + $0x18] sm:$0xff]  }
 0x7ae   : > { %5728 = vmatprep.subr.bf16.mxu1 %v7588_v53  ;;  %5886 = vmatprep.subr.bf16.mxu0 %v7734_v2  ;;  %v7665_v53 = vld [vmem:[%s10053_s9 + $0x20] sm:$0xff]  }
 0x7b1   : > { %5729 = vmatpush1.bf16.msra.mxu1 %v7586_v27  ;;  %5887 = vmatpush1.bf16.msra.mxu0 %v7663_v8  ;;  %v7666_v27 = vld [vmem:[%s10053_s9 + $0x28] sm:$0xff]  }
 0x7b2   : > { %5730 = vmatprep.subr.bf16.mxu1 %v7591_v52  ;;  %5888 = vmatprep.subr.bf16.mxu0 %v7734_v2  ;;  %v7667_v52 = vld [vmem:[%s10053_s9 + $0x30] sm:$0xff]  }
 0x7b5   : > { %5731 = vmatpush1.bf16.msra.mxu1 %v7589_v11  ;;  %5889 = vmatpush1.bf16.msra.mxu0 %v7664_v30  ;;  %v4584_v11 = vsub.s32 4, %v9720_v3 }
 0x7b6   : > { %5732 = vmatprep.subr.bf16.mxu1 %v7594_v23  ;;  %5890 = vmatprep.subr.bf16.mxu0 %v7734_v2  ;;  %v4588_v23 = vsub.s32 5, %v9720_v3  ;;  %v5824_v3 = vld [vmem:[%s10054_s10] sm:$0x1] }
 0x7b9   : > { %5733 = vmatpush1.bf16.msra.mxu1 %v7592_v24  ;;  %5891 = vmatpush1.bf16.msra.mxu0 %v7665_v53  ;;  %v4585_v24 = vrot.slane %v9735_v63, %v4584_v11 }
 0x7ba   : > { %5734 = vmatprep.subr.bf16.mxu1 %v7597_v38  ;;  %5892 = vmatprep.subr.bf16.mxu0 %v7734_v2  ;;  %v4589_v38 = vrot.slane %v9735_v63, %v4588_v23  ;;  %v7669_v63 = vld [vmem:[%s10053_s9 + $0x40] sm:$0xff]  }
 0x7bd   : > { %5735 = vmatpush1.bf16.msra.mxu1 %v7595_v29  ;;  %5893 = vmatpush1.bf16.msra.mxu0 %v7666_v27 }
 0x7be   : > { %5736 = vmatprep.subr.bf16.mxu1 %v7600_v33  ;;  %5894 = vmatprep.subr.bf16.mxu0 %v7734_v2 }
 0x7c1   : > { %5737 = vmatpush1.bf16.msra.mxu1 %v7598_v41  ;;  %5895 = vmatpush1.bf16.msra.mxu0 %v7667_v52 }
 0x7c2   : > { %5738 = vmatprep.subr.bf16.mxu1 %v7603_v54  ;;  %5896 = vmatprep.subr.bf16.mxu0 %v7734_v2 }
 0x7c5   : > { %5739 = vmatpush1.bf16.msra.mxu1 %v7601_v55 }
 0x7c6   : > { %5740 = vmatprep.subr.bf16.mxu1 %v7606_v34 }
 0x7c9   : > { %5741 = vmatpush1.bf16.msra.mxu1 %v7604_v36 }
 0x7ca   : > { %5742 = vmatprep.subr.bf16.mxu1 %v7609_v16 }
 0x7cd   : > { %5743 = vmatpush1.bf16.msra.mxu1 %v7607_v39 }
 0x7ce   : > { %5744 = vmatprep.subr.bf16.mxu1 %v7612_v58 }
 0x7d1   : > { %5745 = vmatpush1.bf16.msra.mxu1 %v7610_v37  ;;  %v7668_v37 = vld [vmem:[%s10053_s9 + $0x38] sm:$0xff]  }
 0x7d2   : > { %5746 = vmatprep.subr.bf16.mxu1 %v7615_v0  ;;  %5897 = vmatpush1.bf16.msra.mxu0 %v7668_v37  ;;  %v5668_v0 = vrot.slane %v5213_v26, %v4568_v61 }
 0x7d3   : > { %5898 = vmatprep.subr.bf16.mxu0 %v7734_v2 }
 0x7d5   : > { %5747 = vmatpush1.bf16.msra.mxu1 %v7613_v5  ;;  %v5672_v5 = vrot.slane %v5213_v26, %v4572_v47 }
 0x7d6   : > { %5748 = vmatprep.subr.bf16.mxu1 %v7618_v7  ;;  %5899 = vmatpush1.bf16.msra.mxu0 %v7669_v63 }
 0x7d9   : > { %5749 = vmatpush1.bf16.msra.mxu1 %v7616_v25 }
 0x7da   : > { %5750 = vmatprep.subr.bf16.mxu1 %v7621_v12 }
 0x7dd   : > { %5751 = vmatpush1.bf16.msra.mxu1 %v7619_v42 }
 0x7de   : > { %5761 = vmatprep.subr.bf16.mxu1 %v7624_v14 }
 0x7e0   : > { %5753 = vmatmul.mubr.bf16.vlgmr.msra.gmra.mrb[16].mxu1 %v5119_v1 }
 0x7e1   : > { %5762 = vmatpush1.bf16.msra.mxu1 %v7622_v15 }
 0x7e2   : > { %5763 = vmatprep.subr.bf16.mxu1 %v7627_v18 }
 0x7e5   : > { %5764 = vmatpush1.bf16.msra.mxu1 %v7625_v19 }
 0x7e6   : > { %5765 = vmatprep.subr.bf16.mxu1 %v7630_v20 }
 0x7e9   : > { %5766 = vmatpush1.bf16.msra.mxu1 %v7628_v46 }
 0x7ea   : > { %5767 = vmatprep.subr.bf16.mxu1 %v7633_v21 }
 0x7ed   : > { %5768 = vmatpush1.bf16.msra.mxu1 %v7631_v56 }
 0x7ee   : > { %5769 = vmatprep.subr.bf16.mxu1 %v7636_v62 }
 0x7f1   : > { %5770 = vmatpush1.bf16.msra.mxu1 %v7634_v50 }
 0x7f2   : > { %5771 = vmatprep.subr.bf16.mxu1 %v7639_v10 }
 0x7f5   : > { %5772 = vmatpush1.bf16.msra.mxu1 %v7637_v22 }
 0x7f6   : > { %5773 = vmatprep.subr.bf16.mxu1 %v7642_v60 }
 0x7f9   : > { %5774 = vmatpush1.bf16.msra.mxu1 %v7640_v45 }
 0x7fa   : > { %5775 = vmatprep.subr.bf16.mxu1 %v7645_v57 }
 0x7fd   : > { %5776 = vmatpush1.bf16.msra.mxu1 %v7643_v4 }
 0x7fe   : > { %5777 = vmatprep.subr.bf16.mxu1 %v7648_v17 }
 0x801   : > { %5778 = vmatpush1.bf16.msra.mxu1 %v7646_v28 }
 0x802   : > { %5779 = vmatprep.subr.bf16.mxu1 %v7651_v31 }
 0x805   : > { %5780 = vmatpush1.bf16.msra.mxu1 %v7649_v32 }
 0x806   : > { %5781 = vmatprep.subr.bf16.mxu1 %v7654_v6 }
 0x809   : > { %5782 = vmatpush1.bf16.msra.mxu1 %v7652_v9 }
 0x80a   : > { %5783 = vmatprep.subr.bf16.mxu1 %v7657_v40 }
 0x80d   : > { %5784 = vmatpush1.bf16.msra.mxu1 %v7655_v48 }
 0x80e   : > { %5785 = vmatprep.subr.bf16.mxu1 %v7660_v51 }
 0x811   : > { %5786 = vmatpush1.bf16.msra.mxu1 %v7658_v59 }
 0x87b   : > { %v5104_v29 = vpop.f32.mrb[20].mxu0 }
 0x87c   : > { %v6642_v33 = vadd.f32 %v5104_v29, %v4585_v24  ;;  %v5106_v41 = vpop.f32.mrb[21].mxu0 }
 0x87d   : > { %v6643_v54 = vadd.f32 %v5106_v41, %v4589_v38  ;;  %v5108_v55 = vpop.f32.mrb[22].mxu0 }
 0x87e   : > { %v5115_v34 = vmax.f32 %v6642_v33, 0.0  ;;  %v5109_v36 = vpop.f32.mrb[23].mxu0 }
 0x87f   : > { %v5116_v16 = vmax.f32 %v6643_v54, 0.0 }
 0x880   : > { %v5121_v58 = vpack.c.bf16 %v5115_v34, %v5115_v34 }
 0x881   : > { %v5122_v39 = vpack.c.bf16 %v5116_v16, %v5116_v16 }
 0x883   : > { %6624 = vmatprep.mubr.msk.bf16.mxu1 %vm5675_vm3, %v5122_v39 }
 0x884   : > { %5794 = vmatmul.mubr.bf16.vlgmr.msra.gmra.mrb[16].mxu1 %v5121_v58 }
 0x957   : > { %v5795_v49 = vpop.f32.mrb[16].mxu1 }
 0x958   : > { %v6644_v7 = vadd.f32 %v5795_v49, %v5668_v0  ;;  %v5797_v2 = vpop.f32.mrb[17].mxu1 }
 0x959   : > { %v6645_v25 = vadd.f32 %v5797_v2, %v5672_v5  ;;  %v5799_v44 = vpop.f32.mrb[18].mxu1 }
 0x95a   : > { %v5802_v12 = vmax.f32 %v6644_v7, 0.0  ;;  %v5800_v42 = vpop.f32.mrb[19].mxu1 }
 0x95b   : > { %v5803_v13 = vmax.f32 %v6645_v25, 0.0 }
 0x95c   : > { %v5804_v15 = vpack.c.bf16 %v5802_v12, %v5802_v12 }
 0x95d   : > { %v5805_v14 = vpack.c.bf16 %v5803_v13, %v5803_v13 }
 0x95f   : > { %6634 = vmatprep.mubr.msk.bf16.mxu0 %vm2443_vm4, %v5805_v14 }
 0x960   : > { %5915 = vmatmul.mubr.bf16.vlgmr.msra.gmra.mrb[24].mxu0 %v5804_v15 }
 0xa33   : > { %v5916_v61 = vpop.f32.mrb[24].mxu0 }
 0xa34   : > { %v5917_v47 = vadd.f32 %v5916_v61, %v5824_v3  ;;  %v5918_v1 = vpop.f32.mrb[25].mxu0 }
 0xa35   : > { %v5919_v18 = vpop.f32.mrb[26].mxu0 }
 0xa36   : > { %v5920_v19 = vpop.f32.mrb[27].mxu0  ;;  %5923 = vst.msk [vmem:[%s378_s30] sm:$0x1] %vm5922_vm5, %v5917_v47 }
 0xa37   : > { %7683 = shalt.err (!%p7680_p3)
}
 0xa38   : > { %s7684_s29 = scalar_lea.hbm %s10002_s13, 16  ;;  %s7688_s30 = scalar_lea.hbm %s10055_s11, 32 }
 0xa39   : > { %p7685_p4 = scmp.ne.s32.totalorder %s10002_s13, %s7684_s29  ;;  %p7689_p9 = scmp.lt.u32.totalorder %s10002_s13, %s10055_s11 }
 0xa3a   : > { %p7690_p10 = scmp.lt.u32.totalorder %s7688_s30, %s7684_s29  ;;  %p7692_p12 = scmp.lt.u32.totalorder %s7684_s29, %s10002_s13 }
 0xa3b   : > { %p7686_p7 = pnand %p7685_p4, %p7853_p5 }
 0xa3c   : > { %p7691_p11 = por %p7690_p10, %p7689_p9 }
 0xa3d   : > { %p7687_p8 = pneg %p7686_p7 }
 0xa3e   : > { %p7693_p13 = por %p7692_p12, %p7691_p11 }
 0xa40   : > { %p7694_p0 = pnand %p7693_p13, %p7687_p8 }
 0xa42   : > { %7697 = shalt.err (!%p7694_p0)
}
 0xa43   : > { %6835 = dma.vmem_to_hbm [thread:$0]  (%p7853_p5), %s10004_s25, 16, %s10002_s13, %s5925_s21  }
 0xa44 PF: > { %p6841_p1 = scmp.ge.s32.totalorder %s7732_s20, 2  ;;  %s5949_s12 = sand.u32 1, %s7720_s17  }
 0xa45   : > { %s5950_s16 = scalar_lea.sflag [#allocation5], %s5949_s12 }
 0xa46   : > { %p6838_p2 = pnand %p6841_p1, %p7857_p6 }
 0xa48   : > { %7715 = dma.done.wait (!%p6838_p2), %s5950_s16, 16  }
 0xa49   : > { %7717 = vsyncadd (!%p6838_p2), %s5950_s16, 4294967280  ;;  %s10068_s19 = sld [smem:[#allocation7_spill]]  ;;  %s10069_s22 = sld [smem:[#allocation8_spill]] }
 0xa4a   : > { %p21_p3 = scmp.ge.s32.totalorder %s7840_s23, 4   ;;  %s10070_s17 = smov %s7724_s18 }
 0xa4b   : > { %s10073_s20 = smov %s7840_s23 }
 0xa4c   :  { %23 = sbr.rel (!%p21_p3) target bundleno = 3 (0x3), region = 110 }
 0xa4f   : > { %s10071_s18 = smov %s10068_s19  ;;  %s10072_s19 = smov %s10069_s22 }
 0xa53   :  { %5954 = vsyncpa [#allocation5], 1 }
 0xa54   :  { %5956 = vsyncpa [#allocation5 + $0x1], 1 }

</bundles_post_ra>
